<compile_context>
chip_gen: v7x
topology: tpu7x:2x2x1
jax: 0.10.0
libtpu: 0.0.40
codegen_flags: <defaults>
</compile_context>

<pallas_src>
import math
import functools

import jax
import jax.numpy as jnp
from jax.experimental import pallas as pl
from jax.experimental.pallas import tpu as pltpu

# ---------------- config (small, consistent with the module) ----------------
B = 16         # batch_size
L = 8          # max_history_num
D = 64         # news_embedding_dim
H = 4          # head_num
DK = 16        # head_dim (d_k == d_v)
DV = 16
A = 32         # attention_dim
NEWS_NUM = 3   # candidate news per user


def _pick_block_b(b, l):
    """Users per grid step.

    rows = block_b * l feeds every row-wise matmul; we want it >= the MXU row tile
    and as few grid steps as possible (per-step overhead ~0.35us dominates at this
    size).  v5e/v6e have a single TensorCore -> one fat step.  v7x has two TCs ->
    keep >= 2 'parallel' steps so both cores get work.  VMEM is not a constraint
    here (<1 MB per step), so no vmem_limit_bytes.
    """
    kind = ""
    try:
        kind = jax.devices()[0].device_kind.lower()
    except Exception:
        pass
    two_tc = "v7" in kind
    bt = -(-b // 2) if (two_tc and b > 1) else b
    cap = max(1, 1024 // max(l, 1))   # soft cap on rows/step for very large batches
    return max(1, min(bt, cap))


def _user_encoder_kernel(hist_ref, mask_ref,
                         wqkv_ref, bqkv_ref, wa_ref, ba_ref,
                         w1_ref, b1_ref, w2_ref,
                         o_ref, *, bt, seq, heads, dk, dv):
    """One grid step == `bt` users.

    hist_ref : (bt, L, D)  bf16 history news embeddings (news_encoder output)
    mask_ref : (bt, L)     f32 history mask (0 => masked-out key)
    o_ref    : (bt, D)     f32 pooled user representations (lane-dense slab)
    """
    rows = bt * seq
    hd = heads * dk
    d_in = hist_ref.shape[-1]
    d_out = o_ref.shape[-1]

    x = hist_ref[...].reshape(rows, d_in)                              # bf16 [rows, D]

    # Additive key-mask bias, built and broadcast ONCE (hoisted out of head loop).
    m = mask_ref[...]                                                  # [bt, L] f32
    bias_row = jnp.where(m == 0.0, jnp.float32(-1e9), jnp.float32(0.0))
    bias = jnp.broadcast_to(bias_row.reshape(bt, 1, seq), (bt, seq, seq))

    # Fused multi-head Q/K/V projection: one wide bf16 matmul, f32 accumulation.
    # (the 1/sqrt(dk) scale is folded into wq/bq at param-prep time)
    qkv = jnp.dot(x, wqkv_ref[...],
                  preferred_element_type=jnp.float32) + bqkv_ref[...]  # [rows, 3*H*DK] f32
    q3 = qkv[:, :hd].astype(jnp.bfloat16).reshape(bt, seq, hd)
    k3 = qkv[:, hd:2 * hd].astype(jnp.bfloat16).reshape(bt, seq, hd)
    v3 = qkv[:, 2 * hd:3 * hd].astype(jnp.bfloat16).reshape(bt, seq, hd)

    # Per-head self-attention, batched over the bt users (static unrolled loop).
    # Softmax math stays f32; matmul operands are bf16 with f32 accumulation.
    ctx_heads = []
    for hh in range(heads):
        qh = q3[:, :, hh * dk:(hh + 1) * dk]                           # [bt, L, DK]
        kh = k3[:, :, hh * dk:(hh + 1) * dk]
        vh = v3[:, :, hh * dv:(hh + 1) * dv]
        s = jnp.einsum('bqd,bkd->bqk', qh, kh,
                       preferred_element_type=jnp.float32) + bias      # [bt, L, L] f32
        s = s - jnp.max(s, axis=-1, keepdims=True)
        p = jnp.exp(s)
        alpha = p * pl.reciprocal(jnp.sum(p, axis=-1, keepdims=True), approx=True)
        ctx_heads.append(jnp.einsum('bqk,bkd->bqd', alpha.astype(jnp.bfloat16), vh,
                                    preferred_element_type=jnp.float32))

    # Single full-width affine projection over all heads + bias + ReLU
    # (dropout is identity at inference).
    ctx = jnp.concatenate(ctx_heads, axis=-1).reshape(rows, hd)        # [rows, H*DV] f32
    h = jnp.maximum(jnp.dot(ctx.astype(jnp.bfloat16), wa_ref[...],
                            preferred_element_type=jnp.float32) + ba_ref[...],
                    0.0)                                               # [rows, D] f32

    # Additive attention pooling over the history positions (per user).
    # NOTE: matches the reference implementation - no history mask applied here.
    t = jnp.tanh(jnp.dot(h.astype(jnp.bfloat16), w1_ref[...],
                         preferred_element_type=jnp.float32) + b1_ref[...])  # [rows, A]
    a = jnp.dot(t.astype(jnp.bfloat16), w2_ref[...],
                preferred_element_type=jnp.float32)                    # [rows, 1]
    a3 = a.reshape(bt, seq, 1)
    a3 = a3 - jnp.max(a3, axis=1, keepdims=True)
    e = jnp.exp(a3)
    w = e * pl.reciprocal(jnp.sum(e, axis=1, keepdims=True), approx=True)    # [bt, L, 1]
    wh = (w * h.reshape(bt, seq, d_out)).reshape(rows, d_out)          # [rows, D] f32

    # Segment-sum over each user's L rows, routed through the MXU (which has slack)
    # instead of a cross-sublane reduce on the XLU.
    r_ids = jax.lax.broadcasted_iota(jnp.int32, (bt, rows), 1)
    b_ids = jax.lax.broadcasted_iota(jnp.int32, (bt, rows), 0)
    seg = jnp.where((r_ids >= b_ids * seq) & (r_ids < (b_ids + 1) * seq),
                    jnp.float32(1.0), jnp.float32(0.0))                # [bt, rows]
    o_ref[...] = jnp.dot(seg, wh, preferred_element_type=jnp.float32)  # [bt, D]


def prepare_params(raw):
    """One-time parameter prep: fuse Q/K/V, fold 1/sqrt(dk) into the Q projection,
    and cast matmul weights to bf16 (biases stay f32 - they add into f32 accumulators)."""
    inv_scale = 1.0 / math.sqrt(float(DK))
    wqkv = jnp.concatenate([raw["wq"] * inv_scale, raw["wk"], raw["wv"]], axis=1)
    bqkv = jnp.concatenate([raw["bq"] * inv_scale, raw["bk"], raw["bv"]], axis=1)
    return {
        "wqkv": wqkv.astype(jnp.bfloat16),
        "bqkv": bqkv.astype(jnp.float32),
        "wa": raw["wa"].astype(jnp.bfloat16),
        "ba": raw["ba"].astype(jnp.float32),
        "w1": raw["w1"].astype(jnp.bfloat16),
        "b1": raw["b1"].astype(jnp.float32),
        "w2": raw["w2"].astype(jnp.bfloat16),
    }


def user_encoder_forward(history_embedding, user_history_mask,
                         candidate_news_representation, params, *, block_b=None):
    """JAX/Pallas equivalent of the UserEncoder forward (given news_encoder output)."""
    b, l, d = history_embedding.shape
    news_num = candidate_news_representation.shape[1]
    hd = H * DK

    if block_b is None:
        block_b = _pick_block_b(b, l)

    # Pad the batch up to a multiple of the per-step user tile.
    bp = -(-b // block_b) * block_b
    hist = history_embedding.astype(jnp.bfloat16)   # bf16 MXU operands; halves DMA bytes
    mask = user_history_mask.astype(jnp.float32)
    if bp != b:
        pad = bp - b
        hist = jnp.pad(hist, ((0, pad), (0, 0), (0, 0)))
        mask = jnp.pad(mask, ((0, pad), (0, 0)), constant_values=1.0)

    kernel = functools.partial(_user_encoder_kernel, bt=block_b, seq=l,
                               heads=H, dk=DK, dv=DV)

    def full(shape):
        return pl.BlockSpec(shape, lambda i, _n=len(shape): (0,) * _n)

    grid_spec = pltpu.PrefetchScalarGridSpec(
        num_scalar_prefetch=0,
        grid=(bp // block_b,),
        in_specs=[
            pl.BlockSpec((block_b, l, d), lambda i: (i, 0, 0)),   # history embeddings
            pl.BlockSpec((block_b, l), lambda i: (i, 0)),         # history mask (2-D tile)
            full((d, 3 * hd)), full((1, 3 * hd)),                 # fused QKV W, b
            full((hd, d)), full((1, d)),                          # multi-head affine W, b
            full((d, A)), full((1, A)),                           # pooling affine1 W, b
            full((A, 1)),                                         # pooling affine2 W (no bias)
        ],
        out_specs=pl.BlockSpec((block_b, d), lambda i: (i, 0)),
    )

    user = pl.pallas_call(
        kernel,
        out_shape=jax.ShapeDtypeStruct((bp, d), jnp.float32),
        grid_spec=grid_spec,
        compiler_params=pltpu.CompilerParams(
            dimension_semantics=("parallel",)),   # shards the grid across v7x's 2 TCs
    )(hist, mask, params["wqkv"], params["bqkv"],
      params["wa"], params["ba"], params["w1"], params["b1"], params["w2"])

    user = user[:b]
    # .unsqueeze(1).repeat(1, news_num, 1)
    return jnp.broadcast_to(user[:, None, :], (b, news_num, d))


def init_raw_params(key):
    hd = H * DK
    ks = jax.random.split(key, 6)
    scale = 0.05
    return {
        "wq": scale * jax.random.normal(ks[0], (D, hd), jnp.float32),
        "bq": jnp.zeros((1, hd), jnp.float32),
        "wk": scale * jax.random.normal(ks[1], (D, hd), jnp.float32),
        "bk": jnp.zeros((1, hd), jnp.float32),
        "wv": scale * jax.random.normal(ks[2], (D, hd), jnp.float32),
        "bv": jnp.zeros((1, hd), jnp.float32),
        "wa": scale * jax.random.normal(ks[3], (hd, D), jnp.float32),
        "ba": jnp.zeros((1, D), jnp.float32),
        "w1": scale * jax.random.normal(ks[4], (D, A), jnp.float32),
        "b1": jnp.zeros((1, A), jnp.float32),
        "w2": scale * jax.random.normal(ks[5], (A, 1), jnp.float32),
    }


if __name__ == "__main__":
    key = jax.random.PRNGKey(0)
    k_hist, k_cand, k_param = jax.random.split(key, 3)

    history_embedding = jax.random.normal(k_hist, (B, L, D), jnp.float32)
    candidate_news_representation = jax.random.normal(k_cand, (B, NEWS_NUM, D), jnp.float32)

    # history mask: a couple of users have trailing positions masked out
    user_history_mask = jnp.ones((B, L), jnp.float32)
    user_history_mask = user_history_mask.at[0, L - 2:].set(0.0)
    user_history_mask = user_history_mask.at[3, L - 4:].set(0.0)

    params = prepare_params(init_raw_params(k_param))

    out = user_encoder_forward(history_embedding, user_history_mask,
                               candidate_news_representation, params)
    out = jax.block_until_ready(out)
    assert out.shape == (B, NEWS_NUM, D), out.shape
    assert bool(jnp.all(jnp.isfinite(out)))
    print("KERNEL_OK")
</pallas_src>

<mosaic_0001>
module attributes {stable_mosaic.version = 11 : i64} {
  func.func @_user_encoder_kernel(%arg0: i32, %arg1: memref<16x8x64xbf16, #tpu.memory_space<vmem>>, %arg2: memref<16x8xf32, #tpu.memory_space<vmem>>, %arg3: memref<64x192xbf16, #tpu.memory_space<vmem>>, %arg4: memref<1x192xf32, #tpu.memory_space<vmem>>, %arg5: memref<64x64xbf16, #tpu.memory_space<vmem>>, %arg6: memref<1x64xf32, #tpu.memory_space<vmem>>, %arg7: memref<64x32xbf16, #tpu.memory_space<vmem>>, %arg8: memref<1x32xf32, #tpu.memory_space<vmem>>, %arg9: memref<32x1xbf16, #tpu.memory_space<vmem>>, %arg10: memref<16x64xf32, #tpu.memory_space<vmem>>) attributes {dimension_semantics = [#tpu.dimension_semantics<parallel>], iteration_bounds = array<i64: 1>, scalar_prefetch = 0 : i64, scratch_operands = 0 : i64, tpu.core_type = #tpu.core_type<tc>, window_params = [{transform_indices = @transform_0, window_bounds = array<i64: 16, 8, 64>}, {transform_indices = @transform_1, window_bounds = array<i64: 16, 8>}, {pipeline_mode = #tpu.pipeline_mode<synchronous>, transform_indices = @transform_2, window_bounds = array<i64: 64, 192>}, {pipeline_mode = #tpu.pipeline_mode<synchronous>, transform_indices = @transform_3, window_bounds = array<i64: 1, 192>}, {pipeline_mode = #tpu.pipeline_mode<synchronous>, transform_indices = @transform_4, window_bounds = array<i64: 64, 64>}, {pipeline_mode = #tpu.pipeline_mode<synchronous>, transform_indices = @transform_5, window_bounds = array<i64: 1, 64>}, {pipeline_mode = #tpu.pipeline_mode<synchronous>, transform_indices = @transform_6, window_bounds = array<i64: 64, 32>}, {pipeline_mode = #tpu.pipeline_mode<synchronous>, transform_indices = @transform_7, window_bounds = array<i64: 1, 32>}, {pipeline_mode = #tpu.pipeline_mode<synchronous>, transform_indices = @transform_8, window_bounds = array<i64: 32, 1>}, {transform_indices = @transform_9, window_bounds = array<i64: 16, 64>}]} {
    %c0 = arith.constant 0 : index
    %c0_0 = arith.constant 0 : index
    %c0_1 = arith.constant 0 : index
    %0 = vector.load %arg1[%c0, %c0_0, %c0_1] : memref<16x8x64xbf16, #tpu.memory_space<vmem>>, vector<16x8x64xbf16>
    %1 = vector.shape_cast %0 : vector<16x8x64xbf16> to vector<128x64xbf16>
    %c0_2 = arith.constant 0 : index
    %c0_3 = arith.constant 0 : index
    %2 = vector.load %arg2[%c0_2, %c0_3] : memref<16x8xf32, #tpu.memory_space<vmem>>, vector<16x8xf32>
    %cst = arith.constant 0.000000e+00 : f32
    %3 = vector.broadcast %cst : f32 to vector<16x8xf32>
    %4 = arith.cmpf oeq, %2, %3 : vector<16x8xf32>
    %cst_4 = arith.constant -1.000000e+09 : f32
    %cst_5 = arith.constant 0.000000e+00 : f32
    %5 = vector.broadcast %cst_4 : f32 to vector<16x8xf32>
    %6 = vector.broadcast %cst_5 : f32 to vector<16x8xf32>
    %7 = arith.select %4, %5, %6 : vector<16x8xi1>, vector<16x8xf32>
    %8 = vector.shape_cast %7 : vector<16x8xf32> to vector<16x1x8xf32>
    %9 = vector.shape_cast %8 : vector<16x1x8xf32> to vector<16x1x8xf32>
    %10 = vector.broadcast %9 : vector<16x1x8xf32> to vector<16x8x8xf32>
    %c0_6 = arith.constant 0 : index
    %c0_7 = arith.constant 0 : index
    %11 = vector.load %arg3[%c0_6, %c0_7] : memref<64x192xbf16, #tpu.memory_space<vmem>>, vector<64x192xbf16>
    %cst_8 = arith.constant dense<0.000000e+00> : vector<128x192xf32>
    %12 = tpu.matmul %1, %11, %cst_8 {dimension_numbers = #tpu.dot_dimension_numbers<[1], [0], [0], [1], [0, 0, 1, 1], [], []>} : vector<128x64xbf16>, vector<64x192xbf16>, vector<128x192xf32> -> vector<128x192xf32>
    %c0_9 = arith.constant 0 : index
    %c0_10 = arith.constant 0 : index
    %13 = vector.load %arg4[%c0_9, %c0_10] : memref<1x192xf32, #tpu.memory_space<vmem>>, vector<1x192xf32>
    %14 = vector.broadcast %13 : vector<1x192xf32> to vector<128x192xf32>
    %15 = arith.addf %12, %14 : vector<128x192xf32>
    %16 = vector.extract_strided_slice %15 {offsets = [0, 0], sizes = [128, 64], strides = [1, 1]} : vector<128x192xf32> to vector<128x64xf32>
    %17 = arith.truncf %16 : vector<128x64xf32> to vector<128x64xbf16>
    %18 = vector.shape_cast %17 : vector<128x64xbf16> to vector<16x8x64xbf16>
    %19 = vector.extract_strided_slice %15 {offsets = [0, 64], sizes = [128, 64], strides = [1, 1]} : vector<128x192xf32> to vector<128x64xf32>
    %20 = arith.truncf %19 : vector<128x64xf32> to vector<128x64xbf16>
    %21 = vector.shape_cast %20 : vector<128x64xbf16> to vector<16x8x64xbf16>
    %22 = vector.extract_strided_slice %15 {offsets = [0, 128], sizes = [128, 64], strides = [1, 1]} : vector<128x192xf32> to vector<128x64xf32>
    %23 = arith.truncf %22 : vector<128x64xf32> to vector<128x64xbf16>
    %24 = vector.shape_cast %23 : vector<128x64xbf16> to vector<16x8x64xbf16>
    %25 = vector.extract_strided_slice %18 {offsets = [0, 0, 0], sizes = [16, 8, 16], strides = [1, 1, 1]} : vector<16x8x64xbf16> to vector<16x8x16xbf16>
    %26 = vector.extract_strided_slice %21 {offsets = [0, 0, 0], sizes = [16, 8, 16], strides = [1, 1, 1]} : vector<16x8x64xbf16> to vector<16x8x16xbf16>
    %27 = vector.extract_strided_slice %24 {offsets = [0, 0, 0], sizes = [16, 8, 16], strides = [1, 1, 1]} : vector<16x8x64xbf16> to vector<16x8x16xbf16>
    "tpu.trace_start"() <{level = 10 : i32, message = "bqd,bkd->bqk"}> : () -> ()
    %cst_11 = arith.constant dense<0.000000e+00> : vector<16x8x8xf32>
    %28 = tpu.matmul %25, %26, %cst_11 {dimension_numbers = #tpu.dot_dimension_numbers<[2], [2], [1], [1], [0, 0, 0, 1, 1, 1], [0], [0]>} : vector<16x8x16xbf16>, vector<16x8x16xbf16>, vector<16x8x8xf32> -> vector<16x8x8xf32>
    "tpu.trace_stop"() : () -> ()
    %29 = arith.addf %28, %10 : vector<16x8x8xf32>
    %cst_12 = arith.constant dense<0xFF800000> : vector<16x8xf32>
    %30 = vector.multi_reduction <maximumf>, %29, %cst_12 [2] : vector<16x8x8xf32> to vector<16x8xf32>
    %31 = vector.shape_cast %30 : vector<16x8xf32> to vector<16x8x1xf32>
    %32 = vector.broadcast %31 : vector<16x8x1xf32> to vector<16x8x8xf32>
    %33 = arith.subf %29, %32 : vector<16x8x8xf32>
    %34 = math.exp %33 : vector<16x8x8xf32>
    %cst_13 = arith.constant dense<0.000000e+00> : vector<16x8xf32>
    %35 = vector.multi_reduction <add>, %34, %cst_13 [2] : vector<16x8x8xf32> to vector<16x8xf32>
    %36 = vector.shape_cast %35 : vector<16x8xf32> to vector<16x8x1xf32>
    %37 = tpu.reciprocal %36 {approx = true} : vector<16x8x1xf32> -> vector<16x8x1xf32>
    %38 = vector.broadcast %37 : vector<16x8x1xf32> to vector<16x8x8xf32>
    %39 = arith.mulf %34, %38 : vector<16x8x8xf32>
    %40 = arith.truncf %39 : vector<16x8x8xf32> to vector<16x8x8xbf16>
    "tpu.trace_start"() <{level = 10 : i32, message = "bqk,bkd->bqd"}> : () -> ()
    %cst_14 = arith.constant dense<0.000000e+00> : vector<16x8x16xf32>
    %41 = tpu.matmul %40, %27, %cst_14 {dimension_numbers = #tpu.dot_dimension_numbers<[2], [1], [1], [2], [0, 0, 0, 1, 1, 2], [0], [0]>} : vector<16x8x8xbf16>, vector<16x8x16xbf16>, vector<16x8x16xf32> -> vector<16x8x16xf32>
    "tpu.trace_stop"() : () -> ()
    %42 = vector.extract_strided_slice %18 {offsets = [0, 0, 16], sizes = [16, 8, 16], strides = [1, 1, 1]} : vector<16x8x64xbf16> to vector<16x8x16xbf16>
    %43 = vector.extract_strided_slice %21 {offsets = [0, 0, 16], sizes = [16, 8, 16], strides = [1, 1, 1]} : vector<16x8x64xbf16> to vector<16x8x16xbf16>
    %44 = vector.extract_strided_slice %24 {offsets = [0, 0, 16], sizes = [16, 8, 16], strides = [1, 1, 1]} : vector<16x8x64xbf16> to vector<16x8x16xbf16>
    "tpu.trace_start"() <{level = 10 : i32, message = "bqd,bkd->bqk"}> : () -> ()
    %cst_15 = arith.constant dense<0.000000e+00> : vector<16x8x8xf32>
    %45 = tpu.matmul %42, %43, %cst_15 {dimension_numbers = #tpu.dot_dimension_numbers<[2], [2], [1], [1], [0, 0, 0, 1, 1, 1], [0], [0]>} : vector<16x8x16xbf16>, vector<16x8x16xbf16>, vector<16x8x8xf32> -> vector<16x8x8xf32>
    "tpu.trace_stop"() : () -> ()
    %46 = arith.addf %45, %10 : vector<16x8x8xf32>
    %cst_16 = arith.constant dense<0xFF800000> : vector<16x8xf32>
    %47 = vector.multi_reduction <maximumf>, %46, %cst_16 [2] : vector<16x8x8xf32> to vector<16x8xf32>
    %48 = vector.shape_cast %47 : vector<16x8xf32> to vector<16x8x1xf32>
    %49 = vector.broadcast %48 : vector<16x8x1xf32> to vector<16x8x8xf32>
    %50 = arith.subf %46, %49 : vector<16x8x8xf32>
    %51 = math.exp %50 : vector<16x8x8xf32>
    %cst_17 = arith.constant dense<0.000000e+00> : vector<16x8xf32>
    %52 = vector.multi_reduction <add>, %51, %cst_17 [2] : vector<16x8x8xf32> to vector<16x8xf32>
    %53 = vector.shape_cast %52 : vector<16x8xf32> to vector<16x8x1xf32>
    %54 = tpu.reciprocal %53 {approx = true} : vector<16x8x1xf32> -> vector<16x8x1xf32>
    %55 = vector.broadcast %54 : vector<16x8x1xf32> to vector<16x8x8xf32>
    %56 = arith.mulf %51, %55 : vector<16x8x8xf32>
    %57 = arith.truncf %56 : vector<16x8x8xf32> to vector<16x8x8xbf16>
    "tpu.trace_start"() <{level = 10 : i32, message = "bqk,bkd->bqd"}> : () -> ()
    %cst_18 = arith.constant dense<0.000000e+00> : vector<16x8x16xf32>
    %58 = tpu.matmul %57, %44, %cst_18 {dimension_numbers = #tpu.dot_dimension_numbers<[2], [1], [1], [2], [0, 0, 0, 1, 1, 2], [0], [0]>} : vector<16x8x8xbf16>, vector<16x8x16xbf16>, vector<16x8x16xf32> -> vector<16x8x16xf32>
    "tpu.trace_stop"() : () -> ()
    %59 = vector.extract_strided_slice %18 {offsets = [0, 0, 32], sizes = [16, 8, 16], strides = [1, 1, 1]} : vector<16x8x64xbf16> to vector<16x8x16xbf16>
    %60 = vector.extract_strided_slice %21 {offsets = [0, 0, 32], sizes = [16, 8, 16], strides = [1, 1, 1]} : vector<16x8x64xbf16> to vector<16x8x16xbf16>
    %61 = vector.extract_strided_slice %24 {offsets = [0, 0, 32], sizes = [16, 8, 16], strides = [1, 1, 1]} : vector<16x8x64xbf16> to vector<16x8x16xbf16>
    "tpu.trace_start"() <{level = 10 : i32, message = "bqd,bkd->bqk"}> : () -> ()
    %cst_19 = arith.constant dense<0.000000e+00> : vector<16x8x8xf32>
    %62 = tpu.matmul %59, %60, %cst_19 {dimension_numbers = #tpu.dot_dimension_numbers<[2], [2], [1], [1], [0, 0, 0, 1, 1, 1], [0], [0]>} : vector<16x8x16xbf16>, vector<16x8x16xbf16>, vector<16x8x8xf32> -> vector<16x8x8xf32>
    "tpu.trace_stop"() : () -> ()
    %63 = arith.addf %62, %10 : vector<16x8x8xf32>
    %cst_20 = arith.constant dense<0xFF800000> : vector<16x8xf32>
    %64 = vector.multi_reduction <maximumf>, %63, %cst_20 [2] : vector<16x8x8xf32> to vector<16x8xf32>
    %65 = vector.shape_cast %64 : vector<16x8xf32> to vector<16x8x1xf32>
    %66 = vector.broadcast %65 : vector<16x8x1xf32> to vector<16x8x8xf32>
    %67 = arith.subf %63, %66 : vector<16x8x8xf32>
    %68 = math.exp %67 : vector<16x8x8xf32>
    %cst_21 = arith.constant dense<0.000000e+00> : vector<16x8xf32>
    %69 = vector.multi_reduction <add>, %68, %cst_21 [2] : vector<16x8x8xf32> to vector<16x8xf32>
    %70 = vector.shape_cast %69 : vector<16x8xf32> to vector<16x8x1xf32>
    %71 = tpu.reciprocal %70 {approx = true} : vector<16x8x1xf32> -> vector<16x8x1xf32>
    %72 = vector.broadcast %71 : vector<16x8x1xf32> to vector<16x8x8xf32>
    %73 = arith.mulf %68, %72 : vector<16x8x8xf32>
    %74 = arith.truncf %73 : vector<16x8x8xf32> to vector<16x8x8xbf16>
    "tpu.trace_start"() <{level = 10 : i32, message = "bqk,bkd->bqd"}> : () -> ()
    %cst_22 = arith.constant dense<0.000000e+00> : vector<16x8x16xf32>
    %75 = tpu.matmul %74, %61, %cst_22 {dimension_numbers = #tpu.dot_dimension_numbers<[2], [1], [1], [2], [0, 0, 0, 1, 1, 2], [0], [0]>} : vector<16x8x8xbf16>, vector<16x8x16xbf16>, vector<16x8x16xf32> -> vector<16x8x16xf32>
    "tpu.trace_stop"() : () -> ()
    %76 = vector.extract_strided_slice %18 {offsets = [0, 0, 48], sizes = [16, 8, 16], strides = [1, 1, 1]} : vector<16x8x64xbf16> to vector<16x8x16xbf16>
    %77 = vector.extract_strided_slice %21 {offsets = [0, 0, 48], sizes = [16, 8, 16], strides = [1, 1, 1]} : vector<16x8x64xbf16> to vector<16x8x16xbf16>
    %78 = vector.extract_strided_slice %24 {offsets = [0, 0, 48], sizes = [16, 8, 16], strides = [1, 1, 1]} : vector<16x8x64xbf16> to vector<16x8x16xbf16>
    "tpu.trace_start"() <{level = 10 : i32, message = "bqd,bkd->bqk"}> : () -> ()
    %cst_23 = arith.constant dense<0.000000e+00> : vector<16x8x8xf32>
    %79 = tpu.matmul %76, %77, %cst_23 {dimension_numbers = #tpu.dot_dimension_numbers<[2], [2], [1], [1], [0, 0, 0, 1, 1, 1], [0], [0]>} : vector<16x8x16xbf16>, vector<16x8x16xbf16>, vector<16x8x8xf32> -> vector<16x8x8xf32>
    "tpu.trace_stop"() : () -> ()
    %80 = arith.addf %79, %10 : vector<16x8x8xf32>
    %cst_24 = arith.constant dense<0xFF800000> : vector<16x8xf32>
    %81 = vector.multi_reduction <maximumf>, %80, %cst_24 [2] : vector<16x8x8xf32> to vector<16x8xf32>
    %82 = vector.shape_cast %81 : vector<16x8xf32> to vector<16x8x1xf32>
    %83 = vector.broadcast %82 : vector<16x8x1xf32> to vector<16x8x8xf32>
    %84 = arith.subf %80, %83 : vector<16x8x8xf32>
    %85 = math.exp %84 : vector<16x8x8xf32>
    %cst_25 = arith.constant dense<0.000000e+00> : vector<16x8xf32>
    %86 = vector.multi_reduction <add>, %85, %cst_25 [2] : vector<16x8x8xf32> to vector<16x8xf32>
    %87 = vector.shape_cast %86 : vector<16x8xf32> to vector<16x8x1xf32>
    %88 = tpu.reciprocal %87 {approx = true} : vector<16x8x1xf32> -> vector<16x8x1xf32>
    %89 = vector.broadcast %88 : vector<16x8x1xf32> to vector<16x8x8xf32>
    %90 = arith.mulf %85, %89 : vector<16x8x8xf32>
    %91 = arith.truncf %90 : vector<16x8x8xf32> to vector<16x8x8xbf16>
    "tpu.trace_start"() <{level = 10 : i32, message = "bqk,bkd->bqd"}> : () -> ()
    %cst_26 = arith.constant dense<0.000000e+00> : vector<16x8x16xf32>
    %92 = tpu.matmul %91, %78, %cst_26 {dimension_numbers = #tpu.dot_dimension_numbers<[2], [1], [1], [2], [0, 0, 0, 1, 1, 2], [0], [0]>} : vector<16x8x8xbf16>, vector<16x8x16xbf16>, vector<16x8x16xf32> -> vector<16x8x16xf32>
    "tpu.trace_stop"() : () -> ()
    %93 = tpu.concatenate %41, %58, %75, %92 in 2 : vector<16x8x16xf32>, vector<16x8x16xf32>, vector<16x8x16xf32>, vector<16x8x16xf32> -> vector<16x8x64xf32>
    %94 = vector.shape_cast %93 : vector<16x8x64xf32> to vector<128x64xf32>
    %95 = arith.truncf %94 : vector<128x64xf32> to vector<128x64xbf16>
    %c0_27 = arith.constant 0 : index
    %c0_28 = arith.constant 0 : index
    %96 = vector.load %arg5[%c0_27, %c0_28] : memref<64x64xbf16, #tpu.memory_space<vmem>>, vector<64x64xbf16>
    %cst_29 = arith.constant dense<0.000000e+00> : vector<128x64xf32>
    %97 = tpu.matmul %95, %96, %cst_29 {dimension_numbers = #tpu.dot_dimension_numbers<[1], [0], [0], [1], [0, 0, 1, 1], [], []>} : vector<128x64xbf16>, vector<64x64xbf16>, vector<128x64xf32> -> vector<128x64xf32>
    %c0_30 = arith.constant 0 : index
    %c0_31 = arith.constant 0 : index
    %98 = vector.load %arg6[%c0_30, %c0_31] : memref<1x64xf32, #tpu.memory_space<vmem>>, vector<1x64xf32>
    %99 = vector.broadcast %98 : vector<1x64xf32> to vector<128x64xf32>
    %100 = arith.addf %97, %99 : vector<128x64xf32>
    %cst_32 = arith.constant 0.000000e+00 : f32
    %101 = vector.broadcast %cst_32 : f32 to vector<128x64xf32>
    %102 = arith.maximumf %100, %101 : vector<128x64xf32>
    %103 = arith.truncf %102 : vector<128x64xf32> to vector<128x64xbf16>
    %c0_33 = arith.constant 0 : index
    %c0_34 = arith.constant 0 : index
    %104 = vector.load %arg7[%c0_33, %c0_34] : memref<64x32xbf16, #tpu.memory_space<vmem>>, vector<64x32xbf16>
    %cst_35 = arith.constant dense<0.000000e+00> : vector<128x32xf32>
    %105 = tpu.matmul %103, %104, %cst_35 {dimension_numbers = #tpu.dot_dimension_numbers<[1], [0], [0], [1], [0, 0, 1, 1], [], []>} : vector<128x64xbf16>, vector<64x32xbf16>, vector<128x32xf32> -> vector<128x32xf32>
    %c0_36 = arith.constant 0 : index
    %c0_37 = arith.constant 0 : index
    %106 = vector.load %arg8[%c0_36, %c0_37] : memref<1x32xf32, #tpu.memory_space<vmem>>, vector<1x32xf32>
    %107 = vector.broadcast %106 : vector<1x32xf32> to vector<128x32xf32>
    %108 = arith.addf %105, %107 : vector<128x32xf32>
    %109 = math.tanh %108 : vector<128x32xf32>
    %110 = arith.truncf %109 : vector<128x32xf32> to vector<128x32xbf16>
    %c0_38 = arith.constant 0 : index
    %c0_39 = arith.constant 0 : index
    %111 = vector.load %arg9[%c0_38, %c0_39] : memref<32x1xbf16, #tpu.memory_space<vmem>>, vector<32x1xbf16>
    %cst_40 = arith.constant dense<0.000000e+00> : vector<128x1xf32>
    %112 = tpu.matmul %110, %111, %cst_40 {dimension_numbers = #tpu.dot_dimension_numbers<[1], [0], [0], [1], [0, 0, 1, 1], [], []>} : vector<128x32xbf16>, vector<32x1xbf16>, vector<128x1xf32> -> vector<128x1xf32>
    %113 = vector.shape_cast %112 : vector<128x1xf32> to vector<16x8x1xf32>
    %cst_41 = arith.constant dense<0xFF800000> : vector<16x1xf32>
    %114 = vector.multi_reduction <maximumf>, %113, %cst_41 [1] : vector<16x8x1xf32> to vector<16x1xf32>
    %115 = vector.shape_cast %114 : vector<16x1xf32> to vector<16x1x1xf32>
    %116 = vector.broadcast %115 : vector<16x1x1xf32> to vector<16x8x1xf32>
    %117 = arith.subf %113, %116 : vector<16x8x1xf32>
    %118 = math.exp %117 : vector<16x8x1xf32>
    %cst_42 = arith.constant dense<0.000000e+00> : vector<16x1xf32>
    %119 = vector.multi_reduction <add>, %118, %cst_42 [1] : vector<16x8x1xf32> to vector<16x1xf32>
    %120 = vector.shape_cast %119 : vector<16x1xf32> to vector<16x1x1xf32>
    %121 = tpu.reciprocal %120 {approx = true} : vector<16x1x1xf32> -> vector<16x1x1xf32>
    %122 = vector.broadcast %121 : vector<16x1x1xf32> to vector<16x8x1xf32>
    %123 = arith.mulf %118, %122 : vector<16x8x1xf32>
    %124 = vector.shape_cast %102 : vector<128x64xf32> to vector<16x8x64xf32>
    %125 = vector.broadcast %123 : vector<16x8x1xf32> to vector<16x8x64xf32>
    %126 = arith.mulf %125, %124 : vector<16x8x64xf32>
    %127 = vector.shape_cast %126 : vector<16x8x64xf32> to vector<128x64xf32>
    %128 = tpu.iota {dimensions = array<i32: 1>} : vector<16x128xi32>
    %129 = tpu.iota {dimensions = array<i32: 0>} : vector<16x128xi32>
    %c8_i32 = arith.constant 8 : i32
    %130 = vector.broadcast %c8_i32 : i32 to vector<16x128xi32>
    %131 = arith.muli %129, %130 : vector<16x128xi32>
    %132 = arith.cmpi sge, %128, %131 : vector<16x128xi32>
    %c1_i32 = arith.constant 1 : i32
    %133 = vector.broadcast %c1_i32 : i32 to vector<16x128xi32>
    %134 = arith.addi %129, %133 : vector<16x128xi32>
    %c8_i32_43 = arith.constant 8 : i32
    %135 = vector.broadcast %c8_i32_43 : i32 to vector<16x128xi32>
    %136 = arith.muli %134, %135 : vector<16x128xi32>
    %137 = arith.cmpi slt, %128, %136 : vector<16x128xi32>
    %138 = arith.andi %132, %137 : vector<16x128xi1>
    %cst_44 = arith.constant 1.000000e+00 : f32
    %cst_45 = arith.constant 0.000000e+00 : f32
    %139 = vector.broadcast %cst_44 : f32 to vector<16x128xf32>
    %140 = vector.broadcast %cst_45 : f32 to vector<16x128xf32>
    %141 = arith.select %138, %139, %140 : vector<16x128xi1>, vector<16x128xf32>
    %cst_46 = arith.constant dense<0.000000e+00> : vector<16x64xf32>
    %142 = tpu.matmul %141, %127, %cst_46 {dimension_numbers = #tpu.dot_dimension_numbers<[1], [0], [0], [1], [0, 0, 1, 1], [], []>} : vector<16x128xf32>, vector<128x64xf32>, vector<16x64xf32> -> vector<16x64xf32>
    %c0_47 = arith.constant 0 : index
    %c0_48 = arith.constant 0 : index
    %143 = vector.load %arg10[%c0_47, %c0_48] : memref<16x64xf32, #tpu.memory_space<vmem>>, vector<16x64xf32>
    tpu.vector_store %arg10[%c0_47, %c0_48], %142 {strides = array<i32>} : memref<16x64xf32, #tpu.memory_space<vmem>>, vector<16x64xf32>,
    return
  }
  func.func @transform_0(%arg0: i32) -> (i32, i32, i32) {
    %c0_i32 = arith.constant 0 : i32
    %c0_i32_0 = arith.constant 0 : i32
    %c0_i32_1 = arith.constant 0 : i32
    return %arg0, %c0_i32, %c0_i32_0 : i32, i32, i32
  }
  func.func @transform_1(%arg0: i32) -> (i32, i32) {
    %c0_i32 = arith.constant 0 : i32
    %c0_i32_0 = arith.constant 0 : i32
    return %arg0, %c0_i32 : i32, i32
  }
  func.func @transform_2(%arg0: i32) -> (i32, i32) {
    %c0_i32 = arith.constant 0 : i32
    %c0_i32_0 = arith.constant 0 : i32
    %c0_i32_1 = arith.constant 0 : i32
    return %c0_i32, %c0_i32_0 : i32, i32
  }
  func.func @transform_3(%arg0: i32) -> (i32, i32) {
    %c0_i32 = arith.constant 0 : i32
    %c0_i32_0 = arith.constant 0 : i32
    %c0_i32_1 = arith.constant 0 : i32
    return %c0_i32, %c0_i32_0 : i32, i32
  }
  func.func @transform_4(%arg0: i32) -> (i32, i32) {
    %c0_i32 = arith.constant 0 : i32
    %c0_i32_0 = arith.constant 0 : i32
    %c0_i32_1 = arith.constant 0 : i32
    return %c0_i32, %c0_i32_0 : i32, i32
  }
  func.func @transform_5(%arg0: i32) -> (i32, i32) {
    %c0_i32 = arith.constant 0 : i32
    %c0_i32_0 = arith.constant 0 : i32
    %c0_i32_1 = arith.constant 0 : i32
    return %c0_i32, %c0_i32_0 : i32, i32
  }
  func.func @transform_6(%arg0: i32) -> (i32, i32) {
    %c0_i32 = arith.constant 0 : i32
    %c0_i32_0 = arith.constant 0 : i32
    %c0_i32_1 = arith.constant 0 : i32
    return %c0_i32, %c0_i32_0 : i32, i32
  }
  func.func @transform_7(%arg0: i32) -> (i32, i32) {
    %c0_i32 = arith.constant 0 : i32
    %c0_i32_0 = arith.constant 0 : i32
    %c0_i32_1 = arith.constant 0 : i32
    return %c0_i32, %c0_i32_0 : i32, i32
  }
  func.func @transform_8(%arg0: i32) -> (i32, i32) {
    %c0_i32 = arith.constant 0 : i32
    %c0_i32_0 = arith.constant 0 : i32
    %c0_i32_1 = arith.constant 0 : i32
    return %c0_i32, %c0_i32_0 : i32, i32
  }
  func.func @transform_9(%arg0: i32) -> (i32, i32) {
    %c0_i32 = arith.constant 0 : i32
    %c0_i32_0 = arith.constant 0 : i32
    return %arg0, %c0_i32 : i32, i32
  }
}

</mosaic_0001>

<bundles_post_ra>
// kernel: tpu_custom_call.1
= control target key start
LH: loop header
LB: loop body
LE: loop exit
PB: predicated region body
PF: predicated region fallthrough
CT: control target
= control target key end

     0   :  { %14 = vsyncpa [#allocation3], 0  ;;  %s13605_s0 = inlined_call_operand.vmem [shape: bf16[16,8,64], index: 0, kind: input, shape index: {}]   ;;  %s13606_s1 = inlined_call_operand.vmem [shape: f32[16,8], index: 1, kind: input, shape index: {}]   ;;  %s13607_s2 = inlined_call_operand.hbm [shape: bf16[64,192], index: 2, kind: input, shape index: {}]   ;;  %s13608_s3 = inlined_call_operand.vmem [shape: f32[1,192], index: 3, kind: input, shape index: {}]   ;;  %s13609_s4 = inlined_call_operand.vmem [shape: bf16[64,64], index: 4, kind: input, shape index: {}]   ;;  %s13610_s5 = inlined_call_operand.vmem [shape: f32[1,64], index: 5, kind: input, shape index: {}]   ;;  %s13611_s6 = inlined_call_operand.vmem [shape: bf16[64,32], index: 6, kind: input, shape index: {}]   ;;  %s13612_s7 = inlined_call_operand.vmem [shape: f32[1,32], index: 7, kind: input, shape index: {}]   ;;  %s13613_s8 = inlined_call_operand.vmem [shape: bf16[32,1], index: 8, kind: input, shape index: {}]   ;;  %s13614_s9 = inlined_call_operand.hbm [shape: f32[16,64], index: 9, kind: output, shape index: {}]  }
   0x1   :  { %15 = vsyncpa [#allocation4], 0  ;;  %s10865_s30 = smov [#allocation2]   ;;  %s10817_s13 = scalar_lea.hbm %s13607_s2, 1024 }
   0x2   :  { %s25_s10 = sshll.u32 %s10865_s30, 4  ;;  %p10818_p0 = scmp.ne.s32.totalorder %s13607_s2, %s10817_s13  ;;  %s26_s10 = int_to_ptr.vmem [resolvable:$true] %s25_s10 }
   0x3   :  { %p10821_p1 = scmp.lt.u32.totalorder %s10817_s13, %s13607_s2 }
   0x5   :  { %p10823_p2 = pnand %p10821_p1, %p10818_p0 }
   0x7   :  { %10826 = shalt.err (!%p10823_p2)
}
   0x8   :  { %s10827_s18 = scalar_lea.vmem %s26_s10, 1024  ;;  %p10832_p4 = scmp.lt.s32.totalorder %s26_s10, %s26_s10 }
   0x9   :  { %p10828_p3 = scmp.ne.s32.totalorder %s26_s10, %s10827_s18  ;;  %p10833_p5 = scmp.lt.s32.totalorder %s10827_s18, %s10827_s18 }
   0xb   :  { %p10834_p6 = por %p10833_p5, %p10832_p4 }
   0xd   :  { %p10835_p7 = pnand %p10834_p6, %p10828_p3 }
   0xf   :  { %10838 = shalt.err (!%p10835_p7)
}
  0x10   :  { %s10866_s19 = smov 128   ;;  %s10867_s20 = smov 8  }
  0x11   :  { %31 = dma.hbm_to_vmem [thread:$0]  %s13607_s2, 1024, %s26_s10, [#allocation3], %s10866_s19, %s10866_s19, %s10867_s20  }
  0x12   :  { %10861 = dma.done.wait [#allocation3], 1024  }
  0x13   :  { %10862 = vsyncadd [#allocation3], 4294966272  ;;  %v10868_v0 = vmov 0   ;;  %v10435_v1 = vld [vmem:[#allocation2 + $0x4] ss:$8 sps:$4 sm:$0xff]   ;;  %vm350_vm0 = vcmask 523264   ;;  %v13615_v17 = vlaneseq }
  0x14   :  { %407 = vmatprep.mubr.bf16.mxu0 %v10868_v0  ;;  %10433 = vset.pattern.permute.xlu0 %v10868_v0  ;;  %v10437_v2 = vld [vmem:[#allocation2] ss:$8 sps:$4 sm:$0xff]   ;;  %v10438_v3 = vld [vmem:[#allocation2 + $0x14] ss:$8 sps:$4 sm:$0xff]   ;;  %v10440_v4 = vld [vmem:[#allocation2 + $0x10] ss:$8 sps:$4 sm:$0xff]  }
  0x15   :  { %10434 = vset.pattern.permute.xlu1 %v10868_v0  ;;  %375 = vmatprep.subr.bf16.mxu0 %v10435_v1  ;;  %v10441_v5 = vld [vmem:[#allocation2 + $0x24] ss:$8 sps:$4 sm:$0xff]   ;;  %v10443_v6 = vld [vmem:[#allocation2 + $0x20] ss:$8 sps:$4 sm:$0xff]   ;;  %v10444_v7 = vld [vmem:[#allocation2 + $0x34] ss:$8 sps:$4 sm:$0xff]  }
  0x16   :  { %376 = vmatpush1.bf16.msra.mxu0 %v10437_v2  ;;  %v10446_v8 = vld [vmem:[#allocation2 + $0x30] ss:$8 sps:$4 sm:$0xff]   ;;  %v10447_v9 = vld [vmem:[%s13605_s0] sm:$0xff]   ;;  %v10448_v10 = vld [vmem:[%s13605_s0 + $0x8] sm:$0xff]   ;;  %v10979_v18 = vshrl.u32 %v13615_v17, 7  ;;  %v13616_v19 = vmov 0.0  }
  0x17   :  { %377 = vmatprep.subr.bf16.mxu0 %v10438_v3  ;;  %v10449_v11 = vld [vmem:[%s13605_s0 + $0x10] sm:$0xff]   ;;  %v10450_v12 = vld [vmem:[%s13605_s0 + $0x18] sm:$0xff]   ;;  %v10451_v13 = vld [vmem:[%s13605_s0 + $0x20] sm:$0xff]   ;;  %9400 = vmatprep.subr.bf16.mxu1 %v13616_v19  ;;  %vm10870_vm1 = vmmov 0   ;;  %vm586_vm2 = vcmask 130048   ;;  %vm1549_vm3 = vcmask 1043456  }
  0x18   :  { %v10452_v14 = vld [vmem:[%s13605_s0 + $0x28] sm:$0xff]   ;;  %v10453_v15 = vld [vmem:[%s13605_s0 + $0x30] sm:$0xff]   ;;  %v10454_v16 = vld [vmem:[%s13605_s0 + $0x38] sm:$0xff]   ;;  %13692 = vst [vmem:[#allocation8_spill] sm:$0xff] %v10979_v18  ;;  %v10984_v20 = vsub.s32 0, %v10979_v18  ;;  %9402 = vmatprep.mubr.msk.bf16.mxu1 %vm10870_vm1, %v13616_v19  ;;  %v266_v28 = vsub.s32 1, %v10979_v18 }
  0x19   :  { %v258_v21 = vld [vmem:[%s13608_s3] sm:$0x3]  ;;  %s10871_s0 = smov 64   ;;  %vm1353_vm5 = vcmask 64512   ;;  %s10874_s23 = smov 112   ;;  %vm7771_vm7 = vcmask 261120  }
  0x1a   :  { %378 = vmatpush1.bf16.msra.mxu0 %v10440_v4  ;;  %v10990_v23 = vrot.slane %v258_v21, %v10984_v20  ;;  %v11006_v30 = vrot.slane %v258_v21, %v266_v28  ;;  %s10875_s24 = smov 32   ;;  %s10876_s25 = smov 96   ;;  %vm7788_vm8 = vcmask 392192   ;;  %vm8318_vm9 = vcmask 7168  }
  0x1b   :  { %379 = vmatprep.subr.bf16.mxu0 %v10441_v5  ;;  %s10877_s26 = smov 16   ;;  %s10878_s27 = smov 80  }
  0x1e   :  { %380 = vmatpush1.bf16.msra.mxu0 %v10443_v6 }
  0x1f   :  { %381 = vmatprep.subr.bf16.mxu0 %v10444_v7 }
  0x22   :  { %382 = vmatpush1.bf16.msra.mxu0 %v10446_v8 }
  0x23   :  { %9394 = vmatprep.subr.bf16.mxu0 %v13616_v19 }
  0x25   :  { %8848 = vmatmul.mubr.msk.bf16.vlgmr.msra.gmra.mrb[0].mxu0 %vm350_vm0, %v10447_v9 }
  0x26   :  { %417 = vmatprep.mubr.bf16.mxu0 %v10868_v0 }
  0x2d   :  { %8849 = vmatmul.mubr.msk.bf16.gmra.mrb[4].mxu0 %vm350_vm0, %v10448_v10 }
  0x2e   :  { %427 = vmatprep.mubr.bf16.mxu0 %v10868_v0 }
  0x35   :  { %8850 = vmatmul.mubr.msk.bf16.gmra.mrb[8].mxu0 %vm350_vm0, %v10449_v11 }
  0x36   :  { %437 = vmatprep.mubr.bf16.mxu0 %v10868_v0 }
  0x3d   :  { %8851 = vmatmul.mubr.msk.bf16.gmra.mrb[12].mxu0 %vm350_vm0, %v10450_v12 }
  0x3e   :  { %447 = vmatprep.mubr.bf16.mxu0 %v10868_v0 }
  0x45   :  { %8852 = vmatmul.mubr.msk.bf16.gmra.mrb[16].mxu0 %vm350_vm0, %v10451_v13 }
  0x46   :  { %457 = vmatprep.mubr.bf16.mxu0 %v10868_v0 }
  0x4d   :  { %8853 = vmatmul.mubr.msk.bf16.gmra.mrb[20].mxu0 %vm350_vm0, %v10452_v14 }
  0x4e   :  { %467 = vmatprep.mubr.bf16.mxu0 %v10868_v0 }
  0x55   :  { %8854 = vmatmul.mubr.msk.bf16.gmra.mrb[24].mxu0 %vm350_vm0, %v10453_v15 }
  0x56   :  { %477 = vmatprep.mubr.bf16.mxu0 %v10868_v0 }
  0x5d   :  { %8855 = vmatmul.mubr.msk.bf16.gmra.mrb[28].mxu0 %vm350_vm0, %v10454_v16 }
  0x5e   :  { %9396 = vmatprep.mubr.msk.bf16.mxu0 %vm10870_vm1, %v13616_v19 }
  0xf8   :  { %v409_v22 = vpop.f32.mrb[0].mxu0 }
  0xf9   :  { %v10992_v24 = vpop.f32.mrb[1].mxu0  ;;  %v410_v40 = vadd.f32 %v409_v22, %v10990_v23 }
  0xfa   :  { %v413_v25 = vpop.f32.mrb[2].mxu0 }
  0xfb   :  { %v414_v26 = vadd.f32 %v413_v25, %v10990_v23  ;;  %v10999_v27 = vpop.f32.mrb[3].mxu0  ;;  %v11025_v43 = vpack.c.bf16 %v410_v40, %v410_v40 }
  0xfd   :  { %v11002_v29 = vpack.c.bf16 %v414_v26, %v414_v26 }
  0xff   :  { %633 = vrot.lane.b32.xlu0 %v11002_v29, %s10871_s0 }
 0x100   :  { %v419_v31 = vpop.f32.mrb[4].mxu0 }
 0x101   :  { %v420_v32 = vadd.f32 %v419_v31, %v10990_v23  ;;  %v421_v33 = vpop.f32.mrb[5].mxu0 }
 0x102   :  { %v11010_v34 = vadd.f32 %v421_v33, %v11006_v30  ;;  %v423_v35 = vpop.f32.mrb[6].mxu0 }
 0x103   :  { %v11012_v36 = vpack.c.bf16 %v420_v32, %v420_v32  ;;  %v424_v37 = vadd.f32 %v423_v35, %v10990_v23  ;;  %v425_v38 = vpop.f32.mrb[7].mxu0 }
 0x104   :  { %v11016_v39 = vadd.f32 %v425_v38, %v11006_v30 }
 0x105   :  { %v11019_v41 = vpack.c.bf16 %v424_v37, %v424_v37  ;;  %681 = vrot.lane.b32.xlu0 %v11012_v36, %s10871_s0 }
 0x107   :  { %729 = vrot.lane.b32.xlu1 %v11019_v41, %s10871_s0 }
 0x108   :  { %v429_v42 = vpop.f32.mrb[8].mxu0 }
 0x109   :  { %v430_v44 = vadd.f32 %v429_v42, %v10990_v23  ;;  %v431_v45 = vpop.f32.mrb[9].mxu0 }
 0x10a   :  { %v11029_v46 = vadd.f32 %v431_v45, %v11006_v30  ;;  %v433_v47 = vpop.f32.mrb[10].mxu0 }
 0x10b   :  { %584 = vrot.lane.b32.xlu1 %v11025_v43, %s10871_s0  ;;  %v11033_v48 = vpack.c.bf16 %v430_v44, %v430_v44  ;;  %v434_v49 = vadd.f32 %v433_v47, %v10990_v23  ;;  %v435_v50 = vpop.f32.mrb[11].mxu0 }
 0x10c   :  { %v11037_v51 = vadd.f32 %v435_v50, %v11006_v30 }
 0x10d   :  { %v11039_v52 = vpack.c.bf16 %v434_v49, %v434_v49  ;;  %777 = vrot.lane.b32.xlu0 %v11033_v48, %s10871_s0 }
 0x10f   :  { %825 = vrot.lane.b32.xlu1 %v11039_v52, %s10871_s0 }
 0x110   :  { %v439_v53 = vpop.f32.mrb[12].mxu0 }
 0x111   :  { %v440_v54 = vadd.f32 %v439_v53, %v10990_v23  ;;  %v441_v55 = vpop.f32.mrb[13].mxu0 }
 0x112   :  { %v11047_v56 = vadd.f32 %v441_v55, %v11006_v30  ;;  %v443_v57 = vpop.f32.mrb[14].mxu0 }
 0x113   :  { %v11049_v58 = vpack.c.bf16 %v440_v54, %v440_v54  ;;  %v444_v59 = vadd.f32 %v443_v57, %v10990_v23  ;;  %v445_v60 = vpop.f32.mrb[15].mxu0 }
 0x114   :  { %v11053_v61 = vadd.f32 %v445_v60, %v11006_v30 }
 0x115   :  { %v11055_v62 = vpack.c.bf16 %v444_v59, %v444_v59  ;;  %873 = vrot.lane.b32.xlu0 %v11049_v58, %s10871_s0 }
 0x117   :  { %921 = vrot.lane.b32.xlu1 %v11055_v62, %s10871_s0 }
 0x118   :  { %v449_v63 = vpop.f32.mrb[16].mxu0 }
 0x119   :  { %v450_v0 = vadd.f32 %v449_v63, %v10990_v23  ;;  %v451_v1 = vpop.f32.mrb[17].mxu0 }
 0x11a   :  { %v11063_v2 = vadd.f32 %v451_v1, %v11006_v30  ;;  %v453_v3 = vpop.f32.mrb[18].mxu0 }
 0x11b   :  { %v11065_v4 = vpack.c.bf16 %v450_v0, %v450_v0  ;;  %v454_v5 = vadd.f32 %v453_v3, %v10990_v23  ;;  %v455_v6 = vpop.f32.mrb[19].mxu0 }
 0x11c   :  { %v11069_v7 = vadd.f32 %v455_v6, %v11006_v30 }
 0x11d   :  { %v11071_v8 = vpack.c.bf16 %v454_v5, %v454_v5  ;;  %969 = vrot.lane.b32.xlu0 %v11065_v4, %s10871_s0 }
 0x11f   :  { %1017 = vrot.lane.b32.xlu1 %v11071_v8, %s10871_s0 }
 0x120   :  { %v459_v9 = vpop.f32.mrb[20].mxu0 }
 0x121   :  { %v460_v10 = vadd.f32 %v459_v9, %v10990_v23  ;;  %v461_v11 = vpop.f32.mrb[21].mxu0 }
 0x122   :  { %v11079_v12 = vadd.f32 %v461_v11, %v11006_v30  ;;  %v463_v13 = vpop.f32.mrb[22].mxu0 }
 0x123   :  { %v11081_v14 = vpack.c.bf16 %v460_v10, %v460_v10  ;;  %v464_v15 = vadd.f32 %v463_v13, %v10990_v23  ;;  %v465_v16 = vpop.f32.mrb[23].mxu0 }
 0x124   :  { %v11085_v21 = vadd.f32 %v465_v16, %v11006_v30 }
 0x125   :  { %v11087_v22 = vpack.c.bf16 %v464_v15, %v464_v15  ;;  %1065 = vrot.lane.b32.xlu0 %v11081_v14, %s10871_s0 }
 0x127   :  { %1113 = vrot.lane.b32.xlu1 %v11087_v22, %s10871_s0 }
 0x128   :  { %v469_v25 = vpop.f32.mrb[24].mxu0 }
 0x129   :  { %v470_v26 = vadd.f32 %v469_v25, %v10990_v23  ;;  %v471_v28 = vpop.f32.mrb[25].mxu0 }
 0x12a   :  { %v11095_v31 = vadd.f32 %v471_v28, %v11006_v30  ;;  %v473_v32 = vpop.f32.mrb[26].mxu0 }
 0x12b   :  { %v11097_v33 = vpack.c.bf16 %v470_v26, %v470_v26  ;;  %v474_v35 = vadd.f32 %v473_v32, %v10990_v23  ;;  %v475_v37 = vpop.f32.mrb[27].mxu0 }
 0x12c   :  { %v11101_v38 = vadd.f32 %v475_v37, %v11006_v30 }
 0x12d   :  { %v11103_v40 = vpack.c.bf16 %v474_v35, %v474_v35  ;;  %1161 = vrot.lane.b32.xlu0 %v11097_v33, %s10871_s0 }
 0x12f   :  { %1209 = vrot.lane.b32.xlu1 %v11103_v40, %s10871_s0 }
 0x130   :  { %v479_v42 = vpop.f32.mrb[28].mxu0 }
 0x131   :  { %v480_v44 = vadd.f32 %v479_v42, %v10990_v23  ;;  %v481_v45 = vpop.f32.mrb[29].mxu0 }
 0x132   :  { %v11111_v47 = vadd.f32 %v481_v45, %v11006_v30  ;;  %v483_v49 = vpop.f32.mrb[30].mxu0 }
 0x133   :  { %v11113_v50 = vpack.c.bf16 %v480_v44, %v480_v44  ;;  %v484_v53 = vadd.f32 %v483_v49, %v10990_v23  ;;  %v485_v54 = vpop.f32.mrb[31].mxu0 }
 0x134   :  { %v11117_v55 = vadd.f32 %v485_v54, %v11006_v30 }
 0x135   :  { %v11119_v57 = vpack.c.bf16 %v484_v53, %v484_v53  ;;  %1257 = vrot.lane.b32.xlu0 %v11113_v50, %s10871_s0  ;;  %v416_v53 = vadd.f32 %v10999_v27, %v11006_v30 }
 0x137   :  { %1305 = vrot.lane.b32.xlu1 %v11119_v57, %s10871_s0  ;;  %v11197_v27 = vpack.c.bf16 %v416_v53, %v416_v53 }
 0x171   :  { %v634_v59 = vpop.permute.xlu0 %633 }
 0x172   :  { %v639_v60 = vsel %vm586_vm2, %v634_v59, 0 }
 0x173   :  { %9401 = vmatpush3.bf16.xpose.msra.mxu1 %v639_v60 }
 0x174   :  { %9406 = vmatprep.subr.bf16.mxu1 %v13616_v19 }
 0x177   :  { %v682_v23 = vpop.permute.xlu0 %681 }
 0x178   :  { %v687_v63 = vsel %vm586_vm2, %v682_v23, 0  ;;  %v1597_v23 = vsel %vm1549_vm3, %v11197_v27, 0 }
 0x179   :  { %v730_v0 = vpop.permute.xlu1 %729 }
 0x17a   :  { %9403 = vmatmul.mubr.msk.bf16.vlgmr.msra.gmra.mrb[0].mxu1 %vm586_vm2, %v11002_v29  ;;  %v735_v5 = vsel %vm586_vm2, %v730_v0, 0 }
 0x17b   :  { %9407 = vmatpush3.bf16.xpose.msra.mxu1 %v687_v63  ;;  %9408 = vmatprep.mubr.msk.bf16.mxu1 %vm10870_vm1, %v13616_v19 }
 0x17c   :  { %9412 = vmatprep.subr.bf16.mxu1 %v13616_v19 }
 0x17d   :  { %v585_v1 = vpop.permute.xlu1 %584 }
 0x17e   :  { %v591_v3 = vsel %vm586_vm2, %v585_v1, 0 }
 0x17f   :  { %9395 = vmatpush3.bf16.xpose.msra.mxu0 %v591_v3  ;;  %v778_v6 = vpop.permute.xlu0 %777 }
 0x180   :  { %9448 = vmatprep.subr.bf16.mxu0 %v13616_v19  ;;  %v783_v10 = vsel %vm586_vm2, %v778_v6, 0 }
 0x181   :  { %v826_v9 = vpop.permute.xlu1 %825 }
 0x182   :  { %9409 = vmatmul.mubr.msk.bf16.vlgmr.msra.gmra.mrb[4].mxu1 %vm586_vm2, %v11012_v36  ;;  %v831_v15 = vsel %vm586_vm2, %v826_v9, 0 }
 0x183   :  { %9413 = vmatpush3.bf16.xpose.msra.mxu1 %v735_v5  ;;  %9414 = vmatprep.mubr.msk.bf16.mxu1 %vm10870_vm1, %v13616_v19  ;;  %v412_v5 = vadd.f32 %v10992_v24, %v11006_v30  ;;  %v10872_v24 = vmov 1966171168  }
 0x184   :  { %9418 = vmatprep.subr.bf16.mxu1 %v13616_v19  ;;  %v74_v30 = vunpack.c.l.s4 %v10872_v24 }
 0x185   :  { %v11226_v6 = vpack.c.bf16 %v412_v5, %v412_v5 }
 0x186   :  { %9397 = vmatmul.mubr.msk.bf16.vlgmr.msra.gmra.mrb[32].mxu0 %vm586_vm2, %v11025_v43 }
 0x187   :  { %9450 = vmatprep.mubr.msk.bf16.mxu0 %vm10870_vm1, %v13616_v19  ;;  %v874_v25 = vpop.permute.xlu0 %873  ;;  %v1551_v9 = vsel %vm1549_vm3, %v11226_v6, 0 }
 0x188   :  { %v879_v26 = vsel %vm586_vm2, %v874_v25, 0 }
 0x189   :  { %v922_v11 = vpop.permute.xlu1 %921 }
 0x18a   :  { %9415 = vmatmul.mubr.msk.bf16.vlgmr.msra.gmra.mrb[8].mxu1 %vm586_vm2, %v11019_v41  ;;  %v927_v37 = vsel %vm586_vm2, %v922_v11, 0  ;;  %v75_v11 = vunpack.c.0.s8 %v74_v30 }
 0x18b   :  { %9419 = vmatpush3.bf16.xpose.msra.mxu1 %v783_v10  ;;  %9420 = vmatprep.mubr.msk.bf16.mxu1 %vm10870_vm1, %v13616_v19  ;;  %v64_v10 = vld [vmem:[%s13606_s1] sm:$0xff] }
 0x18c   :  { %9424 = vmatprep.subr.bf16.mxu1 %v13616_v19  ;;  %vm66_vm4 = vcmp.eq.f32.partialorder %v64_v10, 0.0 }
 0x18f   :  { %v970_v44 = vpop.permute.xlu0 %969 }
 0x190   :  { %v975_v45 = vsel %vm586_vm2, %v970_v44, 0 }
 0x191   :  { %v1018_v13 = vpop.permute.xlu1 %1017 }
 0x192   :  { %v1023_v16 = vsel %vm586_vm2, %v1018_v13, 0  ;;  %9421 = vmatmul.mubr.msk.bf16.vlgmr.msra.gmra.mrb[12].mxu1 %vm586_vm2, %v11033_v48  ;;  %v11239_v13 = vsub.s32 %v75_v11, %v10979_v18 }
 0x193   :  { %9425 = vmatpush3.bf16.xpose.msra.mxu1 %v831_v15  ;;  %9449 = vmatpush3.bf16.xpose.msra.mxu0 %v1023_v16  ;;  %v68_v15 = vsel %vm66_vm4, -1e+09, %v13616_v19 }
 0x194   :  { %9426 = vmatprep.mubr.msk.bf16.mxu1 %vm10870_vm1, %v13616_v19  ;;  %9430 = vmatprep.subr.bf16.mxu1 %v13616_v19  ;;  %v79_v16 = vrot.slane %v68_v15, %v11239_v13 }
 0x195   :  { %9460 = vmatprep.subr.bf16.mxu0 %v13616_v19 }
 0x196   :  { %v87_v25 = vcombine.high %v79_v16, %v79_v16 }
 0x197   :  { %v1066_v59 = vpop.permute.xlu0 %1065 }
 0x198   :  { %v1071_v60 = vsel %vm586_vm2, %v1066_v59, 0 }
 0x199   :  { %v1114_v28 = vpop.permute.xlu1 %1113 }
 0x19a   :  { %v1119_v32 = vsel %vm586_vm2, %v1114_v28, 0  ;;  %9427 = vmatmul.mubr.msk.bf16.vlgmr.msra.gmra.mrb[16].mxu1 %vm586_vm2, %v11039_v52  ;;  %9451 = vmatmul.mubr.msk.bf16.vlgmr.msra.gmra.mrb[36].mxu0 %vm586_vm2, %v11071_v8 }
 0x19b   :  { %9431 = vmatpush3.bf16.xpose.msra.mxu1 %v879_v26  ;;  %9461 = vmatpush3.bf16.xpose.msra.mxu0 %v1119_v32  ;;  %v109_v26 = vrot.slane %v87_v25, %v11239_v13 }
 0x19c   :  { %9432 = vmatprep.mubr.msk.bf16.mxu1 %vm10870_vm1, %v13616_v19  ;;  %9462 = vmatprep.mubr.msk.bf16.mxu0 %vm10870_vm1, %v13616_v19 }
 0x19d   :  { %9436 = vmatprep.subr.bf16.mxu1 %v13616_v19  ;;  %9472 = vmatprep.subr.bf16.mxu0 %v13616_v19  ;;  %v11245_v28 = vrot.slane %v109_v26, %v10984_v20 }
 0x19f   :  { %v1162_v63 = vpop.permute.xlu0 %1161  ;;  %13693 = vst [vmem:[#allocation9_spill] sm:$0xff] %v11245_v28 }
 0x1a0   :  { %v1167_v0 = vsel %vm586_vm2, %v1162_v63, 0 }
 0x1a1   :  { %v1210_v35 = vpop.permute.xlu1 %1209 }
 0x1a2   :  { %v1215_v42 = vsel %vm586_vm2, %v1210_v35, 0  ;;  %9433 = vmatmul.mubr.msk.bf16.vlgmr.msra.gmra.mrb[20].mxu1 %vm586_vm2, %v11049_v58  ;;  %9463 = vmatmul.mubr.msk.bf16.vlgmr.msra.gmra.mrb[40].mxu0 %vm586_vm2, %v11087_v22 }
 0x1a3   :  { %9437 = vmatpush3.bf16.xpose.msra.mxu1 %v927_v37  ;;  %9473 = vmatpush3.bf16.xpose.msra.mxu0 %v1215_v42 }
 0x1a4   :  { %9438 = vmatprep.mubr.msk.bf16.mxu1 %vm10870_vm1, %v13616_v19  ;;  %9474 = vmatprep.mubr.msk.bf16.mxu0 %vm10870_vm1, %v13616_v19 }
 0x1a5   :  { %9442 = vmatprep.subr.bf16.mxu1 %v13616_v19  ;;  %9484 = vmatprep.subr.bf16.mxu0 %v13616_v19 }
 0x1a7   :  { %v1258_v1 = vpop.permute.xlu0 %1257 }
 0x1a8   :  { %v1263_v3 = vsel %vm586_vm2, %v1258_v1, 0 }
 0x1a9   :  { %v1306_v49 = vpop.permute.xlu1 %1305 }
 0x1aa   :  { %v1311_v54 = vsel %vm586_vm2, %v1306_v49, 0  ;;  %9439 = vmatmul.mubr.msk.bf16.vlgmr.msra.gmra.mrb[24].mxu1 %vm586_vm2, %v11055_v62  ;;  %9475 = vmatmul.mubr.msk.bf16.vlgmr.msra.gmra.mrb[44].mxu0 %vm586_vm2, %v11103_v40  ;;  %v95_v49 = vrot.slane %v79_v16, %v11239_v13 }
 0x1ab   :  { %9443 = vmatpush3.bf16.xpose.msra.mxu1 %v975_v45  ;;  %9485 = vmatpush3.bf16.xpose.msra.mxu0 %v1311_v54 }
 0x1ac   :  { %9444 = vmatprep.mubr.msk.bf16.mxu1 %vm10870_vm1, %v13616_v19  ;;  %9454 = vmatprep.subr.bf16.mxu1 %v13616_v19  ;;  %v117_v53 = vcombine.high %v95_v49, %v95_v49 }
 0x1ad   :  { %9486 = vmatprep.mubr.msk.bf16.mxu0 %vm10870_vm1, %v13616_v19  ;;  %9496 = vmatprep.subr.bf16.mxu0 %v13616_v19 }
 0x1ae   :  { %v11257_v1 = vrot.slane %v117_v53, %v10984_v20 }
 0x1b0   :  { %13695 = vst [vmem:[#allocation11_spill] sm:$0xff] %v11257_v1 }
 0x1b2   :  { %9445 = vmatmul.mubr.msk.bf16.vlgmr.msra.gmra.mrb[28].mxu1 %vm586_vm2, %v11065_v4  ;;  %9487 = vmatmul.mubr.msk.bf16.vlgmr.msra.gmra.mrb[48].mxu0 %vm586_vm2, %v11119_v57 }
 0x1b3   :  { %9455 = vmatpush3.bf16.xpose.msra.mxu1 %v1071_v60  ;;  %9497 = vmatpush3.bf16.msra.mxu0 %v1597_v23  ;;  %v11254_v60 = vrot.slane %v95_v49, %v10984_v20  ;;  %v72_v23 = vcombine.high %v68_v15, %v68_v15 }
 0x1b4   :  { %9456 = vmatprep.mubr.msk.bf16.mxu1 %vm10870_vm1, %v13616_v19  ;;  %9466 = vmatprep.subr.bf16.mxu1 %v13616_v19 }
 0x1b5   :  { %9498 = vmatprep.mubr.msk.bf16.mxu0 %vm10870_vm1, %v13616_v19  ;;  %9508 = vmatprep.subr.bf16.mxu0 %v13616_v19  ;;  %13694 = vst [vmem:[#allocation10_spill] sm:$0xff] %v11254_v60  ;;  %v86_v30 = vrot.slane %v72_v23, %v11239_v13 }
 0x1ba   :  { %9457 = vmatmul.mubr.msk.bf16.vlgmr.msra.gmra.mrb[32].mxu1 %vm586_vm2, %v11081_v14 }
 0x1bb   :  { %9467 = vmatpush3.bf16.xpose.msra.mxu1 %v1167_v0  ;;  %9468 = vmatprep.mubr.msk.bf16.mxu1 %vm10870_vm1, %v13616_v19 }
 0x1bc   :  { %9478 = vmatprep.subr.bf16.mxu1 %v13616_v19 }
 0x1c2   :  { %9469 = vmatmul.mubr.msk.bf16.vlgmr.msra.gmra.mrb[36].mxu1 %vm586_vm2, %v11097_v33 }
 0x1c3   :  { %9479 = vmatpush3.bf16.xpose.msra.mxu1 %v1263_v3  ;;  %9480 = vmatprep.mubr.msk.bf16.mxu1 %vm10870_vm1, %v13616_v19  ;;  %v119_v3 = vcombine.high %v109_v26, %v109_v26 }
 0x1c4   :  { %9490 = vmatprep.subr.bf16.mxu1 %v13616_v19 }
 0x1c5   :  { %v11269_v25 = vrot.slane %v119_v3, %v10984_v20 }
 0x1c7   :  { %13696 = vst [vmem:[#allocation12_spill] sm:$0xff] %v11269_v25 }
 0x1ca   :  { %9481 = vmatmul.mubr.msk.bf16.vlgmr.msra.gmra.mrb[40].mxu1 %vm586_vm2, %v11113_v50 }
 0x1cb   :  { %9491 = vmatpush3.bf16.msra.mxu1 %v1551_v9  ;;  %9492 = vmatprep.mubr.msk.bf16.mxu1 %vm10870_vm1, %v13616_v19 }
 0x1cc   :  { %9502 = vmatprep.subr.bf16.mxu1 %v13616_v19 }
 0x24d   :  { %v675_v32 = vpop.f32.mrb[0].mxu1 }
 0x24e   :  { %v9404_v35 = vpop.f32.mrb[1].mxu1  ;;  %v11248_v37 = vadd.f32 %v675_v32, %v11245_v28 }
 0x24f   :  { %v678_v42 = vpop.f32.mrb[2].mxu1  ;;  %v102_v35 = vrot.slane %v86_v30, %v11239_v13 }
 0x250   :  { %v9405_v44 = vpop.f32.mrb[3].mxu1  ;;  %v1357_v45 = vsel %vm1353_vm5, %v11248_v37, -inf }
 0x251   :  { %1358 = vmax.xlane.f32.xlu1 %v1357_v45  ;;  %v11278_v53 = vrot.slane %v102_v35, %v10984_v20 }
 0x253   :  { %13697 = vst [vmem:[#allocation13_spill] sm:$0xff] %v11278_v53 }
 0x255   :  { %v723_v54 = vpop.f32.mrb[4].mxu1 }
 0x256   :  { %v9410_v59 = vpop.f32.mrb[5].mxu1  ;;  %v11266_v15 = vadd.f32 %v723_v54, %v11257_v1  ;;  %v88_v54 = vcombine.high %v86_v30, %v86_v30 }
 0x257   :  { %v726_v63 = vpop.f32.mrb[6].mxu1 }
 0x258   :  { %v9411_v0 = vpop.f32.mrb[7].mxu1  ;;  %v1360_v45 = vsel %vm1353_vm5, %v11266_v15, -inf  ;;  %v116_v3 = vrot.slane %v88_v54, %v11239_v13  ;;  %v118_v54 = vcombine.high %v102_v35, %v102_v35 }
 0x259   :  { %v627_v5 = vpop.f32.mrb[32].mxu0 }
 0x25a   :  { %v9398_v9 = vpop.f32.mrb[33].mxu0  ;;  %v11260_v24 = vadd.f32 %v627_v5, %v11254_v60 }
 0x25b   :  { %v630_v10 = vpop.f32.mrb[34].mxu0  ;;  %v65_v9 = vld [vmem:[%s13606_s1 + $0x8] sm:$0xff]  ;;  %s10873_s1 = smov 48  }
 0x25c   :  { %v9399_v11 = vpop.f32.mrb[35].mxu0  ;;  %v1354_v16 = vsel %vm1353_vm5, %v11260_v24, -inf  ;;  %vm67_vm6 = vcmp.eq.f32.partialorder %v65_v9, 0.0  ;;  %v11302_v9 = vrot.slane %v118_v54, %v10984_v20 }
 0x25d   :  { %v771_v32 = vpop.f32.mrb[8].mxu1  ;;  %1355 = vmax.xlane.f32.xlu0 %v1354_v16  ;;  %v11292_v11 = vrot.slane %v116_v3, %v10984_v20 }
 0x25e   :  { %v9416_v26 = vpop.f32.mrb[9].mxu1  ;;  %v11275_v49 = vadd.f32 %v771_v32, %v11269_v25  ;;  %13699 = vst [vmem:[#allocation15_spill] sm:$0xff] %v11302_v9 }
 0x25f   :  { %v774_v42 = vpop.f32.mrb[10].mxu1  ;;  %13698 = vst [vmem:[#allocation14_spill] sm:$0xff] %v11292_v11  ;;  %v69_v26 = vsel %vm67_vm6, -1e+09, %v13616_v19 }
 0x260   :  { %v9417_v44 = vpop.f32.mrb[11].mxu1  ;;  %v1363_v59 = vsel %vm1353_vm5, %v11275_v49, -inf }
 0x261   :  { %1361 = vmax.xlane.f32.xlu0 %v1360_v45 }
 0x265   :  { %v819_v23 = vpop.f32.mrb[12].mxu1  ;;  %1364 = vmax.xlane.f32.xlu0 %v1363_v59 }
 0x266   :  { %v9422_v63 = vpop.f32.mrb[13].mxu1  ;;  %v11283_v0 = vadd.f32 %v819_v23, %v11278_v53 }
 0x267   :  { %v822_v5 = vpop.f32.mrb[14].mxu1 }
 0x268   :  { %v9423_v10 = vpop.f32.mrb[15].mxu1  ;;  %v1366_v30 = vsel %vm1353_vm5, %v11283_v0, -inf }
 0x269   :  { %1367 = vmax.xlane.f32.xlu1 %v1366_v30  ;;  %v128_v30 = vrot.slane %v69_v26, %v11239_v13 }
 0x26b   :  { %v136_v17 = vcombine.high %v128_v30, %v128_v30 }
 0x26d   :  { %v867_v16 = vpop.f32.mrb[16].mxu1  ;;  %v1059_v32 = vpop.f32.mrb[36].mxu0 }
 0x26e   :  { %v9428_v42 = vpop.f32.mrb[17].mxu1  ;;  %v9452_v44 = vpop.f32.mrb[37].mxu0  ;;  %v11296_v45 = vadd.f32 %v867_v16, %v11292_v11 }
 0x26f   :  { %v870_v59 = vpop.f32.mrb[18].mxu1  ;;  %v1062_v23 = vpop.f32.mrb[38].mxu0  ;;  %v121_v42 = vcombine.high %v69_v26, %v69_v26 }
 0x270   :  { %v9429_v63 = vpop.f32.mrb[19].mxu1  ;;  %v9453_v5 = vpop.f32.mrb[39].mxu0  ;;  %v1369_v10 = vsel %vm1353_vm5, %v11296_v45, -inf  ;;  %v120_v59 = vcombine.high %v116_v3, %v116_v3 }
 0x271   :  { %1370 = vmax.xlane.f32.xlu0 %v1369_v10  ;;  %v158_v5 = vrot.slane %v136_v17, %v11239_v13  ;;  %v135_v10 = vrot.slane %v121_v42, %v11239_v13 }
 0x272   :  { %v11312_v26 = vrot.slane %v120_v59, %v10984_v20 }
 0x274   :  { %13700 = vst [vmem:[#allocation16_spill] sm:$0xff] %v11312_v26 }
 0x275   :  { %v915_v44 = vpop.f32.mrb[20].mxu1  ;;  %v1155_v19 = vpop.f32.mrb[40].mxu0 }
 0x276   :  { %v9434_v16 = vpop.f32.mrb[21].mxu1  ;;  %v9464_v18 = vpop.f32.mrb[41].mxu0  ;;  %v11305_v35 = vadd.f32 %v915_v44, %v11302_v9  ;;  %v11315_v44 = vrot.slane %v158_v5, %v10984_v20 }
 0x277   :  { %v918_v23 = vpop.f32.mrb[22].mxu1  ;;  %v1158_v63 = vpop.f32.mrb[42].mxu0  ;;  %v168_v18 = vcombine.high %v158_v5, %v158_v5  ;;  %v137_v16 = vcombine.high %v135_v10, %v135_v10 }
 0x278   :  { %v9435_v53 = vpop.f32.mrb[23].mxu1  ;;  %v9465_v11 = vpop.f32.mrb[43].mxu0  ;;  %v1372_v54 = vsel %vm1353_vm5, %v11305_v35, -inf  ;;  %13701 = vst [vmem:[#allocation17_spill] sm:$0xff] %v11315_v44 }
 0x279   :  { %1373 = vmax.xlane.f32.xlu1 %v1372_v54  ;;  %v144_v11 = vrot.slane %v128_v30, %v11239_v13  ;;  %v11322_v54 = vrot.slane %v168_v18, %v10984_v20  ;;  %v165_v59 = vrot.slane %v137_v16, %v11239_v13 }
 0x27b   :  { %13702 = vst [vmem:[#allocation18_spill] sm:$0xff] %v11322_v54  ;;  %v11334_v30 = vadd.f32 %v1155_v19, %v11322_v54 }
 0x27d   :  { %v963_v3 = vpop.f32.mrb[24].mxu1  ;;  %v1251_v23 = vpop.f32.mrb[44].mxu0 }
 0x27e   :  { %v9440_v63 = vpop.f32.mrb[25].mxu1  ;;  %v9476_v17 = vpop.f32.mrb[45].mxu0  ;;  %v11318_v53 = vadd.f32 %v963_v3, %v11312_v26  ;;  %v11331_v3 = vrot.slane %v144_v11, %v10984_v20 }
 0x27f   :  { %v966_v9 = vpop.f32.mrb[26].mxu1  ;;  %v1254_v42 = vpop.f32.mrb[46].mxu0  ;;  %v11328_v63 = vadd.f32 %v1059_v32, %v11315_v44 }
 0x280   :  { %v9441_v25 = vpop.f32.mrb[27].mxu1  ;;  %v9477_v1 = vpop.f32.mrb[47].mxu0  ;;  %v1375_v5 = vsel %vm1353_vm5, %v11318_v53, -inf  ;;  %13703 = vst [vmem:[#allocation19_spill] sm:$0xff] %v11331_v3  ;;  %v11337_v9 = vrot.slane %v165_v59, %v10984_v20 }
 0x281   :  { %1376 = vmax.xlane.f32.xlu0 %v1375_v5  ;;  %v1381_v25 = vsel %vm1353_vm5, %v11328_v63, -inf  ;;  %v169_v1 = vcombine.high %v165_v59, %v165_v59  ;;  %v166_v5 = vcombine.high %v144_v11, %v144_v11  ;;  %v1387_v59 = vsel %vm1353_vm5, %v11334_v30, -inf }
 0x282   :  { %13704 = vst [vmem:[#allocation20_spill] sm:$0xff] %v11337_v9  ;;  %v11345_v19 = vadd.f32 %v1251_v23, %v11337_v9 }
 0x283   :  { %v11355_v11 = vrot.slane %v166_v5, %v10984_v20 }
 0x285   :  { %v1011_v18 = vpop.f32.mrb[28].mxu1  ;;  %1382 = vmax.xlane.f32.xlu0 %v1381_v25  ;;  %v1347_v16 = vpop.f32.mrb[48].mxu0  ;;  %v11352_v25 = vrot.slane %v169_v1, %v10984_v20  ;;  %13706 = vst [vmem:[#allocation22_spill] sm:$0xff] %v11355_v11  ;;  %v151_v1 = vrot.slane %v135_v10, %v11239_v13 }
 0x286   :  { %v9446_v17 = vpop.f32.mrb[29].mxu1  ;;  %v11342_v32 = vadd.f32 %v1011_v18, %v11331_v3  ;;  %v9488_v42 = vpop.f32.mrb[49].mxu0 }
 0x287   :  { %v1014_v44 = vpop.f32.mrb[30].mxu1  ;;  %v1350_v26 = vpop.f32.mrb[50].mxu0  ;;  %13705 = vst [vmem:[#allocation21_spill] sm:$0xff] %v11352_v25 }
 0x288   :  { %v9447_v54 = vpop.f32.mrb[31].mxu1  ;;  %v1378_v60 = vsel %vm1353_vm5, %v11342_v32, -inf  ;;  %v9489_v17 = vpop.f32.mrb[51].mxu0  ;;  %v1393_v26 = vsel %vm1353_vm5, %v11345_v19, -inf  ;;  %v11360_v44 = vadd.f32 %v1347_v16, %v11352_v25  ;;  %v11371_v16 = vrot.slane %v151_v1, %v10984_v20 }
 0x289   :  { %1379 = vmax.xlane.f32.xlu1 %v1378_v60  ;;  %1388 = vmax.xlane.f32.xlu0 %v1387_v59 }
 0x28a   :  { %v1399_v59 = vsel %vm1353_vm5, %v11360_v44, -inf  ;;  %13707 = vst [vmem:[#allocation23_spill] sm:$0xff] %v11371_v16 }
 0x28d   :  { %v1107_v23 = vpop.f32.mrb[32].mxu1  ;;  %1394 = vmax.xlane.f32.xlu0 %v1393_v26 }
 0x28e   :  { %v9458_v54 = vpop.f32.mrb[33].mxu1  ;;  %v11363_v18 = vadd.f32 %v1107_v23, %v11355_v11 }
 0x28f   :  { %v1110_v42 = vpop.f32.mrb[34].mxu1  ;;  %v167_v54 = vcombine.high %v151_v1, %v151_v1 }
 0x290   :  { %v9459_v60 = vpop.f32.mrb[35].mxu1  ;;  %v1384_v5 = vsel %vm1353_vm5, %v11363_v18, -inf }
 0x291   :  { %1385 = vmax.xlane.f32.xlu1 %v1384_v5  ;;  %1400 = vmax.xlane.f32.xlu0 %v1399_v59  ;;  %v11379_v60 = vrot.slane %v167_v54, %v10984_v20 }
 0x293   :  { %13708 = vst [vmem:[#allocation24_spill] sm:$0xff] %v11379_v60 }
 0x295   :  { %v1203_v17 = vpop.f32.mrb[36].mxu1 }
 0x296   :  { %v9470_v26 = vpop.f32.mrb[37].mxu1  ;;  %v11374_v23 = vadd.f32 %v1203_v17, %v11371_v16 }
 0x297   :  { %v1206_v13 = vpop.f32.mrb[38].mxu1 }
 0x298   :  { %v9471_v10 = vpop.f32.mrb[39].mxu1  ;;  %v1390_v42 = vsel %vm1353_vm5, %v11374_v23, -inf }
 0x299   :  { %1391 = vmax.xlane.f32.xlu1 %v1390_v42 }
 0x29d   :  { %v1299_v5 = vpop.f32.mrb[40].mxu1 }
 0x29e   :  { %v9482_v59 = vpop.f32.mrb[41].mxu1  ;;  %v11382_v25 = vadd.f32 %v1299_v5, %v11379_v60 }
 0x29f   :  { %v1302_v11 = vpop.f32.mrb[42].mxu1 }
 0x2a0   :  { %v9483_v26 = vpop.f32.mrb[43].mxu1  ;;  %v1396_v17 = vsel %vm1353_vm5, %v11382_v25, -inf }
 0x2a1   :  { %1397 = vmax.xlane.f32.xlu1 %v1396_v17 }
 0x2de   :  { %v1359_v1 = vpop.xlane.xlu1 %1358 }
 0x2df   :  { %v1403_v13 = vsub.f32 %v11248_v37, %v1359_v1 }
 0x2e1   :  { %v1420_v10 = vmul.f32 1.442695, %v1403_v13 }
 0x2e3   :  { %10465 = vpow2.f32 %v1420_v10 }
 0x2ea   :  { %v1356_v42 = vpop.xlane.xlu0 %1355 }
 0x2eb   :  { %v1402_v20 = vsub.f32 %v11260_v24, %v1356_v42 }
 0x2ed   :  { %v11388_v54 = vpop.eup %10465  ;;  %v1418_v59 = vmul.f32 1.442695, %v1402_v20 }
 0x2ee   :  { %v1362_v16 = vpop.xlane.xlu0 %1361  ;;  %v1453_v11 = vsel %vm1353_vm5, %v11388_v54, 0.0 }
 0x2ef   :  { %10467 = vpow2.f32 %v1418_v59  ;;  %v1404_v5 = vsub.f32 %v11266_v15, %v1362_v16  ;;  %1454 = vadd.xlane.f32.xlu0 %v1453_v11 }
 0x2f1   :  { %v1422_v26 = vmul.f32 1.442695, %v1404_v5 }
 0x2f2   :  { %v1365_v17 = vpop.xlane.xlu0 %1364 }
 0x2f3   :  { %10469 = vpow2.f32 %v1422_v26  ;;  %v1405_v37 = vsub.f32 %v11275_v49, %v1365_v17 }
 0x2f5   :  { %v1424_v1 = vmul.f32 1.442695, %v1405_v37 }
 0x2f6   :  { %v1368_v13 = vpop.xlane.xlu1 %1367 }
 0x2f7   :  { %10471 = vpow2.f32 %v1424_v1  ;;  %v1406_v24 = vsub.f32 %v11283_v0, %v1368_v13 }
 0x2f9   :  { %v11395_v10 = vpop.eup %10467  ;;  %v1426_v42 = vmul.f32 1.442695, %v1406_v24 }
 0x2fa   :  { %v1450_v20 = vsel %vm1353_vm5, %v11395_v10, 0.0 }
 0x2fb   :  { %10473 = vpow2.f32 %v1426_v42  ;;  %1451 = vadd.xlane.f32.xlu1 %v1450_v20 }
 0x2fd   :  { %v11399_v15 = vpop.eup %10469 }
 0x2fe   :  { %v1371_v16 = vpop.xlane.xlu0 %1370  ;;  %v1456_v59 = vsel %vm1353_vm5, %v11399_v15, 0.0 }
 0x2ff   :  { %v1407_v49 = vsub.f32 %v11296_v45, %v1371_v16  ;;  %1457 = vadd.xlane.f32.xlu1 %v1456_v59 }
 0x301   :  { %v11404_v11 = vpop.eup %10471  ;;  %v1428_v0 = vmul.f32 1.442695, %v1407_v49 }
 0x302   :  { %v1459_v5 = vsel %vm1353_vm5, %v11404_v11, 0.0 }
 0x303   :  { %10475 = vpow2.f32 %v1428_v0  ;;  %1460 = vadd.xlane.f32.xlu0 %v1459_v5 }
 0x305   :  { %v11408_v26 = vpop.eup %10473 }
 0x306   :  { %v1374_v17 = vpop.xlane.xlu1 %1373  ;;  %v1462_v37 = vsel %vm1353_vm5, %v11408_v26, 0.0 }
 0x307   :  { %v1408_v1 = vsub.f32 %v11305_v35, %v1374_v17  ;;  %1463 = vadd.xlane.f32.xlu1 %v1462_v37 }
 0x309   :  { %v1430_v13 = vmul.f32 1.442695, %v1408_v1 }
 0x30b   :  { %10477 = vpow2.f32 %v1430_v13 }
 0x30d   :  { %v11413_v45 = vpop.eup %10475 }
 0x30e   :  { %v1377_v24 = vpop.xlane.xlu0 %1376  ;;  %v1465_v42 = vsel %vm1353_vm5, %v11413_v45, 0.0 }
 0x30f   :  { %v1409_v20 = vsub.f32 %v11318_v53, %v1377_v24  ;;  %1466 = vadd.xlane.f32.xlu0 %v1465_v42 }
 0x311   :  { %v1432_v16 = vmul.f32 1.442695, %v1409_v20 }
 0x312   :  { %v1383_v59 = vpop.xlane.xlu0 %1382 }
 0x313   :  { %10479 = vpow2.f32 %v1432_v16  ;;  %v1411_v49 = vsub.f32 %v11328_v63, %v1383_v59 }
 0x315   :  { %v11419_v0 = vpop.eup %10477  ;;  %v1436_v35 = vmul.f32 1.442695, %v1411_v49 }
 0x316   :  { %v1389_v5 = vpop.xlane.xlu0 %1388  ;;  %v1468_v17 = vsel %vm1353_vm5, %v11419_v0, 0.0 }
 0x317   :  { %10481 = vpow2.f32 %v1436_v35  ;;  %v1413_v37 = vsub.f32 %v11334_v30, %v1389_v5  ;;  %1469 = vadd.xlane.f32.xlu1 %v1468_v17 }
 0x319   :  { %v1440_v1 = vmul.f32 1.442695, %v1413_v37 }
 0x31a   :  { %v1395_v13 = vpop.xlane.xlu0 %1394 }
 0x31b   :  { %10483 = vpow2.f32 %v1440_v1  ;;  %v1415_v53 = vsub.f32 %v11345_v19, %v1395_v13  ;;  %v1380_v1 = vpop.xlane.xlu1 %1379 }
 0x31c   :  { %v1410_v13 = vsub.f32 %v11342_v32, %v1380_v1 }
 0x31d   :  { %v11425_v24 = vpop.eup %10479  ;;  %v1444_v42 = vmul.f32 1.442695, %v1415_v53 }
 0x31e   :  { %v1401_v63 = vpop.xlane.xlu0 %1400  ;;  %v1471_v20 = vsel %vm1353_vm5, %v11425_v24, 0.0 }
 0x31f   :  { %10485 = vpow2.f32 %v1444_v42  ;;  %v1417_v16 = vsub.f32 %v11360_v44, %v1401_v63  ;;  %1472 = vadd.xlane.f32.xlu0 %v1471_v20  ;;  %v1386_v53 = vpop.xlane.xlu1 %1385  ;;  %v1434_v42 = vmul.f32 1.442695, %v1410_v13 }
 0x320   :  { %v1412_v63 = vsub.f32 %v11363_v18, %v1386_v53 }
 0x321   :  { %v11430_v59 = vpop.eup %10481  ;;  %v1448_v30 = vmul.f32 1.442695, %v1417_v16 }
 0x322   :  { %v1477_v49 = vsel %vm1353_vm5, %v11430_v59, 0.0  ;;  %v1438_v16 = vmul.f32 1.442695, %v1412_v63  ;;  %v11500_v63 = vpack.c.bf16 %v11016_v39, %v11016_v39 }
 0x323   :  { %10487 = vpow2.f32 %v1448_v30  ;;  %1478 = vadd.xlane.f32.xlu0 %v1477_v49 }
 0x324   :  { %10489 = vpow2.f32 %v1434_v42 }
 0x325   :  { %v11434_v19 = vpop.eup %10483  ;;  %10491 = vpow2.f32 %v1438_v16  ;;  %v11508_v16 = vpack.c.bf16 %v11037_v51, %v11037_v51  ;;  %v1689_v51 = vsel %vm1549_vm3, %v11500_v63, 0 }
 0x326   :  { %v1483_v35 = vsel %vm1353_vm5, %v11434_v19, 0.0  ;;  %v1392_v20 = vpop.xlane.xlu1 %1391 }
 0x327   :  { %1484 = vadd.xlane.f32.xlu0 %v1483_v35  ;;  %v1414_v30 = vsub.f32 %v11374_v23, %v1392_v20 }
 0x328   :  { %2285 = vrot.lane.b32.xlu1 %v11025_v43, %s10873_s1 }
 0x329   :  { %v11440_v44 = vpop.eup %10485  ;;  %v1442_v49 = vmul.f32 1.442695, %v1414_v30 }
 0x32a   :  { %v1489_v5 = vsel %vm1353_vm5, %v11440_v44, 0.0 }
 0x32b   :  { %1490 = vadd.xlane.f32.xlu0 %v1489_v5  ;;  %10493 = vpow2.f32 %v1442_v49 }
 0x32d   :  { %v11444_v17 = vpop.eup %10487 }
 0x32e   :  { %v1495_v37 = vsel %vm1353_vm5, %v11444_v17, 0.0  ;;  %v11453_v35 = vpop.eup %10489  ;;  %v1398_v1 = vpop.xlane.xlu1 %1397 }
 0x32f   :  { %1496 = vadd.xlane.f32.xlu0 %v1495_v37  ;;  %v1474_v32 = vsel %vm1353_vm5, %v11453_v35, 0.0  ;;  %v11459_v18 = vpop.eup %10491  ;;  %v1416_v13 = vsub.f32 %v11382_v25, %v1398_v1 }
 0x330   :  { %v1480_v23 = vsel %vm1353_vm5, %v11459_v18, 0.0 }
 0x331   :  { %v1446_v53 = vmul.f32 1.442695, %v1416_v13 }
 0x333   :  { %10495 = vpow2.f32 %v1446_v53  ;;  %v11535_v53 = vpack.c.bf16 %v11010_v34, %v11010_v34 }
 0x335   :  { %v11465_v5 = vpop.eup %10493 }
 0x336   :  { %v1486_v37 = vsel %vm1353_vm5, %v11465_v5, 0.0 }
 0x33d   :  { %v11502_v25 = vpop.eup %10495 }
 0x33e   :  { %v1492_v49 = vsel %vm1353_vm5, %v11502_v25, 0.0 }
 0x345   :  { %2335 = vrot.lane.b32.xlu0 %v11002_v29, %s10873_s1 }
 0x349   :  { %2385 = vrot.lane.b32.xlu0 %v11012_v36, %s10873_s1 }
 0x34c   :  { %1475 = vadd.xlane.f32.xlu1 %v1474_v32 }
 0x34d   :  { %2383 = vrot.lane.b32.xlu0 %v11012_v36, %s10874_s23 }
 0x350   :  { %1481 = vadd.xlane.f32.xlu1 %v1480_v23  ;;  %v11517_v23 = vpack.c.bf16 %v11053_v61, %v11053_v61  ;;  %v11529_v61 = vpack.c.bf16 %v11069_v7, %v11069_v7  ;;  %v1643_v7 = vsel %vm1549_vm3, %v11535_v53, 0 }
 0x351   :  { %2485 = vrot.lane.b32.xlu0 %v11033_v48, %s10873_s1 }
 0x352   :  { %13710 = vst [vmem:[#allocation25_spill] sm:$0xff] %v11529_v61 }
 0x354   :  { %1487 = vadd.xlane.f32.xlu1 %v1486_v37 }
 0x355   :  { %2483 = vrot.lane.b32.xlu0 %v11033_v48, %s10874_s23 }
 0x359   :  { %2585 = vrot.lane.b32.xlu0 %v11049_v58, %s10873_s1 }
 0x35d   :  { %2583 = vrot.lane.b32.xlu0 %v11049_v58, %s10874_s23 }
 0x361   :  { %2685 = vrot.lane.b32.xlu0 %v11065_v4, %s10873_s1 }
 0x365   :  { %2683 = vrot.lane.b32.xlu0 %v11065_v4, %s10874_s23  ;;  %2283 = vrot.lane.b32.xlu1 %v11025_v43, %s10874_s23 }
 0x369   :  { %2785 = vrot.lane.b32.xlu0 %v11081_v14, %s10873_s1 }
 0x36d   :  { %2783 = vrot.lane.b32.xlu0 %v11081_v14, %s10874_s23 }
 0x371   :  { %2885 = vrot.lane.b32.xlu0 %v11097_v33, %s10873_s1 }
 0x375   :  { %2883 = vrot.lane.b32.xlu0 %v11097_v33, %s10874_s23 }
 0x379   :  { %2985 = vrot.lane.b32.xlu0 %v11113_v50, %s10873_s1 }
 0x37c   :  { %v1455_v42 = vpop.xlane.xlu0 %1454 }
 0x37d   :  { %10497 = vrcp.f32 %v1455_v42  ;;  %2983 = vrot.lane.b32.xlu0 %v11113_v50, %s10874_s23 }
 0x381   :  { %3323 = vrot.lane.b32.xlu0 %v11197_v27, %s10874_s23 }
 0x385   :  { %3419 = vrot.lane.b32.xlu0 %v11500_v63, %s10874_s23 }
 0x387   :  { %v10498_v20 = vpop.eup %10497 }
 0x388   :  { %v1452_v30 = vpop.xlane.xlu1 %1451  ;;  %v1515_v32 = vmul.f32 %v10498_v20, %v11388_v54  ;;  %v13709_v54 = vmov 0.0  }
 0x389   :  { %10499 = vrcp.f32 %v1452_v30  ;;  %3515 = vrot.lane.b32.xlu0 %v11508_v16, %s10874_s23  ;;  %1493 = vadd.xlane.f32.xlu1 %v1492_v49 }
 0x38a   :  { %v1531_v39 = vpack.c.bf16 %v1515_v32, %v1515_v32  ;;  %v11549_v32 = vpack.c.bf16 %v11029_v46, %v11029_v46  ;;  %v1781_v46 = vsel %vm1549_vm3, %v11508_v16, 0 }
 0x38c   :  { %9499 = vmatmul.mubr.msk.bf16.vlgmr.msra.gmra.mrb[52].mxu0 %vm1353_vm5, %v1531_v39  ;;  %v1458_v37 = vpop.xlane.xlu1 %1457  ;;  %13711 = vst [vmem:[#allocation26_spill] sm:$0xff] %v11549_v32 }
 0x38d   :  { %9509 = vmatpush3.bf16.msra.mxu0 %v1689_v51  ;;  %10501 = vrcp.f32 %v1458_v37  ;;  %3611 = vrot.lane.b32.xlu0 %v11517_v23, %s10874_s23 }
 0x38e   :  { %9510 = vmatprep.mubr.msk.bf16.mxu0 %vm10870_vm1, %v13709_v54  ;;  %9520 = vmatprep.subr.bf16.mxu0 %v13709_v54 }
 0x390   :  { %v1461_v1 = vpop.xlane.xlu0 %1460 }
 0x391   :  { %10503 = vrcp.f32 %v1461_v1  ;;  %3707 = vrot.lane.b32.xlu0 %v11529_v61, %s10874_s23 }
 0x393   :  { %v10500_v13 = vpop.eup %10499 }
 0x394   :  { %v1464_v42 = vpop.xlane.xlu1 %1463  ;;  %v1514_v20 = vmul.f32 %v10500_v13, %v11395_v10 }
 0x395   :  { %10505 = vrcp.f32 %v1464_v42  ;;  %v11570_v42 = vpack.c.bf16 %v11047_v56, %v11047_v56 }
 0x396   :  { %v1530_v30 = vpack.c.bf16 %v1514_v20, %v1514_v20 }
 0x397   :  { %v10502_v49 = vpop.eup %10501  ;;  %13712 = vst [vmem:[#allocation27_spill] sm:$0xff] %v11570_v42 }
 0x398   :  { %9493 = vmatmul.mubr.msk.bf16.vlgmr.msra.gmra.mrb[44].mxu1 %vm1353_vm5, %v1530_v30  ;;  %v1516_v34 = vmul.f32 %v10502_v49, %v11399_v15  ;;  %v1735_v15 = vsel %vm1549_vm3, %v11549_v32, 0 }
 0x399   :  { %9503 = vmatpush3.bf16.msra.mxu1 %v1643_v7  ;;  %9504 = vmatprep.mubr.msk.bf16.mxu1 %vm10870_vm1, %v13709_v54 }
 0x39a   :  { %2333 = vrot.lane.b32.xlu1 %v11002_v29, %s10874_s23  ;;  %9514 = vmatprep.subr.bf16.mxu1 %v13709_v54  ;;  %v1532_v37 = vpack.c.bf16 %v1516_v34, %v1516_v34  ;;  %v1873_v34 = vsel %vm1549_vm3, %v11517_v23, 0 }
 0x39b   :  { %v10504_v10 = vpop.eup %10503 }
 0x39c   :  { %v1467_v39 = vpop.xlane.xlu0 %1466  ;;  %v1517_v51 = vmul.f32 %v10504_v10, %v11404_v11 }
 0x39d   :  { %10507 = vrcp.f32 %v1467_v39  ;;  %v11594_v39 = vpack.c.bf16 %v11063_v2, %v11063_v2 }
 0x39e   :  { %2435 = vrot.lane.b32.xlu1 %v11019_v41, %s10873_s1  ;;  %v1533_v1 = vpack.c.bf16 %v1517_v51, %v1517_v51 }
 0x39f   :  { %v10506_v13 = vpop.eup %10505  ;;  %13713 = vst [vmem:[#allocation28_spill] sm:$0xff] %v11594_v39 }
 0x3a0   :  { %9505 = vmatmul.mubr.msk.bf16.vlgmr.msra.gmra.mrb[48].mxu1 %vm1353_vm5, %v1532_v37  ;;  %9511 = vmatmul.mubr.msk.bf16.vlgmr.msra.gmra.mrb[56].mxu0 %vm1353_vm5, %v1533_v1  ;;  %v1518_v11 = vmul.f32 %v10506_v13, %v11408_v26  ;;  %v1827_v26 = vsel %vm1549_vm3, %v11570_v42, 0  ;;  %v1919_v13 = vsel %vm1549_vm3, %v11594_v39, 0 }
 0x3a1   :  { %9515 = vmatpush3.bf16.msra.mxu1 %v1735_v15  ;;  %9521 = vmatpush3.bf16.msra.mxu0 %v1781_v46 }
 0x3a2   :  { %2433 = vrot.lane.b32.xlu1 %v11019_v41, %s10874_s23  ;;  %9516 = vmatprep.mubr.msk.bf16.mxu1 %vm10870_vm1, %v13709_v54  ;;  %v1534_v30 = vpack.c.bf16 %v1518_v11, %v1518_v11 }
 0x3a3   :  { %9526 = vmatprep.subr.bf16.mxu1 %v13709_v54  ;;  %9522 = vmatprep.mubr.msk.bf16.mxu0 %vm10870_vm1, %v13709_v54 }
 0x3a4   :  { %v1470_v20 = vpop.xlane.xlu1 %1469  ;;  %9532 = vmatprep.subr.bf16.mxu0 %v13709_v54 }
 0x3a5   :  { %10509 = vrcp.f32 %v1470_v20  ;;  %v1965_v20 = vsel %vm1549_vm3, %v11529_v61, 0 }
 0x3a6   :  { %2535 = vrot.lane.b32.xlu1 %v11039_v52, %s10873_s1 }
 0x3a7   :  { %v10508_v49 = vpop.eup %10507 }
 0x3a8   :  { %9517 = vmatmul.mubr.msk.bf16.vlgmr.msra.gmra.mrb[52].mxu1 %vm1353_vm5, %v1534_v30  ;;  %v1519_v7 = vmul.f32 %v10508_v49, %v11413_v45  ;;  %v11621_v49 = vpack.c.bf16 %v11085_v21, %v11085_v21 }
 0x3a9   :  { %9527 = vmatpush3.bf16.msra.mxu1 %v1827_v26  ;;  %9528 = vmatprep.mubr.msk.bf16.mxu1 %vm10870_vm1, %v13709_v54 }
 0x3aa   :  { %2533 = vrot.lane.b32.xlu1 %v11039_v52, %s10874_s23  ;;  %v1535_v56 = vpack.c.bf16 %v1519_v7, %v1519_v7  ;;  %9538 = vmatprep.subr.bf16.mxu1 %v13709_v54  ;;  %13714 = vst [vmem:[#allocation29_spill] sm:$0xff] %v11621_v49 }
 0x3ac   :  { %9523 = vmatmul.mubr.msk.bf16.vlgmr.msra.gmra.mrb[60].mxu0 %vm1353_vm5, %v1535_v56  ;;  %v1473_v10 = vpop.xlane.xlu0 %1472  ;;  %v2057_v56 = vsel %vm1549_vm3, %v11621_v49, 0 }
 0x3ad   :  { %9533 = vmatpush3.bf16.msra.mxu0 %v1873_v34  ;;  %10511 = vrcp.f32 %v1473_v10  ;;  %9534 = vmatprep.mubr.msk.bf16.mxu0 %vm10870_vm1, %v13709_v54  ;;  %v11636_v34 = vpack.c.bf16 %v11101_v38, %v11101_v38 }
 0x3ae   :  { %2635 = vrot.lane.b32.xlu1 %v11055_v62, %s10873_s1  ;;  %9544 = vmatprep.subr.bf16.mxu0 %v13709_v54 }
 0x3af   :  { %v10510_v45 = vpop.eup %10509  ;;  %13715 = vst [vmem:[#allocation30_spill] sm:$0xff] %v11636_v34 }
 0x3b0   :  { %v1479_v51 = vpop.xlane.xlu0 %1478  ;;  %v1520_v37 = vmul.f32 %v10510_v45, %v11419_v0 }
 0x3b1   :  { %10513 = vrcp.f32 %v1479_v51  ;;  %v2149_v51 = vsel %vm1549_vm3, %v11636_v34, 0 }
 0x3b2   :  { %2633 = vrot.lane.b32.xlu1 %v11055_v62, %s10874_s23  ;;  %v1536_v1 = vpack.c.bf16 %v1520_v37, %v1520_v37 }
 0x3b4   :  { %9529 = vmatmul.mubr.msk.bf16.vlgmr.msra.gmra.mrb[56].mxu1 %vm1353_vm5, %v1536_v1  ;;  %v1485_v15 = vpop.xlane.xlu0 %1484 }
 0x3b5   :  { %9539 = vmatpush3.bf16.msra.mxu1 %v1919_v13  ;;  %9540 = vmatprep.mubr.msk.bf16.mxu1 %vm10870_vm1, %v13709_v54  ;;  %10515 = vrcp.f32 %v1485_v15  ;;  %v11658_v15 = vpop.permute.xlu1 %2285 }
 0x3b6   :  { %2735 = vrot.lane.b32.xlu1 %v11071_v8, %s10873_s1  ;;  %9550 = vmatprep.subr.bf16.mxu1 %v13709_v54 }
 0x3b7   :  { %v10512_v2 = vpop.eup %10511 }
 0x3b8   :  { %v1521_v0 = vmul.f32 %v10512_v2, %v11425_v24  ;;  %v1491_v30 = vpop.xlane.xlu0 %1490 }
 0x3b9   :  { %10517 = vrcp.f32 %v1491_v30  ;;  %v11679_v30 = vpack.c.bf16 %v11079_v12, %v11079_v12 }
 0x3ba   :  { %2733 = vrot.lane.b32.xlu1 %v11071_v8, %s10874_s23  ;;  %v1537_v46 = vpack.c.bf16 %v1521_v0, %v1521_v0 }
 0x3bb   :  { %v10514_v11 = vpop.eup %10513  ;;  %13716 = vst [vmem:[#allocation31_spill] sm:$0xff] %v11679_v30 }
 0x3bc   :  { %9535 = vmatmul.mubr.msk.bf16.vlgmr.msra.gmra.mrb[64].mxu0 %vm1353_vm5, %v1537_v46  ;;  %v1523_v24 = vmul.f32 %v10514_v11, %v11430_v59  ;;  %v1497_v59 = vpop.xlane.xlu0 %1496 }
 0x3bd   :  { %9545 = vmatpush3.bf16.msra.mxu0 %v1965_v20  ;;  %9546 = vmatprep.mubr.msk.bf16.mxu0 %vm10870_vm1, %v13709_v54  ;;  %10519 = vrcp.f32 %v1497_v59 }
 0x3be   :  { %2835 = vrot.lane.b32.xlu1 %v11087_v22, %s10873_s1  ;;  %9556 = vmatprep.subr.bf16.mxu0 %v13709_v54  ;;  %v1539_v26 = vpack.c.bf16 %v1523_v24, %v1523_v24 }
 0x3bf   :  { %v10516_v7 = vpop.eup %10515 }
 0x3c0   :  { %v1525_v21 = vmul.f32 %v10516_v7, %v11434_v19  ;;  %v11651_v19 = vpack.c.bf16 %v11117_v55, %v11117_v55  ;;  %v2336_v2 = vpop.permute.xlu0 %2335 }
 0x3c1   :  { %v2341_v46 = vsel %vm586_vm2, %v2336_v2, 0 }
 0x3c2   :  { %2833 = vrot.lane.b32.xlu1 %v11087_v22, %s10874_s23  ;;  %v1541_v10 = vpack.c.bf16 %v1525_v21, %v1525_v21  ;;  %v2241_v13 = vsel %vm1549_vm3, %v11651_v19, 0 }
 0x3c3   :  { %v10518_v45 = vpop.eup %10517 }
 0x3c4   :  { %9547 = vmatmul.mubr.msk.bf16.vlgmr.msra.gmra.mrb[68].mxu0 %vm1353_vm5, %v1539_v26  ;;  %v1527_v38 = vmul.f32 %v10518_v45, %v11440_v44 }
 0x3c5   :  { %9557 = vmatpush3.bf16.msra.mxu0 %v2057_v56  ;;  %9558 = vmatprep.mubr.msk.bf16.mxu0 %vm10870_vm1, %v13709_v54  ;;  %v2011_v56 = vsel %vm1549_vm3, %v11679_v30, 0 }
 0x3c6   :  { %2935 = vrot.lane.b32.xlu1 %v11103_v40, %s10873_s1  ;;  %9568 = vmatprep.subr.bf16.mxu0 %v13709_v54  ;;  %v1543_v37 = vpack.c.bf16 %v1527_v38, %v1527_v38  ;;  %v2386_v38 = vpop.permute.xlu0 %2385 }
 0x3c7   :  { %v10520_v1 = vpop.eup %10519 }
 0x3c8   :  { %v1529_v55 = vmul.f32 %v10520_v1, %v11444_v17 }
 0x3ca   :  { %2933 = vrot.lane.b32.xlu1 %v11103_v40, %s10874_s23  ;;  %v1545_v0 = vpack.c.bf16 %v1529_v55, %v1529_v55 }
 0x3cc   :  { %9559 = vmatmul.mubr.msk.bf16.vlgmr.msra.gmra.mrb[72].mxu0 %vm1353_vm5, %v1541_v10 }
 0x3cd   :  { %9569 = vmatpush3.bf16.msra.mxu0 %v2149_v51  ;;  %9570 = vmatprep.mubr.msk.bf16.mxu0 %vm10870_vm1, %v13709_v54 }
 0x3ce   :  { %3035 = vrot.lane.b32.xlu1 %v11119_v57, %s10873_s1  ;;  %9580 = vmatprep.subr.bf16.mxu0 %v13709_v54 }
 0x3d2   :  { %3033 = vrot.lane.b32.xlu1 %v11119_v57, %s10874_s23 }
 0x3d4   :  { %9571 = vmatmul.mubr.msk.bf16.vlgmr.msra.gmra.mrb[76].mxu0 %vm1353_vm5, %v1543_v37  ;;  %v2384_v37 = vpop.permute.xlu0 %2383 }
 0x3d5   :  { %9581 = vmatpush3.bf16.msra.mxu0 %v2241_v13  ;;  %9582 = vmatprep.mubr.msk.bf16.mxu0 %vm10870_vm1, %v13709_v54 }
 0x3d6   :  { %3275 = vrot.lane.b32.xlu1 %v11226_v6, %s10874_s23  ;;  %9592 = vmatprep.subr.bf16.mxu0 %v13709_v54 }
 0x3d8   :  { %v2486_v1 = vpop.permute.xlu0 %2485 }
 0x3d9   :  { %v1476_v44 = vpop.xlane.xlu1 %1475 }
 0x3da   :  { %10521 = vrcp.f32 %v1476_v44  ;;  %3371 = vrot.lane.b32.xlu1 %v11535_v53, %s10874_s23 }
 0x3dc   :  { %9583 = vmatmul.mubr.msk.bf16.vlgmr.msra.gmra.mrb[80].mxu0 %vm1353_vm5, %v1545_v0 }
 0x3dd   :  { %v1482_v11 = vpop.xlane.xlu1 %1481  ;;  %9594 = vmatprep.mubr.msk.bf16.mxu0 %vm10870_vm1, %v13709_v54 }
 0x3de   :  { %9593 = vmatpush3.bf16.xpose.msra.mxu0 %v2341_v46  ;;  %10523 = vrcp.f32 %v1482_v11  ;;  %3467 = vrot.lane.b32.xlu1 %v11549_v32, %s10874_s23 }
 0x3df   :  { %9604 = vmatprep.subr.bf16.mxu0 %v13709_v54 }
 0x3e1   :  { %v1488_v17 = vpop.xlane.xlu1 %1487 }
 0x3e2   :  { %3563 = vrot.lane.b32.xlu1 %v11570_v42, %s10874_s23  ;;  %10525 = vrcp.f32 %v1488_v17 }
 0x3e4   :  { %v10522_v20 = vpop.eup %10521 }
 0x3e5   :  { %v1522_v24 = vmul.f32 %v10522_v20, %v11453_v35  ;;  %v11695_v35 = vpack.c.bf16 %v11095_v31, %v11095_v31  ;;  %v11708_v31 = vpack.c.bf16 %v11111_v47, %v11111_v47  ;;  %v2284_v13 = vpop.permute.xlu1 %2283 }
 0x3e6   :  { %3659 = vrot.lane.b32.xlu1 %v11594_v39, %s10874_s23 }
 0x3e7   :  { %v1538_v26 = vpack.c.bf16 %v1522_v24, %v1522_v24  ;;  %13717 = vst [vmem:[#allocation32_spill] sm:$0xff] %v11695_v35  ;;  %v2103_v10 = vsel %vm1549_vm3, %v11695_v35, 0  ;;  %v2195_v51 = vsel %vm1549_vm3, %v11708_v31, 0 }
 0x3e8   :  { %v10524_v7 = vpop.eup %10523 }
 0x3e9   :  { %9541 = vmatmul.mubr.msk.bf16.vlgmr.msra.gmra.mrb[60].mxu1 %vm1353_vm5, %v1538_v26  ;;  %v1524_v12 = vmul.f32 %v10524_v7, %v11459_v18  ;;  %v2291_v7 = vsel %vm586_vm2, %v11658_v15, 0  ;;  %v2391_v15 = vsel %vm586_vm2, %v2386_v38, 0 }
 0x3ea   :  { %9551 = vmatpush3.bf16.msra.mxu1 %v2011_v56  ;;  %3755 = vrot.lane.b32.xlu1 %v11679_v30, %s10874_s23 }
 0x3eb   :  { %9552 = vmatprep.mubr.msk.bf16.mxu1 %vm10870_vm1, %v13709_v54  ;;  %9562 = vmatprep.subr.bf16.mxu1 %v13709_v54  ;;  %v1540_v59 = vpack.c.bf16 %v1524_v12, %v1524_v12 }
 0x3ec   :  { %v10526_v21 = vpop.eup %10525 }
 0x3ed   :  { %v1526_v18 = vmul.f32 %v10526_v21, %v11465_v5  ;;  %v2484_v5 = vpop.permute.xlu0 %2483 }
 0x3ee   :  { %3803 = vrot.lane.b32.xlu1 %v11621_v49, %s10874_s23 }
 0x3ef   :  { %v1542_v45 = vpack.c.bf16 %v1526_v18, %v1526_v18 }
 0x3f1   :  { %9553 = vmatmul.mubr.msk.bf16.vlgmr.msra.gmra.mrb[64].mxu1 %vm1353_vm5, %v1540_v59  ;;  %v2586_v47 = vpop.permute.xlu0 %2585 }
 0x3f2   :  { %9563 = vmatpush3.bf16.msra.mxu1 %v2103_v10  ;;  %9564 = vmatprep.mubr.msk.bf16.mxu1 %vm10870_vm1, %v13709_v54 }
 0x3f3   :  { %9574 = vmatprep.subr.bf16.mxu1 %v13709_v54 }
 0x3f5   :  { %v11719_v2 = vpop.permute.xlu0 %2583 }
 0x3f9   :  { %9565 = vmatmul.mubr.msk.bf16.vlgmr.msra.gmra.mrb[68].mxu1 %vm1353_vm5, %v1542_v45  ;;  %v2686_v24 = vpop.permute.xlu0 %2685 }
 0x3fa   :  { %9575 = vmatpush3.bf16.msra.mxu1 %v2195_v51  ;;  %9576 = vmatprep.mubr.msk.bf16.mxu1 %vm10870_vm1, %v13709_v54  ;;  %v2491_v51 = vsel %vm586_vm2, %v2486_v1, 0 }
 0x3fb   :  { %9586 = vmatprep.subr.bf16.mxu1 %v13709_v54 }
 0x416   :  { %v1494_v55 = vpop.xlane.xlu1 %1493 }
 0x417   :  { %10527 = vrcp.f32 %v1494_v55 }
 0x41a   :  { %v2334_v44 = vpop.permute.xlu1 %2333 }
 0x41b   :  { %9595 = vmatmul.mubr.msk.bf16.vlgmr.msra.gmra.mrb[84].mxu0 %vm586_vm2, %v2334_v44 }
 0x41c   :  { %9606 = vmatprep.mubr.msk.bf16.mxu0 %vm10870_vm1, %v13709_v54 }
 0x41e   :  { %v2436_v0 = vpop.permute.xlu1 %2435 }
 0x41f   :  { %v2441_v46 = vsel %vm586_vm2, %v2436_v0, 0 }
 0x420   :  { %9605 = vmatpush3.bf16.xpose.msra.mxu0 %v2441_v46 }
 0x421   :  { %v10528_v11 = vpop.eup %10527  ;;  %9616 = vmatprep.subr.bf16.mxu0 %v13709_v54 }
 0x422   :  { %v2434_v17 = vpop.permute.xlu1 %2433  ;;  %v1528_v20 = vmul.f32 %v10528_v11, %v11502_v25  ;;  %v2684_v25 = vpop.permute.xlu0 %2683 }
 0x424   :  { %v1544_v26 = vpack.c.bf16 %v1528_v20, %v1528_v20 }
 0x426   :  { %9577 = vmatmul.mubr.msk.bf16.vlgmr.msra.gmra.mrb[72].mxu1 %vm1353_vm5, %v1544_v26  ;;  %v2536_v56 = vpop.permute.xlu1 %2535  ;;  %v2786_v18 = vpop.permute.xlu0 %2785 }
 0x427   :  { %9587 = vmatpush3.bf16.xpose.msra.mxu1 %v2291_v7  ;;  %v2541_v12 = vsel %vm586_vm2, %v2536_v56, 0  ;;  %9607 = vmatmul.mubr.msk.bf16.vlgmr.msra.gmra.mrb[88].mxu0 %vm586_vm2, %v2434_v17 }
 0x428   :  { %9617 = vmatpush3.bf16.xpose.msra.mxu0 %v2541_v12  ;;  %9588 = vmatprep.mubr.msk.bf16.mxu1 %vm10870_vm1, %v13709_v54 }
 0x429   :  { %9598 = vmatprep.subr.bf16.mxu1 %v13709_v54  ;;  %9618 = vmatprep.mubr.msk.bf16.mxu0 %vm10870_vm1, %v13709_v54 }
 0x42a   :  { %v2534_v59 = vpop.permute.xlu1 %2533  ;;  %9628 = vmatprep.subr.bf16.mxu0 %v13709_v54  ;;  %v2784_v38 = vpop.permute.xlu0 %2783 }
 0x42e   :  { %9589 = vmatmul.mubr.msk.bf16.vlgmr.msra.gmra.mrb[76].mxu1 %vm586_vm2, %v2284_v13  ;;  %v2636_v21 = vpop.permute.xlu1 %2635  ;;  %v2886_v1 = vpop.permute.xlu0 %2885 }
 0x42f   :  { %9599 = vmatpush3.bf16.xpose.msra.mxu1 %v2391_v15  ;;  %v2641_v10 = vsel %vm586_vm2, %v2636_v21, 0  ;;  %9619 = vmatmul.mubr.msk.bf16.vlgmr.msra.gmra.mrb[92].mxu0 %vm586_vm2, %v2534_v59 }
 0x430   :  { %9629 = vmatpush3.bf16.xpose.msra.mxu0 %v2641_v10  ;;  %9600 = vmatprep.mubr.msk.bf16.mxu1 %vm10870_vm1, %v13709_v54 }
 0x431   :  { %9610 = vmatprep.subr.bf16.mxu1 %v13709_v54  ;;  %9630 = vmatprep.mubr.msk.bf16.mxu0 %vm10870_vm1, %v13709_v54 }
 0x432   :  { %v2634_v45 = vpop.permute.xlu1 %2633  ;;  %9640 = vmatprep.subr.bf16.mxu0 %v13709_v54  ;;  %v2884_v11 = vpop.permute.xlu0 %2883 }
 0x436   :  { %9601 = vmatmul.mubr.msk.bf16.vlgmr.msra.gmra.mrb[80].mxu1 %vm586_vm2, %v2384_v37  ;;  %v2736_v13 = vpop.permute.xlu1 %2735  ;;  %v2591_v37 = vsel %vm586_vm2, %v2586_v47, 0  ;;  %v2986_v26 = vpop.permute.xlu0 %2985 }
 0x437   :  { %9611 = vmatpush3.bf16.xpose.msra.mxu1 %v2491_v51  ;;  %v2741_v55 = vsel %vm586_vm2, %v2736_v13, 0  ;;  %9631 = vmatmul.mubr.msk.bf16.vlgmr.msra.gmra.mrb[96].mxu0 %vm586_vm2, %v2634_v45  ;;  %v2991_v10 = vsel %vm586_vm2, %v2986_v26, 0 }
 0x438   :  { %9641 = vmatpush3.bf16.xpose.msra.mxu0 %v2741_v55  ;;  %9612 = vmatprep.mubr.msk.bf16.mxu1 %vm10870_vm1, %v13709_v54 }
 0x439   :  { %9622 = vmatprep.subr.bf16.mxu1 %v13709_v54  ;;  %9642 = vmatprep.mubr.msk.bf16.mxu0 %vm10870_vm1, %v13709_v54 }
 0x43a   :  { %v2734_v44 = vpop.permute.xlu1 %2733  ;;  %9652 = vmatprep.subr.bf16.mxu0 %v13709_v54  ;;  %v2984_v7 = vpop.permute.xlu0 %2983 }
 0x43e   :  { %9613 = vmatmul.mubr.msk.bf16.vlgmr.msra.gmra.mrb[84].mxu1 %vm586_vm2, %v2484_v5  ;;  %v2836_v0 = vpop.permute.xlu1 %2835  ;;  %v2691_v5 = vsel %vm586_vm2, %v2686_v24, 0  ;;  %v3324_v59 = vpop.permute.xlu0 %3323 }
 0x43f   :  { %9623 = vmatpush3.bf16.xpose.msra.mxu1 %v2591_v37  ;;  %v2841_v46 = vsel %vm586_vm2, %v2836_v0, 0  ;;  %9643 = vmatmul.mubr.msk.bf16.vlgmr.msra.gmra.mrb[100].mxu0 %vm586_vm2, %v2734_v44  ;;  %v3329_v21 = vsel %vm1549_vm3, %v3324_v59, 0 }
 0x440   :  { %9653 = vmatpush3.bf16.xpose.msra.mxu0 %v2841_v46  ;;  %9624 = vmatprep.mubr.msk.bf16.mxu1 %vm10870_vm1, %v13709_v54 }
 0x441   :  { %9634 = vmatprep.subr.bf16.mxu1 %v13709_v54  ;;  %9654 = vmatprep.mubr.msk.bf16.mxu0 %vm10870_vm1, %v13709_v54 }
 0x442   :  { %v2834_v17 = vpop.permute.xlu1 %2833  ;;  %9664 = vmatprep.subr.bf16.mxu0 %v13709_v54 }
 0x446   :  { %9625 = vmatmul.mubr.msk.bf16.vlgmr.msra.gmra.mrb[88].mxu1 %vm586_vm2, %v11719_v2  ;;  %v2936_v47 = vpop.permute.xlu1 %2935  ;;  %v2791_v2 = vsel %vm586_vm2, %v2786_v18, 0 }
 0x447   :  { %9635 = vmatpush3.bf16.xpose.msra.mxu1 %v2691_v5  ;;  %v2941_v20 = vsel %vm586_vm2, %v2936_v47, 0  ;;  %9655 = vmatmul.mubr.msk.bf16.vlgmr.msra.gmra.mrb[104].mxu0 %vm586_vm2, %v2834_v17 }
 0x448   :  { %9665 = vmatpush3.bf16.xpose.msra.mxu0 %v2941_v20  ;;  %9636 = vmatprep.mubr.msk.bf16.mxu1 %vm10870_vm1, %v13709_v54 }
 0x449   :  { %9646 = vmatprep.subr.bf16.mxu1 %v13709_v54  ;;  %9666 = vmatprep.mubr.msk.bf16.mxu0 %vm10870_vm1, %v13709_v54 }
 0x44a   :  { %v2934_v24 = vpop.permute.xlu1 %2933  ;;  %9676 = vmatprep.subr.bf16.mxu0 %v13709_v54 }
 0x44e   :  { %9637 = vmatmul.mubr.msk.bf16.vlgmr.msra.gmra.mrb[92].mxu1 %vm586_vm2, %v2684_v25  ;;  %v3036_v56 = vpop.permute.xlu1 %3035  ;;  %v2891_v25 = vsel %vm586_vm2, %v2886_v1, 0 }
 0x44f   :  { %9647 = vmatpush3.bf16.xpose.msra.mxu1 %v2791_v2  ;;  %v3041_v12 = vsel %vm586_vm2, %v3036_v56, 0  ;;  %9667 = vmatmul.mubr.msk.bf16.vlgmr.msra.gmra.mrb[108].mxu0 %vm586_vm2, %v2934_v24 }
 0x450   :  { %9677 = vmatpush3.bf16.xpose.msra.mxu0 %v3041_v12  ;;  %9648 = vmatprep.mubr.msk.bf16.mxu1 %vm10870_vm1, %v13709_v54 }
 0x451   :  { %9658 = vmatprep.subr.bf16.mxu1 %v13709_v54  ;;  %9678 = vmatprep.mubr.msk.bf16.mxu0 %vm10870_vm1, %v13709_v54 }
 0x452   :  { %9688 = vmatprep.subr.bf16.mxu0 %v13709_v54  ;;  %v3034_v15 = vpop.permute.xlu1 %3033 }
 0x456   :  { %9649 = vmatmul.mubr.msk.bf16.vlgmr.msra.gmra.mrb[96].mxu1 %vm586_vm2, %v2784_v38  ;;  %v3276_v13 = vpop.permute.xlu1 %3275 }
 0x457   :  { %9659 = vmatpush3.bf16.xpose.msra.mxu1 %v2891_v25  ;;  %9679 = vmatmul.mubr.msk.bf16.vlgmr.msra.gmra.mrb[112].mxu0 %vm586_vm2, %v3034_v15  ;;  %v3281_v55 = vsel %vm1549_vm3, %v3276_v13, 0 }
 0x458   :  { %9689 = vmatpush3.bf16.msra.mxu0 %v3329_v21  ;;  %9660 = vmatprep.mubr.msk.bf16.mxu1 %vm10870_vm1, %v13709_v54 }
 0x459   :  { %9670 = vmatprep.subr.bf16.mxu1 %v13709_v54  ;;  %9690 = vmatprep.mubr.msk.bf16.mxu0 %vm10870_vm1, %v13709_v54 }
 0x45a   :  { %9700 = vmatprep.subr.bf16.mxu0 %v13709_v54 }
 0x45e   :  { %9661 = vmatmul.mubr.msk.bf16.vlgmr.msra.gmra.mrb[100].mxu1 %vm586_vm2, %v2884_v11 }
 0x45f   :  { %9671 = vmatpush3.bf16.xpose.msra.mxu1 %v2991_v10  ;;  %v11798_v18 = vpop.f32.mrb[52].mxu0  ;;  %9672 = vmatprep.mubr.msk.bf16.mxu1 %vm10870_vm1, %v13709_v54 }
 0x460   :  { %13718 = vst [vmem:[#allocation33_spill] sm:$0xff] %v11798_v18  ;;  %v9500_v45 = vpop.f32.mrb[53].mxu0  ;;  %9682 = vmatprep.subr.bf16.mxu1 %v13709_v54 }
 0x461   :  { %v1636_v51 = vpop.f32.mrb[54].mxu0 }
 0x462   :  { %v9501_v38 = vpop.f32.mrb[55].mxu0 }
 0x466   :  { %9673 = vmatmul.mubr.msk.bf16.vlgmr.msra.gmra.mrb[104].mxu1 %vm586_vm2, %v2984_v7 }
 0x467   :  { %9683 = vmatpush3.bf16.msra.mxu1 %v3281_v55  ;;  %9684 = vmatprep.mubr.msk.bf16.mxu1 %vm10870_vm1, %v13709_v54 }
 0x468   :  { %9694 = vmatprep.subr.bf16.mxu1 %v13709_v54 }
 0x46b   :  { %v11808_v44 = vpop.f32.mrb[44].mxu1 }
 0x46c   :  { %13719 = vst [vmem:[#allocation34_spill] sm:$0xff] %v11808_v44  ;;  %v9494_v1 = vpop.f32.mrb[45].mxu1 }
 0x46d   :  { %v1590_v37 = vpop.f32.mrb[46].mxu1 }
 0x46e   :  { %v9495_v0 = vpop.f32.mrb[47].mxu1 }
 0x473   :  { %v11810_v46 = vpop.f32.mrb[48].mxu1  ;;  %v11812_v11 = vpop.f32.mrb[56].mxu0 }
 0x474   :  { %13720 = vst [vmem:[#allocation35_spill] sm:$0xff] %v11810_v46  ;;  %13721 = vst [vmem:[#allocation36_spill] sm:$0xff] %v11812_v11  ;;  %v9506_v17 = vpop.f32.mrb[49].mxu1  ;;  %v9512_v5 = vpop.f32.mrb[57].mxu0 }
 0x475   :  { %v1682_v47 = vpop.f32.mrb[50].mxu1  ;;  %v1728_v20 = vpop.f32.mrb[58].mxu0 }
 0x476   :  { %v9507_v26 = vpop.f32.mrb[51].mxu1  ;;  %v9513_v24 = vpop.f32.mrb[59].mxu0 }
 0x47b   :  { %v11814_v2 = vpop.f32.mrb[52].mxu1 }
 0x47c   :  { %13722 = vst [vmem:[#allocation37_spill] sm:$0xff] %v11814_v2  ;;  %v9518_v7 = vpop.f32.mrb[53].mxu1  ;;  %v13739_v2 = vld [vmem:[#allocation16_spill] sm:$0xff] }
 0x47d   :  { %v1774_v56 = vpop.f32.mrb[54].mxu1 }
 0x47e   :  { %v9519_v12 = vpop.f32.mrb[55].mxu1 }
 0x47f   :  { %v11816_v59 = vpop.f32.mrb[60].mxu0 }
 0x480   :  { %13723 = vst [vmem:[#allocation38_spill] sm:$0xff] %v11816_v59  ;;  %v9524_v25 = vpop.f32.mrb[61].mxu0 }
 0x481   :  { %v1820_v15 = vpop.f32.mrb[62].mxu0 }
 0x482   :  { %v9525_v21 = vpop.f32.mrb[63].mxu0 }
 0x487   :  { %v11818_v10 = vpop.f32.mrb[56].mxu1 }
 0x488   :  { %13724 = vst [vmem:[#allocation39_spill] sm:$0xff] %v11818_v10  ;;  %v9530_v45 = vpop.f32.mrb[57].mxu1  ;;  %v13736_v10 = vld [vmem:[#allocation12_spill] sm:$0xff] }
 0x489   :  { %v1866_v51 = vpop.f32.mrb[58].mxu1 }
 0x48a   :  { %v9531_v38 = vpop.f32.mrb[59].mxu1 }
 0x48f   :  { %v11820_v13 = vpop.f32.mrb[64].mxu0 }
 0x490   :  { %13725 = vst [vmem:[#allocation40_spill] sm:$0xff] %v11820_v13  ;;  %v9536_v55 = vpop.f32.mrb[65].mxu0 }
 0x491   :  { %v1912_v1 = vpop.f32.mrb[66].mxu0 }
 0x492   :  { %v9537_v37 = vpop.f32.mrb[67].mxu0 }
 0x497   :  { %v11822_v0 = vpop.f32.mrb[68].mxu0 }
 0x498   :  { %13726 = vst [vmem:[#allocation41_spill] sm:$0xff] %v11822_v0  ;;  %v9548_v17 = vpop.f32.mrb[69].mxu0 }
 0x499   :  { %v2004_v5 = vpop.f32.mrb[70].mxu0 }
 0x49a   :  { %v9549_v47 = vpop.f32.mrb[71].mxu0 }
 0x49f   :  { %v11824_v20 = vpop.f32.mrb[72].mxu0 }
 0x4a0   :  { %13727 = vst [vmem:[#allocation42_spill] sm:$0xff] %v11824_v20  ;;  %v9560_v26 = vpop.f32.mrb[73].mxu0 }
 0x4a1   :  { %v2096_v24 = vpop.f32.mrb[74].mxu0 }
 0x4a2   :  { %v9561_v7 = vpop.f32.mrb[75].mxu0 }
 0x4a7   :  { %v11826_v56 = vpop.f32.mrb[76].mxu0 }
 0x4a8   :  { %13728 = vst [vmem:[#allocation43_spill] sm:$0xff] %v11826_v56  ;;  %v9572_v12 = vpop.f32.mrb[77].mxu0 }
 0x4a9   :  { %v2188_v25 = vpop.f32.mrb[78].mxu0 }
 0x4aa   :  { %v9573_v15 = vpop.f32.mrb[79].mxu0 }
 0x4af   :  { %v11828_v21 = vpop.f32.mrb[80].mxu0 }
 0x4b0   :  { %13729 = vst [vmem:[#allocation44_spill] sm:$0xff] %v11828_v21  ;;  %v9584_v45 = vpop.f32.mrb[81].mxu0 }
 0x4b1   :  { %v2280_v51 = vpop.f32.mrb[82].mxu0 }
 0x4b2   :  { %v9585_v38 = vpop.f32.mrb[83].mxu0 }
 0x4bc   :  { %v11830_v55 = vpop.f32.mrb[60].mxu1 }
 0x4bd   :  { %13730 = vst [vmem:[#allocation45_spill] sm:$0xff] %v11830_v55  ;;  %v9542_v1 = vpop.f32.mrb[61].mxu1 }
 0x4be   :  { %v1958_v37 = vpop.f32.mrb[62].mxu1 }
 0x4bf   :  { %v9543_v17 = vpop.f32.mrb[63].mxu1 }
 0x4c4   :  { %v11832_v5 = vpop.f32.mrb[64].mxu1 }
 0x4c5   :  { %13731 = vst [vmem:[#allocation46_spill] sm:$0xff] %v11832_v5  ;;  %v9554_v47 = vpop.f32.mrb[65].mxu1  ;;  %v13734_v5 = vld [vmem:[#allocation10_spill] sm:$0xff] }
 0x4c6   :  { %v2050_v26 = vpop.f32.mrb[66].mxu1 }
 0x4c7   :  { %v9555_v24 = vpop.f32.mrb[67].mxu1 }
 0x4cc   :  { %v11834_v7 = vpop.f32.mrb[68].mxu1 }
 0x4cd   :  { %13732 = vst [vmem:[#allocation47_spill] sm:$0xff] %v11834_v7  ;;  %v9566_v12 = vpop.f32.mrb[69].mxu1 }
 0x4ce   :  { %v2142_v25 = vpop.f32.mrb[70].mxu1 }
 0x4cf   :  { %v9567_v15 = vpop.f32.mrb[71].mxu1 }
 0x4ee   :  { %v2377_v56 = vpop.f32.mrb[84].mxu0 }
 0x4ef   :  { %v11837_v45 = vadd.f32 %v2377_v56, %v11245_v28  ;;  %v9596_v51 = vpop.f32.mrb[85].mxu0 }
 0x4f0   :  { %v2380_v38 = vpop.f32.mrb[86].mxu0 }
 0x4f1   :  { %v9597_v21 = vpop.f32.mrb[87].mxu0  ;;  %v3086_v1 = vsel %vm1353_vm5, %v11837_v45, -inf }
 0x4f2   :  { %3087 = vmax.xlane.f32.xlu1 %v3086_v1 }
 0x4f9   :  { %v11841_v37 = vpop.f32.mrb[72].mxu1 }
 0x4fa   :  { %13733 = vst [vmem:[#allocation48_spill] sm:$0xff] %v11841_v37  ;;  %v9578_v17 = vpop.f32.mrb[73].mxu1  ;;  %v2477_v47 = vpop.f32.mrb[88].mxu0 }
 0x4fb   :  { %v2234_v26 = vpop.f32.mrb[74].mxu1  ;;  %v9608_v24 = vpop.f32.mrb[89].mxu0 }
 0x4fc   :  { %v9579_v12 = vpop.f32.mrb[75].mxu1  ;;  %v2480_v25 = vpop.f32.mrb[90].mxu0  ;;  %v13735_v24 = vld [vmem:[#allocation11_spill] sm:$0xff] }
 0x4fd   :  { %v9609_v15 = vpop.f32.mrb[91].mxu0 }
 0x501   :  { %v2327_v7 = vpop.f32.mrb[76].mxu1 }
 0x502   :  { %v11844_v56 = vadd.f32 %v2327_v7, %v13734_v5  ;;  %v9590_v51 = vpop.f32.mrb[77].mxu1  ;;  %v2577_v38 = vpop.f32.mrb[92].mxu0 }
 0x503   :  { %v2330_v21 = vpop.f32.mrb[78].mxu1  ;;  %v9620_v20 = vpop.f32.mrb[93].mxu0  ;;  %v11852_v51 = vadd.f32 %v2477_v47, %v13736_v10 }
 0x504   :  { %v9591_v55 = vpop.f32.mrb[79].mxu1  ;;  %v2580_v0 = vpop.f32.mrb[94].mxu0  ;;  %v3083_v1 = vsel %vm1353_vm5, %v11844_v56, -inf }
 0x505   :  { %3084 = vmax.xlane.f32.xlu0 %v3083_v1  ;;  %v9621_v17 = vpop.f32.mrb[95].mxu0  ;;  %v13737_v1 = vld [vmem:[#allocation14_spill] sm:$0xff] }
 0x506   :  { %v11857_v17 = vadd.f32 %v2577_v38, %v13737_v1 }
 0x508   :  { %v3098_v46 = vsel %vm1353_vm5, %v11857_v17, -inf }
 0x509   :  { %v2427_v26 = vpop.f32.mrb[80].mxu1 }
 0x50a   :  { %v11849_v12 = vadd.f32 %v2427_v26, %v13735_v24  ;;  %v9602_v25 = vpop.f32.mrb[81].mxu1  ;;  %v2677_v15 = vpop.f32.mrb[96].mxu0  ;;  %v3092_v26 = vsel %vm1353_vm5, %v11852_v51, -inf }
 0x50b   :  { %v2430_v37 = vpop.f32.mrb[82].mxu1  ;;  %v9632_v7 = vpop.f32.mrb[97].mxu0  ;;  %v11865_v59 = vadd.f32 %v2677_v15, %v13739_v2  ;;  %v13741_v15 = vld [vmem:[#allocation15_spill] sm:$0xff]  ;;  %v13742_v2 = vld [vmem:[#allocation18_spill] sm:$0xff] }
 0x50c   :  { %v9603_v21 = vpop.f32.mrb[83].mxu1  ;;  %v2680_v20 = vpop.f32.mrb[98].mxu0  ;;  %v3089_v0 = vsel %vm1353_vm5, %v11849_v12, -inf  ;;  %v13738_v37 = vld [vmem:[#allocation13_spill] sm:$0xff] }
 0x50d   :  { %3090 = vmax.xlane.f32.xlu0 %v3089_v0  ;;  %v9633_v55 = vpop.f32.mrb[99].mxu0 }
 0x511   :  { %v2527_v25 = vpop.f32.mrb[84].mxu1  ;;  %3093 = vmax.xlane.f32.xlu0 %v3092_v26 }
 0x512   :  { %v11862_v7 = vadd.f32 %v2527_v25, %v13738_v37  ;;  %v9614_v47 = vpop.f32.mrb[85].mxu1  ;;  %v2777_v13 = vpop.f32.mrb[100].mxu0  ;;  %v13740_v25 = vld [vmem:[#allocation17_spill] sm:$0xff] }
 0x513   :  { %v2530_v21 = vpop.f32.mrb[86].mxu1  ;;  %v9644_v20 = vpop.f32.mrb[101].mxu0  ;;  %v11872_v11 = vadd.f32 %v2777_v13, %v13740_v25  ;;  %v3104_v47 = vsel %vm1353_vm5, %v11865_v59, -inf }
 0x514   :  { %v9615_v0 = vpop.f32.mrb[87].mxu1  ;;  %v2780_v55 = vpop.f32.mrb[102].mxu0  ;;  %v3095_v38 = vsel %vm1353_vm5, %v11862_v7, -inf }
 0x515   :  { %3096 = vmax.xlane.f32.xlu1 %v3095_v38  ;;  %3099 = vmax.xlane.f32.xlu0 %v3098_v46  ;;  %v9645_v26 = vpop.f32.mrb[103].mxu0 }
 0x516   :  { %v3110_v26 = vsel %vm1353_vm5, %v11872_v11, -inf }
 0x519   :  { %v2627_v21 = vpop.f32.mrb[88].mxu1  ;;  %3105 = vmax.xlane.f32.xlu0 %v3104_v47 }
 0x51a   :  { %v11877_v20 = vadd.f32 %v2627_v21, %v13741_v15  ;;  %v9626_v0 = vpop.f32.mrb[89].mxu1  ;;  %v2877_v55 = vpop.f32.mrb[104].mxu0 }
 0x51b   :  { %v2630_v44 = vpop.f32.mrb[90].mxu1  ;;  %v9656_v18 = vpop.f32.mrb[105].mxu0  ;;  %v11880_v37 = vadd.f32 %v2877_v55, %v13742_v2 }
 0x51c   :  { %v9627_v46 = vpop.f32.mrb[91].mxu1  ;;  %v2880_v38 = vpop.f32.mrb[106].mxu0  ;;  %v3101_v13 = vsel %vm1353_vm5, %v11877_v20, -inf }
 0x51d   :  { %3102 = vmax.xlane.f32.xlu1 %v3101_v13  ;;  %3111 = vmax.xlane.f32.xlu0 %v3110_v26  ;;  %v9657_v47 = vpop.f32.mrb[107].mxu0  ;;  %v3116_v21 = vsel %vm1353_vm5, %v11880_v37, -inf }
 0x521   :  { %v2727_v0 = vpop.f32.mrb[92].mxu1  ;;  %3117 = vmax.xlane.f32.xlu0 %v3116_v21 }
 0x522   :  { %v11889_v18 = vadd.f32 %v2727_v0, %v11331_v3  ;;  %v9638_v44 = vpop.f32.mrb[93].mxu1  ;;  %v2977_v55 = vpop.f32.mrb[108].mxu0  ;;  %v13743_v0 = vld [vmem:[#allocation22_spill] sm:$0xff] }
 0x523   :  { %v11892_v46 = vadd.f32 %v2977_v55, %v11337_v9  ;;  %v2730_v38 = vpop.f32.mrb[94].mxu1  ;;  %v9668_v2 = vpop.f32.mrb[109].mxu0  ;;  %v13744_v9 = vld [vmem:[#allocation21_spill] sm:$0xff] }
 0x524   :  { %v9639_v15 = vpop.f32.mrb[95].mxu1  ;;  %v2980_v25 = vpop.f32.mrb[110].mxu0  ;;  %v3107_v13 = vsel %vm1353_vm5, %v11889_v18, -inf }
 0x525   :  { %3108 = vmax.xlane.f32.xlu1 %v3107_v13  ;;  %v9669_v26 = vpop.f32.mrb[111].mxu0  ;;  %v3122_v47 = vsel %vm1353_vm5, %v11892_v46, -inf }
 0x526   :  { %3123 = vmax.xlane.f32.xlu0 %v3122_v47 }
 0x529   :  { %v2827_v21 = vpop.f32.mrb[96].mxu1 }
 0x52a   :  { %v11899_v44 = vadd.f32 %v2827_v21, %v13743_v0  ;;  %v9650_v3 = vpop.f32.mrb[97].mxu1  ;;  %v3077_v55 = vpop.f32.mrb[112].mxu0  ;;  %v13745_v0 = vld [vmem:[#allocation23_spill] sm:$0xff] }
 0x52b   :  { %v11902_v38 = vadd.f32 %v3077_v55, %v13744_v9  ;;  %v2830_v2 = vpop.f32.mrb[98].mxu1  ;;  %v9680_v25 = vpop.f32.mrb[113].mxu0 }
 0x52c   :  { %v9651_v15 = vpop.f32.mrb[99].mxu1  ;;  %v3080_v1 = vpop.f32.mrb[114].mxu0  ;;  %v3113_v13 = vsel %vm1353_vm5, %v11899_v44, -inf }
 0x52d   :  { %3114 = vmax.xlane.f32.xlu1 %v3113_v13  ;;  %v9681_v26 = vpop.f32.mrb[115].mxu0  ;;  %v3128_v47 = vsel %vm1353_vm5, %v11902_v38, -inf }
 0x52e   :  { %3129 = vmax.xlane.f32.xlu0 %v3128_v47 }
 0x531   :  { %v2927_v21 = vpop.f32.mrb[100].mxu1 }
 0x532   :  { %v11909_v3 = vadd.f32 %v2927_v21, %v13745_v0  ;;  %v9662_v10 = vpop.f32.mrb[101].mxu1 }
 0x533   :  { %v2930_v55 = vpop.f32.mrb[102].mxu1 }
 0x534   :  { %v9663_v9 = vpop.f32.mrb[103].mxu1  ;;  %v3119_v2 = vsel %vm1353_vm5, %v11909_v3, -inf }
 0x535   :  { %3120 = vmax.xlane.f32.xlu1 %v3119_v2  ;;  %v11922_v9 = vpop.permute.xlu1 %3371 }
 0x539   :  { %v3027_v1 = vpop.f32.mrb[104].mxu1  ;;  %v11924_v10 = vpop.permute.xlu1 %3467 }
 0x53a   :  { %v11914_v25 = vadd.f32 %v3027_v1, %v11379_v60  ;;  %v9674_v15 = vpop.f32.mrb[105].mxu1 }
 0x53b   :  { %v3030_v13 = vpop.f32.mrb[106].mxu1  ;;  %v11934_v15 = vpop.permute.xlu0 %3419 }
 0x53c   :  { %v9675_v26 = vpop.f32.mrb[107].mxu1  ;;  %v3125_v47 = vsel %vm1353_vm5, %v11914_v25, -inf }
 0x53d   :  { %3126 = vmax.xlane.f32.xlu1 %v3125_v47  ;;  %v11926_v21 = vpop.permute.xlu1 %3563 }
 0x53f   :  { %v11937_v47 = vpop.permute.xlu0 %3515 }
 0x541   :  { %v11928_v55 = vpop.permute.xlu1 %3659 }
 0x544   :  { %3851 = vrot.lane.b32.xlu0 %v11695_v35, %s10874_s23  ;;  %v11939_v35 = vpop.permute.xlu0 %3611 }
 0x545   :  { %v11930_v2 = vpop.permute.xlu1 %3755 }
 0x548   :  { %v11943_v0 = vpop.permute.xlu0 %3707 }
 0x549   :  { %v11932_v1 = vpop.permute.xlu1 %3803 }
 0x54a   :  { %13746 = vst [vmem:[#allocation49_spill] sm:$0xff] %v11932_v1 }
 0x54e   :  { %3899 = vrot.lane.b32.xlu1 %v11636_v34, %s10874_s23 }
 0x57f   :  { %v3088_v13 = vpop.xlane.xlu1 %3087 }
 0x580   :  { %v3132_v26 = vsub.f32 %v11837_v45, %v3088_v13 }
 0x582   :  { %v3149_v34 = vmul.f32 1.442695, %v3132_v26 }
 0x584   :  { %10529 = vpow2.f32 %v3149_v34 }
 0x58e   :  { %v11941_v60 = vpop.eup %10529 }
 0x58f   :  { %v3182_v24 = vsel %vm1353_vm5, %v11941_v60, 0.0 }
 0x590   :  { %3183 = vadd.xlane.f32.xlu0 %v3182_v24 }
 0x592   :  { %v3085_v5 = vpop.xlane.xlu0 %3084 }
 0x593   :  { %v3131_v28 = vsub.f32 %v11844_v56, %v3085_v5 }
 0x595   :  { %v3147_v49 = vmul.f32 1.442695, %v3131_v28 }
 0x597   :  { %10531 = vpow2.f32 %v3147_v49 }
 0x59a   :  { %v3091_v45 = vpop.xlane.xlu0 %3090 }
 0x59b   :  { %v3133_v13 = vsub.f32 %v11849_v12, %v3091_v45 }
 0x59d   :  { %v3151_v26 = vmul.f32 1.442695, %v3133_v13 }
 0x59e   :  { %v3094_v34 = vpop.xlane.xlu0 %3093 }
 0x59f   :  { %10533 = vpow2.f32 %v3151_v26  ;;  %v3134_v30 = vsub.f32 %v11852_v51, %v3094_v34 }
 0x5a1   :  { %v11950_v39 = vpop.eup %10531  ;;  %v3153_v42 = vmul.f32 1.442695, %v3134_v30 }
 0x5a2   :  { %v3100_v1 = vpop.xlane.xlu0 %3099  ;;  %v3097_v32 = vpop.xlane.xlu1 %3096  ;;  %v3179_v24 = vsel %vm1353_vm5, %v11950_v39, 0.0 }
 0x5a3   :  { %10535 = vpow2.f32 %v3153_v42  ;;  %v3136_v28 = vsub.f32 %v11857_v17, %v3100_v1  ;;  %v3135_v49 = vsub.f32 %v11862_v7, %v3097_v32  ;;  %3180 = vadd.xlane.f32.xlu1 %v3179_v24 }
 0x5a5   :  { %v3157_v5 = vmul.f32 1.442695, %v3136_v28  ;;  %v3155_v56 = vmul.f32 1.442695, %v3135_v49 }
 0x5a6   :  { %v3106_v12 = vpop.xlane.xlu0 %3105 }
 0x5a7   :  { %10537 = vpow2.f32 %v3157_v5  ;;  %v3138_v51 = vsub.f32 %v11865_v59, %v3106_v12 }
 0x5a8   :  { %10539 = vpow2.f32 %v3155_v56 }
 0x5a9   :  { %v11957_v45 = vpop.eup %10533  ;;  %v3161_v30 = vmul.f32 1.442695, %v3138_v51 }
 0x5aa   :  { %v3112_v13 = vpop.xlane.xlu0 %3111  ;;  %v3103_v26 = vpop.xlane.xlu1 %3102  ;;  %v3185_v42 = vsel %vm1353_vm5, %v11957_v45, 0.0 }
 0x5ab   :  { %10541 = vpow2.f32 %v3161_v30  ;;  %v3140_v17 = vsub.f32 %v11872_v11, %v3112_v13  ;;  %v3137_v32 = vsub.f32 %v11877_v20, %v3103_v26  ;;  %3186 = vadd.xlane.f32.xlu1 %v3185_v42 }
 0x5ad   :  { %v11963_v7 = vpop.eup %10535  ;;  %v3165_v1 = vmul.f32 1.442695, %v3140_v17  ;;  %v3159_v34 = vmul.f32 1.442695, %v3137_v32 }
 0x5ae   :  { %v3118_v59 = vpop.xlane.xlu0 %3117  ;;  %v3188_v24 = vsel %vm1353_vm5, %v11963_v7, 0.0 }
 0x5af   :  { %10543 = vpow2.f32 %v3165_v1  ;;  %v3142_v28 = vsub.f32 %v11880_v37, %v3118_v59  ;;  %3189 = vadd.xlane.f32.xlu0 %v3188_v24 }
 0x5b0   :  { %10545 = vpow2.f32 %v3159_v34 }
 0x5b1   :  { %v11968_v49 = vpop.eup %10537  ;;  %v3169_v5 = vmul.f32 1.442695, %v3142_v28 }
 0x5b2   :  { %v11970_v11 = vpop.eup %10539  ;;  %v3109_v20 = vpop.xlane.xlu1 %3108  ;;  %v3194_v56 = vsel %vm1353_vm5, %v11968_v49, 0.0 }
 0x5b3   :  { %10547 = vpow2.f32 %v3169_v5  ;;  %v3139_v12 = vsub.f32 %v11889_v18, %v3109_v20  ;;  %v3124_v51 = vpop.xlane.xlu0 %3123  ;;  %3195 = vadd.xlane.f32.xlu0 %v3194_v56  ;;  %v3191_v30 = vsel %vm1353_vm5, %v11970_v11, 0.0 }
 0x5b4   :  { %v3144_v37 = vsub.f32 %v11892_v46, %v3124_v51  ;;  %3192 = vadd.xlane.f32.xlu1 %v3191_v30 }
 0x5b5   :  { %v11978_v13 = vpop.eup %10541  ;;  %v3163_v26 = vmul.f32 1.442695, %v3139_v12 }
 0x5b6   :  { %v3173_v42 = vmul.f32 1.442695, %v3144_v37  ;;  %v3200_v17 = vsel %vm1353_vm5, %v11978_v13, 0.0 }
 0x5b7   :  { %10549 = vpow2.f32 %v3163_v26  ;;  %3201 = vadd.xlane.f32.xlu0 %v3200_v17 }
 0x5b8   :  { %10551 = vpow2.f32 %v3173_v42 }
 0x5b9   :  { %v11982_v32 = vpop.eup %10543 }
 0x5ba   :  { %v11984_v18 = vpop.eup %10545  ;;  %v3115_v1 = vpop.xlane.xlu1 %3114  ;;  %v3206_v34 = vsel %vm1353_vm5, %v11982_v32, 0.0 }
 0x5bb   :  { %v3141_v46 = vsub.f32 %v11899_v44, %v3115_v1  ;;  %3207 = vadd.xlane.f32.xlu0 %v3206_v34  ;;  %v3197_v59 = vsel %vm1353_vm5, %v11984_v18, 0.0 }
 0x5bc   :  { %3198 = vadd.xlane.f32.xlu1 %v3197_v59 }
 0x5bd   :  { %v11991_v24 = vpop.eup %10547  ;;  %v3167_v28 = vmul.f32 1.442695, %v3141_v46 }
 0x5be   :  { %v3212_v5 = vsel %vm1353_vm5, %v11991_v24, 0.0 }
 0x5bf   :  { %10553 = vpow2.f32 %v3167_v28  ;;  %3213 = vadd.xlane.f32.xlu0 %v3212_v5 }
 0x5c1   :  { %v11995_v20 = vpop.eup %10549 }
 0x5c2   :  { %v11997_v56 = vpop.eup %10551  ;;  %v3121_v12 = vpop.xlane.xlu1 %3120  ;;  %v3203_v44 = vsel %vm1353_vm5, %v11995_v20, 0.0 }
 0x5c3   :  { %v3143_v51 = vsub.f32 %v11909_v3, %v3121_v12  ;;  %3204 = vadd.xlane.f32.xlu1 %v3203_v44  ;;  %v3218_v30 = vsel %vm1353_vm5, %v11997_v56, 0.0  ;;  %v3130_v3 = vpop.xlane.xlu0 %3129 }
 0x5c4   :  { %3219 = vadd.xlane.f32.xlu0 %v3218_v30  ;;  %v3146_v34 = vsub.f32 %v11902_v38, %v3130_v3 }
 0x5c5   :  { %v3171_v37 = vmul.f32 1.442695, %v3143_v51 }
 0x5c6   :  { %v3177_v46 = vmul.f32 1.442695, %v3146_v34  ;;  %v3425_v34 = vsel %vm1549_vm3, %v11934_v15, 0 }
 0x5c7   :  { %10555 = vpow2.f32 %v3171_v37 }
 0x5c8   :  { %10557 = vpow2.f32 %v3177_v46 }
 0x5c9   :  { %v12004_v26 = vpop.eup %10553 }
 0x5ca   :  { %v3209_v42 = vsel %vm1353_vm5, %v12004_v26, 0.0  ;;  %v3127_v59 = vpop.xlane.xlu1 %3126 }
 0x5cb   :  { %3210 = vadd.xlane.f32.xlu1 %v3209_v42  ;;  %v3145_v28 = vsub.f32 %v11914_v25, %v3127_v59  ;;  %v12032_v25 = vpop.permute.xlu0 %3851 }
 0x5cd   :  { %v3175_v12 = vmul.f32 1.442695, %v3145_v28 }
 0x5ce   :  { %v12055_v3 = vpop.permute.xlu1 %3899 }
 0x5cf   :  { %10559 = vpow2.f32 %v3175_v12 }
 0x5d1   :  { %v12008_v17 = vpop.eup %10555 }
 0x5d2   :  { %v3215_v1 = vsel %vm1353_vm5, %v12008_v17, 0.0  ;;  %v12018_v5 = vpop.eup %10557 }
 0x5d3   :  { %3216 = vadd.xlane.f32.xlu1 %v3215_v1  ;;  %v3224_v44 = vsel %vm1353_vm5, %v12018_v5, 0.0 }
 0x5d9   :  { %v12022_v51 = vpop.eup %10559 }
 0x5da   :  { %3947 = vrot.lane.b32.xlu0 %v11708_v31, %s10874_s23  ;;  %v3221_v38 = vsel %vm1353_vm5, %v12022_v51, 0.0 }
 0x5e4   :  { %3995 = vrot.lane.b32.xlu1 %v11651_v19, %s10874_s23 }
 0x5f9   :  { %3225 = vadd.xlane.f32.xlu0 %v3224_v44  ;;  %v3377_v44 = vsel %vm1549_vm3, %v11922_v9, 0 }
 0x608   :  { %3222 = vadd.xlane.f32.xlu1 %v3221_v38 }
 0x60f   :  { %4045 = vrot.lane.b32.xlu0 %v11025_v43, %s10875_s24 }
 0x613   :  { %4043 = vrot.lane.b32.xlu0 %v11025_v43, %s10876_s25 }
 0x617   :  { %4145 = vrot.lane.b32.xlu0 %v11012_v36, %s10875_s24 }
 0x619   :  { %4095 = vrot.lane.b32.xlu1 %v11002_v29, %s10875_s24 }
 0x61b   :  { %4143 = vrot.lane.b32.xlu0 %v11012_v36, %s10876_s25 }
 0x61d   :  { %v3184_v30 = vpop.xlane.xlu0 %3183  ;;  %4093 = vrot.lane.b32.xlu1 %v11002_v29, %s10876_s25 }
 0x61e   :  { %10561 = vrcp.f32 %v3184_v30 }
 0x61f   :  { %4245 = vrot.lane.b32.xlu0 %v11033_v48, %s10875_s24 }
 0x621   :  { %4195 = vrot.lane.b32.xlu1 %v11019_v41, %s10875_s24 }
 0x623   :  { %4243 = vrot.lane.b32.xlu0 %v11033_v48, %s10876_s25 }
 0x625   :  { %4193 = vrot.lane.b32.xlu1 %v11019_v41, %s10876_s25 }
 0x627   :  { %4345 = vrot.lane.b32.xlu0 %v11049_v58, %s10875_s24 }
 0x628   :  { %v10562_v37 = vpop.eup %10561 }
 0x629   :  { %4295 = vrot.lane.b32.xlu1 %v11039_v52, %s10875_s24  ;;  %v3244_v42 = vmul.f32 %v10562_v37, %v11941_v60 }
 0x62b   :  { %4343 = vrot.lane.b32.xlu0 %v11049_v58, %s10876_s25  ;;  %v3260_v1 = vpack.c.bf16 %v3244_v42, %v3244_v42 }
 0x62d   :  { %9691 = vmatmul.mubr.msk.bf16.vlgmr.msra.gmra.mrb[116].mxu0 %vm1353_vm5, %v3260_v1  ;;  %4293 = vrot.lane.b32.xlu1 %v11039_v52, %s10876_s25 }
 0x62e   :  { %9701 = vmatpush3.bf16.msra.mxu0 %v3425_v34  ;;  %9702 = vmatprep.mubr.msk.bf16.mxu0 %vm10870_vm1, %v13709_v54  ;;  %v3473_v34 = vsel %vm1549_vm3, %v11924_v10, 0 }
 0x62f   :  { %4445 = vrot.lane.b32.xlu0 %v11065_v4, %s10875_s24  ;;  %9712 = vmatprep.subr.bf16.mxu0 %v13709_v54 }
 0x630   :  { %v3181_v60 = vpop.xlane.xlu1 %3180 }
 0x631   :  { %10563 = vrcp.f32 %v3181_v60  ;;  %4395 = vrot.lane.b32.xlu1 %v11055_v62, %s10875_s24 }
 0x633   :  { %4443 = vrot.lane.b32.xlu0 %v11065_v4, %s10876_s25 }
 0x635   :  { %4393 = vrot.lane.b32.xlu1 %v11055_v62, %s10876_s25 }
 0x637   :  { %4545 = vrot.lane.b32.xlu0 %v11081_v14, %s10875_s24 }
 0x638   :  { %v3187_v15 = vpop.xlane.xlu1 %3186 }
 0x639   :  { %10565 = vrcp.f32 %v3187_v15  ;;  %4495 = vrot.lane.b32.xlu1 %v11071_v8, %s10875_s24 }
 0x63b   :  { %v10564_v46 = vpop.eup %10563  ;;  %4543 = vrot.lane.b32.xlu0 %v11081_v14, %s10876_s25 }
 0x63c   :  { %v3190_v59 = vpop.xlane.xlu0 %3189  ;;  %v3243_v28 = vmul.f32 %v10564_v46, %v11950_v39 }
 0x63d   :  { %10567 = vrcp.f32 %v3190_v59  ;;  %4493 = vrot.lane.b32.xlu1 %v11071_v8, %s10876_s25 }
 0x63e   :  { %v3259_v12 = vpack.c.bf16 %v3243_v28, %v3243_v28 }
 0x63f   :  { %4645 = vrot.lane.b32.xlu0 %v11097_v33, %s10875_s24 }
 0x640   :  { %v3196_v38 = vpop.xlane.xlu0 %3195  ;;  %9685 = vmatmul.mubr.msk.bf16.vlgmr.msra.gmra.mrb[108].mxu1 %vm1353_vm5, %v3259_v12 }
 0x641   :  { %10569 = vrcp.f32 %v3196_v38  ;;  %9695 = vmatpush3.bf16.msra.mxu1 %v3377_v44  ;;  %v3193_v30 = vpop.xlane.xlu1 %3192  ;;  %4595 = vrot.lane.b32.xlu1 %v11087_v22, %s10875_s24  ;;  %v3569_v38 = vsel %vm1549_vm3, %v11926_v21, 0  ;;  %v3617_v21 = vsel %vm1549_vm3, %v11939_v35, 0 }
 0x642   :  { %10571 = vrcp.f32 %v3193_v30  ;;  %9696 = vmatprep.mubr.msk.bf16.mxu1 %vm10870_vm1, %v13709_v54  ;;  %9706 = vmatprep.subr.bf16.mxu1 %v13709_v54 }
 0x643   :  { %v10566_v39 = vpop.eup %10565  ;;  %4643 = vrot.lane.b32.xlu0 %v11097_v33, %s10876_s25 }
 0x644   :  { %v3245_v9 = vmul.f32 %v10566_v39, %v11957_v45  ;;  %v3202_v37 = vpop.xlane.xlu0 %3201 }
 0x645   :  { %4593 = vrot.lane.b32.xlu1 %v11087_v22, %s10876_s25  ;;  %10573 = vrcp.f32 %v3202_v37 }
 0x646   :  { %v3261_v42 = vpack.c.bf16 %v3245_v9, %v3245_v9 }
 0x647   :  { %v10568_v1 = vpop.eup %10567  ;;  %4745 = vrot.lane.b32.xlu0 %v11113_v50, %s10875_s24 }
 0x648   :  { %9697 = vmatmul.mubr.msk.bf16.vlgmr.msra.gmra.mrb[112].mxu1 %vm1353_vm5, %v3261_v42  ;;  %v3246_v60 = vmul.f32 %v10568_v1, %v11963_v7  ;;  %v3521_v7 = vsel %vm1549_vm3, %v11937_v47, 0  ;;  %v3208_v59 = vpop.xlane.xlu0 %3207  ;;  %v3665_v1 = vsel %vm1549_vm3, %v11928_v55, 0  ;;  %v3713_v55 = vsel %vm1549_vm3, %v11943_v0, 0 }
 0x649   :  { %9707 = vmatpush3.bf16.msra.mxu1 %v3473_v34  ;;  %v3199_v15 = vpop.xlane.xlu1 %3198  ;;  %4695 = vrot.lane.b32.xlu1 %v11103_v40, %s10875_s24 }
 0x64a   :  { %10575 = vrcp.f32 %v3199_v15  ;;  %v3262_v45 = vpack.c.bf16 %v3246_v60, %v3246_v60  ;;  %9708 = vmatprep.mubr.msk.bf16.mxu1 %vm10870_vm1, %v13709_v54  ;;  %9718 = vmatprep.subr.bf16.mxu1 %v13709_v54 }
 0x64b   :  { %v10570_v46 = vpop.eup %10569  ;;  %4743 = vrot.lane.b32.xlu0 %v11113_v50, %s10876_s25  ;;  %10577 = vrcp.f32 %v3208_v59 }
 0x64c   :  { %v10572_v10 = vpop.eup %10571  ;;  %9703 = vmatmul.mubr.msk.bf16.vlgmr.msra.gmra.mrb[120].mxu0 %vm1353_vm5, %v3262_v45  ;;  %v3248_v12 = vmul.f32 %v10570_v46, %v11968_v49  ;;  %v3214_v39 = vpop.xlane.xlu0 %3213 }
 0x64d   :  { %9713 = vmatpush3.bf16.msra.mxu0 %v3521_v7  ;;  %4693 = vrot.lane.b32.xlu1 %v11103_v40, %s10876_s25  ;;  %v3247_v28 = vmul.f32 %v10572_v10, %v11970_v11  ;;  %v13747_v10 = vld [vmem:[#allocation26_spill] sm:$0xff] }
 0x64e   :  { %9714 = vmatprep.mubr.msk.bf16.mxu0 %vm10870_vm1, %v13709_v54  ;;  %9724 = vmatprep.subr.bf16.mxu0 %v13709_v54  ;;  %v3264_v11 = vpack.c.bf16 %v3248_v12, %v3248_v12 }
 0x64f   :  { %5083 = vrot.lane.b32.xlu0 %v11197_v27, %s10876_s25  ;;  %v3263_v47 = vpack.c.bf16 %v3247_v28, %v3247_v28  ;;  %v10574_v49 = vpop.eup %10573  ;;  %v13748_v28 = vld [vmem:[#allocation49_spill] sm:$0xff] }
 0x650   :  { %v3205_v44 = vpop.xlane.xlu1 %3204  ;;  %v3250_v37 = vmul.f32 %v10574_v49, %v11978_v13  ;;  %v3809_v12 = vsel %vm1549_vm3, %v13748_v28, 0  ;;  %v13750_v49 = vld [vmem:[#allocation28_spill] sm:$0xff] }
 0x651   :  { %9709 = vmatmul.mubr.msk.bf16.vlgmr.msra.gmra.mrb[116].mxu1 %vm1353_vm5, %v3263_v47  ;;  %10579 = vrcp.f32 %v3205_v44  ;;  %4795 = vrot.lane.b32.xlu1 %v11119_v57, %s10875_s24  ;;  %v3220_v15 = vpop.xlane.xlu0 %3219  ;;  %v13749_v47 = vld [vmem:[#allocation27_spill] sm:$0xff] }
 0x652   :  { %9719 = vmatpush3.bf16.msra.mxu1 %v3569_v38  ;;  %9720 = vmatprep.mubr.msk.bf16.mxu1 %vm10870_vm1, %v13709_v54  ;;  %10581 = vrcp.f32 %v3214_v39  ;;  %v3266_v34 = vpack.c.bf16 %v3250_v37, %v3250_v37  ;;  %v13751_v39 = vld [vmem:[#allocation31_spill] sm:$0xff] }
 0x653   :  { %5179 = vrot.lane.b32.xlu0 %v11500_v63, %s10876_s25  ;;  %9730 = vmatprep.subr.bf16.mxu1 %v13709_v54 }
 0x654   :  { %v10576_v30 = vpop.eup %10575  ;;  %9715 = vmatmul.mubr.msk.bf16.vlgmr.msra.gmra.mrb[124].mxu0 %vm1353_vm5, %v3264_v11  ;;  %v3857_v11 = vsel %vm1549_vm3, %v12032_v25, 0 }
 0x655   :  { %9725 = vmatpush3.bf16.msra.mxu0 %v3617_v21  ;;  %4793 = vrot.lane.b32.xlu1 %v11119_v57, %s10876_s25  ;;  %v3249_v9 = vmul.f32 %v10576_v30, %v11984_v18  ;;  %v10578_v18 = vpop.eup %10577 }
 0x656   :  { %9726 = vmatprep.mubr.msk.bf16.mxu0 %vm10870_vm1, %v13709_v54  ;;  %9736 = vmatprep.subr.bf16.mxu0 %v13709_v54  ;;  %v3252_v46 = vmul.f32 %v10578_v18, %v11982_v32 }
 0x657   :  { %5275 = vrot.lane.b32.xlu0 %v11508_v16, %s10876_s25  ;;  %v3265_v35 = vpack.c.bf16 %v3249_v9, %v3249_v9  ;;  %v3948_v9 = vpop.permute.xlu0 %3947 }
 0x658   :  { %v3211_v42 = vpop.xlane.xlu1 %3210  ;;  %v3268_v59 = vpack.c.bf16 %v3252_v46, %v3252_v46 }
 0x659   :  { %9721 = vmatmul.mubr.msk.bf16.vlgmr.msra.gmra.mrb[120].mxu1 %vm1353_vm5, %v3265_v35  ;;  %10583 = vrcp.f32 %v3211_v42  ;;  %5035 = vrot.lane.b32.xlu1 %v11226_v6, %s10876_s25  ;;  %v3953_v42 = vsel %vm1549_vm3, %v3948_v9, 0 }
 0x65a   :  { %9731 = vmatpush3.bf16.msra.mxu1 %v3665_v1  ;;  %9732 = vmatprep.mubr.msk.bf16.mxu1 %vm10870_vm1, %v13709_v54  ;;  %10585 = vrcp.f32 %v3220_v15 }
 0x65b   :  { %v10580_v13 = vpop.eup %10579  ;;  %5371 = vrot.lane.b32.xlu0 %v11517_v23, %s10876_s25  ;;  %9742 = vmatprep.subr.bf16.mxu1 %v13709_v54 }
 0x65c   :  { %9727 = vmatmul.mubr.msk.bf16.vlgmr.msra.gmra.mrb[128].mxu0 %vm1353_vm5, %v3266_v34  ;;  %v3251_v60 = vmul.f32 %v10580_v13, %v11995_v20  ;;  %v3761_v20 = vsel %vm1549_vm3, %v11930_v2, 0  ;;  %v10582_v7 = vpop.eup %10581 }
 0x65d   :  { %9737 = vmatpush3.bf16.msra.mxu0 %v3713_v55  ;;  %5131 = vrot.lane.b32.xlu1 %v11535_v53, %s10876_s25  ;;  %v3254_v38 = vmul.f32 %v10582_v7, %v11991_v24  ;;  %v3905_v24 = vsel %vm1549_vm3, %v12055_v3, 0 }
 0x65e   :  { %v3267_v45 = vpack.c.bf16 %v3251_v60, %v3251_v60  ;;  %9738 = vmatprep.mubr.msk.bf16.mxu0 %vm10870_vm1, %v13709_v54  ;;  %9748 = vmatprep.subr.bf16.mxu0 %v13709_v54 }
 0x65f   :  { %5467 = vrot.lane.b32.xlu0 %v11529_v61, %s10876_s25  ;;  %v3270_v30 = vpack.c.bf16 %v3254_v38, %v3254_v38  ;;  %v13781_v61 = vld [vmem:[#allocation22_spill] sm:$0xff] }
 0x660   :  { %v3217_v0 = vpop.xlane.xlu1 %3216 }
 0x661   :  { %9733 = vmatmul.mubr.msk.bf16.vlgmr.msra.gmra.mrb[124].mxu1 %vm1353_vm5, %v3267_v45  ;;  %10587 = vrcp.f32 %v3217_v0  ;;  %5227 = vrot.lane.b32.xlu1 %v13747_v10, %s10876_s25 }
 0x662   :  { %9743 = vmatpush3.bf16.msra.mxu1 %v3761_v20  ;;  %9744 = vmatprep.mubr.msk.bf16.mxu1 %vm10870_vm1, %v13709_v54 }
 0x663   :  { %v10584_v32 = vpop.eup %10583  ;;  %9754 = vmatprep.subr.bf16.mxu1 %v13709_v54 }
 0x664   :  { %9739 = vmatmul.mubr.msk.bf16.vlgmr.msra.gmra.mrb[132].mxu0 %vm1353_vm5, %v3268_v59  ;;  %v3253_v2 = vmul.f32 %v10584_v32, %v12004_v26  ;;  %v10586_v26 = vpop.eup %10585  ;;  %v3996_v3 = vpop.permute.xlu1 %3995 }
 0x665   :  { %9749 = vmatpush3.bf16.msra.mxu0 %v3809_v12  ;;  %5323 = vrot.lane.b32.xlu1 %v13749_v47, %s10876_s25  ;;  %v3256_v35 = vmul.f32 %v10586_v26, %v11997_v56  ;;  %v4001_v18 = vsel %vm1549_vm3, %v3996_v3, 0 }
 0x666   :  { %v3269_v44 = vpack.c.bf16 %v3253_v2, %v3253_v2  ;;  %9750 = vmatprep.mubr.msk.bf16.mxu0 %vm10870_vm1, %v13709_v54  ;;  %9760 = vmatprep.subr.bf16.mxu0 %v13709_v54 }
 0x667   :  { %v3272_v1 = vpack.c.bf16 %v3256_v35, %v3256_v35 }
 0x669   :  { %9745 = vmatmul.mubr.msk.bf16.vlgmr.msra.gmra.mrb[128].mxu1 %vm1353_vm5, %v3269_v44  ;;  %5419 = vrot.lane.b32.xlu1 %v13750_v49, %s10876_s25 }
 0x66a   :  { %9755 = vmatpush3.bf16.msra.mxu1 %v3857_v11  ;;  %9756 = vmatprep.mubr.msk.bf16.mxu1 %vm10870_vm1, %v13709_v54 }
 0x66b   :  { %v10588_v21 = vpop.eup %10587  ;;  %9766 = vmatprep.subr.bf16.mxu1 %v13709_v54 }
 0x66c   :  { %9751 = vmatmul.mubr.msk.bf16.vlgmr.msra.gmra.mrb[136].mxu0 %vm1353_vm5, %v3270_v30  ;;  %v3255_v25 = vmul.f32 %v10588_v21, %v12008_v17  ;;  %v13752_v17 = vld [vmem:[#allocation29_spill] sm:$0xff] }
 0x66d   :  { %9761 = vmatpush3.bf16.msra.mxu0 %v3905_v24  ;;  %5515 = vrot.lane.b32.xlu1 %v13751_v39, %s10876_s25 }
 0x66e   :  { %v3271_v37 = vpack.c.bf16 %v3255_v25, %v3255_v25  ;;  %9762 = vmatprep.mubr.msk.bf16.mxu0 %vm10870_vm1, %v13709_v54  ;;  %9772 = vmatprep.subr.bf16.mxu0 %v13709_v54 }
 0x671   :  { %9757 = vmatmul.mubr.msk.bf16.vlgmr.msra.gmra.mrb[132].mxu1 %vm1353_vm5, %v3271_v37  ;;  %5563 = vrot.lane.b32.xlu1 %v13752_v17, %s10876_s25 }
 0x672   :  { %9767 = vmatpush3.bf16.msra.mxu1 %v3953_v42  ;;  %9768 = vmatprep.mubr.msk.bf16.mxu1 %vm10870_vm1, %v13709_v54 }
 0x673   :  { %9778 = vmatprep.subr.bf16.mxu1 %v13709_v54 }
 0x674   :  { %9763 = vmatmul.mubr.msk.bf16.vlgmr.msra.gmra.mrb[140].mxu0 %vm1353_vm5, %v3272_v1 }
 0x675   :  { %9773 = vmatpush3.bf16.msra.mxu0 %v4001_v18  ;;  %9774 = vmatprep.mubr.msk.bf16.mxu0 %vm10870_vm1, %v13709_v54 }
 0x676   :  { %9784 = vmatprep.subr.bf16.mxu0 %v13709_v54 }
 0x686   :  { %v3226_v56 = vpop.xlane.xlu0 %3225 }
 0x687   :  { %10589 = vrcp.f32 %v3226_v56 }
 0x68a   :  { %v4046_v34 = vpop.permute.xlu0 %4045 }
 0x68b   :  { %v4051_v26 = vsel %vm586_vm2, %v4046_v34, 0 }
 0x68e   :  { %v4044_v13 = vpop.permute.xlu0 %4043 }
 0x691   :  { %v10590_v55 = vpop.eup %10589 }
 0x692   :  { %v4146_v60 = vpop.permute.xlu0 %4145  ;;  %v3258_v15 = vmul.f32 %v10590_v55, %v12018_v5 }
 0x693   :  { %v4151_v9 = vsel %vm586_vm2, %v4146_v60, 0 }
 0x694   :  { %v3274_v45 = vpack.c.bf16 %v3258_v15, %v3258_v15 }
 0x695   :  { %v3223_v46 = vpop.xlane.xlu1 %3222 }
 0x696   :  { %10591 = vrcp.f32 %v3223_v46  ;;  %v4144_v0 = vpop.permute.xlu0 %4143  ;;  %9775 = vmatmul.mubr.msk.bf16.vlgmr.msra.gmra.mrb[144].mxu0 %vm1353_vm5, %v3274_v45 }
 0x697   :  { %9786 = vmatprep.mubr.msk.bf16.mxu0 %vm10870_vm1, %v13709_v54 }
 0x699   :  { %v4096_v20 = vpop.permute.xlu1 %4095 }
 0x69a   :  { %v4101_v7 = vsel %vm586_vm2, %v4096_v20, 0  ;;  %v4246_v59 = vpop.permute.xlu0 %4245 }
 0x69b   :  { %9785 = vmatpush3.bf16.xpose.msra.mxu0 %v4101_v7  ;;  %v4251_v18 = vsel %vm586_vm2, %v4246_v59, 0 }
 0x69c   :  { %9796 = vmatprep.subr.bf16.mxu0 %v13709_v54 }
 0x69d   :  { %v4094_v32 = vpop.permute.xlu1 %4093 }
 0x69e   :  { %v4244_v28 = vpop.permute.xlu0 %4243 }
 0x6a0   :  { %v10592_v12 = vpop.eup %10591 }
 0x6a1   :  { %v4196_v5 = vpop.permute.xlu1 %4195  ;;  %v3257_v2 = vmul.f32 %v10592_v12, %v12022_v51 }
 0x6a2   :  { %v4201_v44 = vsel %vm586_vm2, %v4196_v5, 0  ;;  %v4346_v38 = vpop.permute.xlu0 %4345  ;;  %9787 = vmatmul.mubr.msk.bf16.vlgmr.msra.gmra.mrb[148].mxu0 %vm586_vm2, %v4094_v32 }
 0x6a3   :  { %9797 = vmatpush3.bf16.xpose.msra.mxu0 %v4201_v44  ;;  %v3273_v11 = vpack.c.bf16 %v3257_v2, %v3257_v2  ;;  %9798 = vmatprep.mubr.msk.bf16.mxu0 %vm10870_vm1, %v13709_v54  ;;  %v4351_v60 = vsel %vm586_vm2, %v4346_v38, 0 }
 0x6a4   :  { %9808 = vmatprep.subr.bf16.mxu0 %v13709_v54 }
 0x6a5   :  { %9769 = vmatmul.mubr.msk.bf16.vlgmr.msra.gmra.mrb[136].mxu1 %vm1353_vm5, %v3273_v11  ;;  %v4194_v30 = vpop.permute.xlu1 %4193 }
 0x6a6   :  { %9779 = vmatpush3.bf16.xpose.msra.mxu1 %v4051_v26  ;;  %v4344_v21 = vpop.permute.xlu0 %4343  ;;  %9780 = vmatprep.mubr.msk.bf16.mxu1 %vm10870_vm1, %v13709_v54 }
 0x6a7   :  { %9790 = vmatprep.subr.bf16.mxu1 %v13709_v54 }
 0x6a9   :  { %v4296_v51 = vpop.permute.xlu1 %4295 }
 0x6aa   :  { %v4301_v24 = vsel %vm586_vm2, %v4296_v51, 0  ;;  %v4446_v25 = vpop.permute.xlu0 %4445  ;;  %9799 = vmatmul.mubr.msk.bf16.vlgmr.msra.gmra.mrb[152].mxu0 %vm586_vm2, %v4194_v30 }
 0x6ab   :  { %9809 = vmatpush3.bf16.xpose.msra.mxu0 %v4301_v24  ;;  %9810 = vmatprep.mubr.msk.bf16.mxu0 %vm10870_vm1, %v13709_v54  ;;  %v4451_v20 = vsel %vm586_vm2, %v4446_v25, 0 }
 0x6ac   :  { %9820 = vmatprep.subr.bf16.mxu0 %v13709_v54 }
 0x6ad   :  { %9781 = vmatmul.mubr.msk.bf16.vlgmr.msra.gmra.mrb[140].mxu1 %vm586_vm2, %v4044_v13  ;;  %v4294_v37 = vpop.permute.xlu1 %4293 }
 0x6ae   :  { %9791 = vmatpush3.bf16.xpose.msra.mxu1 %v4151_v9  ;;  %v4444_v35 = vpop.permute.xlu0 %4443  ;;  %9792 = vmatprep.mubr.msk.bf16.mxu1 %vm10870_vm1, %v13709_v54 }
 0x6af   :  { %9802 = vmatprep.subr.bf16.mxu1 %v13709_v54 }
 0x6b1   :  { %v4396_v42 = vpop.permute.xlu1 %4395 }
 0x6b2   :  { %v4401_v3 = vsel %vm586_vm2, %v4396_v42, 0  ;;  %9811 = vmatmul.mubr.msk.bf16.vlgmr.msra.gmra.mrb[156].mxu0 %vm586_vm2, %v4294_v37  ;;  %v4546_v1 = vpop.permute.xlu0 %4545 }
 0x6b3   :  { %9821 = vmatpush3.bf16.xpose.msra.mxu0 %v4401_v3  ;;  %9822 = vmatprep.mubr.msk.bf16.mxu0 %vm10870_vm1, %v13709_v54  ;;  %v4551_v5 = vsel %vm586_vm2, %v4546_v1, 0 }
 0x6b4   :  { %9832 = vmatprep.subr.bf16.mxu0 %v13709_v54 }
 0x6b5   :  { %9793 = vmatmul.mubr.msk.bf16.vlgmr.msra.gmra.mrb[144].mxu1 %vm586_vm2, %v4144_v0  ;;  %v4394_v56 = vpop.permute.xlu1 %4393 }
 0x6b6   :  { %9803 = vmatpush3.bf16.xpose.msra.mxu1 %v4251_v18  ;;  %9804 = vmatprep.mubr.msk.bf16.mxu1 %vm10870_vm1, %v13709_v54  ;;  %v4544_v34 = vpop.permute.xlu0 %4543 }
 0x6b7   :  { %9814 = vmatprep.subr.bf16.mxu1 %v13709_v54 }
 0x6b9   :  { %v4496_v13 = vpop.permute.xlu1 %4495 }
 0x6ba   :  { %v4501_v55 = vsel %vm586_vm2, %v4496_v13, 0  ;;  %9823 = vmatmul.mubr.msk.bf16.vlgmr.msra.gmra.mrb[160].mxu0 %vm586_vm2, %v4394_v56  ;;  %v4646_v45 = vpop.permute.xlu0 %4645 }
 0x6bb   :  { %9833 = vmatpush3.bf16.xpose.msra.mxu0 %v4501_v55  ;;  %9834 = vmatprep.mubr.msk.bf16.mxu0 %vm10870_vm1, %v13709_v54  ;;  %v4651_v26 = vsel %vm586_vm2, %v4646_v45, 0 }
 0x6bc   :  { %9844 = vmatprep.subr.bf16.mxu0 %v13709_v54 }
 0x6bd   :  { %9805 = vmatmul.mubr.msk.bf16.vlgmr.msra.gmra.mrb[148].mxu1 %vm586_vm2, %v4244_v28  ;;  %v4494_v15 = vpop.permute.xlu1 %4493 }
 0x6be   :  { %9815 = vmatpush3.bf16.xpose.msra.mxu1 %v4351_v60  ;;  %9816 = vmatprep.mubr.msk.bf16.mxu1 %vm10870_vm1, %v13709_v54  ;;  %v4644_v7 = vpop.permute.xlu0 %4643 }
 0x6bf   :  { %9826 = vmatprep.subr.bf16.mxu1 %v13709_v54 }
 0x6c1   :  { %v4596_v46 = vpop.permute.xlu1 %4595 }
 0x6c2   :  { %v4601_v0 = vsel %vm586_vm2, %v4596_v46, 0  ;;  %9835 = vmatmul.mubr.msk.bf16.vlgmr.msra.gmra.mrb[164].mxu0 %vm586_vm2, %v4494_v15  ;;  %v4746_v12 = vpop.permute.xlu0 %4745 }
 0x6c3   :  { %9845 = vmatpush3.bf16.xpose.msra.mxu0 %v4601_v0  ;;  %9846 = vmatprep.mubr.msk.bf16.mxu0 %vm10870_vm1, %v13709_v54  ;;  %v4751_v24 = vsel %vm586_vm2, %v4746_v12, 0 }
 0x6c4   :  { %9856 = vmatprep.subr.bf16.mxu0 %v13709_v54 }
 0x6c5   :  { %9817 = vmatmul.mubr.msk.bf16.vlgmr.msra.gmra.mrb[152].mxu1 %vm586_vm2, %v4344_v21  ;;  %v4594_v59 = vpop.permute.xlu1 %4593 }
 0x6c6   :  { %9827 = vmatpush3.bf16.xpose.msra.mxu1 %v4451_v20  ;;  %9828 = vmatprep.mubr.msk.bf16.mxu1 %vm10870_vm1, %v13709_v54  ;;  %v4744_v44 = vpop.permute.xlu0 %4743 }
 0x6c7   :  { %9838 = vmatprep.subr.bf16.mxu1 %v13709_v54 }
 0x6c9   :  { %v4696_v32 = vpop.permute.xlu1 %4695 }
 0x6ca   :  { %v4701_v28 = vsel %vm586_vm2, %v4696_v32, 0  ;;  %9847 = vmatmul.mubr.msk.bf16.vlgmr.msra.gmra.mrb[168].mxu0 %vm586_vm2, %v4594_v59  ;;  %v5084_v30 = vpop.permute.xlu0 %5083 }
 0x6cb   :  { %9857 = vmatpush3.bf16.xpose.msra.mxu0 %v4701_v28  ;;  %9858 = vmatprep.mubr.msk.bf16.mxu0 %vm10870_vm1, %v13709_v54  ;;  %v5089_v51 = vsel %vm1549_vm3, %v5084_v30, 0 }
 0x6cc   :  { %9868 = vmatprep.subr.bf16.mxu0 %v13709_v54 }
 0x6cd   :  { %9829 = vmatmul.mubr.msk.bf16.vlgmr.msra.gmra.mrb[156].mxu1 %vm586_vm2, %v4444_v35  ;;  %v4694_v2 = vpop.permute.xlu1 %4693 }
 0x6ce   :  { %9839 = vmatpush3.bf16.xpose.msra.mxu1 %v4551_v5  ;;  %9840 = vmatprep.mubr.msk.bf16.mxu1 %vm10870_vm1, %v13709_v54 }
 0x6cf   :  { %9850 = vmatprep.subr.bf16.mxu1 %v13709_v54 }
 0x6d1   :  { %v4796_v38 = vpop.permute.xlu1 %4795 }
 0x6d2   :  { %v4801_v11 = vsel %vm586_vm2, %v4796_v38, 0  ;;  %9859 = vmatmul.mubr.msk.bf16.vlgmr.msra.gmra.mrb[172].mxu0 %vm586_vm2, %v4694_v2 }
 0x6d3   :  { %9869 = vmatpush3.bf16.xpose.msra.mxu0 %v4801_v11  ;;  %9870 = vmatprep.mubr.msk.bf16.mxu0 %vm10870_vm1, %v13709_v54 }
 0x6d4   :  { %9880 = vmatprep.subr.bf16.mxu0 %v13709_v54 }
 0x6d5   :  { %9841 = vmatmul.mubr.msk.bf16.vlgmr.msra.gmra.mrb[160].mxu1 %vm586_vm2, %v4544_v34  ;;  %v4794_v21 = vpop.permute.xlu1 %4793 }
 0x6d6   :  { %9851 = vmatpush3.bf16.xpose.msra.mxu1 %v4651_v26  ;;  %9852 = vmatprep.mubr.msk.bf16.mxu1 %vm10870_vm1, %v13709_v54 }
 0x6d7   :  { %9862 = vmatprep.subr.bf16.mxu1 %v13709_v54 }
 0x6d9   :  { %v5036_v25 = vpop.permute.xlu1 %5035 }
 0x6da   :  { %9871 = vmatmul.mubr.msk.bf16.vlgmr.msra.gmra.mrb[176].mxu0 %vm586_vm2, %v4794_v21  ;;  %v5041_v9 = vsel %vm1549_vm3, %v5036_v25, 0 }
 0x6db   :  { %9881 = vmatpush3.bf16.msra.mxu0 %v5089_v51  ;;  %9882 = vmatprep.mubr.msk.bf16.mxu0 %vm10870_vm1, %v13709_v54 }
 0x6dc   :  { %9892 = vmatprep.subr.bf16.mxu0 %v13709_v54 }
 0x6dd   :  { %9853 = vmatmul.mubr.msk.bf16.vlgmr.msra.gmra.mrb[164].mxu1 %vm586_vm2, %v4644_v7 }
 0x6de   :  { %9863 = vmatpush3.bf16.xpose.msra.mxu1 %v4751_v24  ;;  %9864 = vmatprep.mubr.msk.bf16.mxu1 %vm10870_vm1, %v13709_v54 }
 0x6df   :  { %9874 = vmatprep.subr.bf16.mxu1 %v13709_v54 }
 0x6e5   :  { %9865 = vmatmul.mubr.msk.bf16.vlgmr.msra.gmra.mrb[168].mxu1 %vm586_vm2, %v4744_v44 }
 0x6e6   :  { %9875 = vmatpush3.bf16.msra.mxu1 %v5041_v9  ;;  %9876 = vmatprep.mubr.msk.bf16.mxu1 %vm10870_vm1, %v13709_v54 }
 0x6e7   :  { %9886 = vmatprep.subr.bf16.mxu1 %v13709_v54 }
 0x700   :  { %v12306_v37 = vpop.f32.mrb[116].mxu0 }
 0x701   :  { %13753 = vst [vmem:[#allocation26_spill] sm:$0xff] %v12306_v37  ;;  %v9692_v35 = vpop.f32.mrb[117].mxu0 }
 0x702   :  { %v3368_v42 = vpop.f32.mrb[118].mxu0 }
 0x703   :  { %v9693_v3 = vpop.f32.mrb[119].mxu0 }
 0x713   :  { %v12308_v1 = vpop.f32.mrb[108].mxu1 }
 0x714   :  { %13754 = vst [vmem:[#allocation49_spill] sm:$0xff] %v12308_v1  ;;  %v9686_v56 = vpop.f32.mrb[109].mxu1 }
 0x715   :  { %v3320_v34 = vpop.f32.mrb[110].mxu1 }
 0x716   :  { %v9687_v13 = vpop.f32.mrb[111].mxu1 }
 0x71b   :  { %v12312_v55 = vpop.f32.mrb[112].mxu1 }
 0x71c   :  { %13755 = vst [vmem:[#allocation50_spill] sm:$0xff] %v12312_v55  ;;  %v9698_v60 = vpop.f32.mrb[113].mxu1 }
 0x71d   :  { %v3416_v15 = vpop.f32.mrb[114].mxu1 }
 0x71e   :  { %v9699_v45 = vpop.f32.mrb[115].mxu1 }
 0x71f   :  { %v12314_v46 = vpop.f32.mrb[120].mxu0 }
 0x720   :  { %13756 = vst [vmem:[#allocation51_spill] sm:$0xff] %v12314_v46  ;;  %v9704_v20 = vpop.f32.mrb[121].mxu0 }
 0x721   :  { %v3464_v7 = vpop.f32.mrb[122].mxu0 }
 0x722   :  { %v9705_v59 = vpop.f32.mrb[123].mxu0 }
 0x724   :  { %v12318_v32 = vpop.f32.mrb[116].mxu1 }
 0x725   :  { %13757 = vst [vmem:[#allocation52_spill] sm:$0xff] %v12318_v32  ;;  %v9710_v28 = vpop.f32.mrb[117].mxu1 }
 0x726   :  { %v3512_v12 = vpop.f32.mrb[118].mxu1 }
 0x727   :  { %v9711_v5 = vpop.f32.mrb[119].mxu1  ;;  %v12320_v2 = vpop.f32.mrb[124].mxu0 }
 0x728   :  { %13758 = vst [vmem:[#allocation53_spill] sm:$0xff] %v12320_v2  ;;  %v9716_v38 = vpop.f32.mrb[125].mxu0 }
 0x729   :  { %v3560_v11 = vpop.f32.mrb[126].mxu0 }
 0x72a   :  { %v9717_v26 = vpop.f32.mrb[127].mxu0 }
 0x72c   :  { %v12324_v30 = vpop.f32.mrb[120].mxu1 }
 0x72d   :  { %13759 = vst [vmem:[#allocation54_spill] sm:$0xff] %v12324_v30  ;;  %v9722_v21 = vpop.f32.mrb[121].mxu1 }
 0x72e   :  { %v3608_v51 = vpop.f32.mrb[122].mxu1 }
 0x72f   :  { %v9723_v24 = vpop.f32.mrb[123].mxu1  ;;  %v12326_v25 = vpop.f32.mrb[128].mxu0 }
 0x730   :  { %13760 = vst [vmem:[#allocation55_spill] sm:$0xff] %v12326_v25  ;;  %v9728_v35 = vpop.f32.mrb[129].mxu0 }
 0x731   :  { %v3656_v42 = vpop.f32.mrb[130].mxu0 }
 0x732   :  { %v9729_v3 = vpop.f32.mrb[131].mxu0 }
 0x734   :  { %v12330_v56 = vpop.f32.mrb[124].mxu1 }
 0x735   :  { %13761 = vst [vmem:[#allocation56_spill] sm:$0xff] %v12330_v56  ;;  %v9734_v34 = vpop.f32.mrb[125].mxu1 }
 0x736   :  { %v3704_v13 = vpop.f32.mrb[126].mxu1 }
 0x737   :  { %v9735_v60 = vpop.f32.mrb[127].mxu1  ;;  %v12332_v15 = vpop.f32.mrb[132].mxu0 }
 0x738   :  { %13762 = vst [vmem:[#allocation57_spill] sm:$0xff] %v12332_v15  ;;  %v9740_v20 = vpop.f32.mrb[133].mxu0 }
 0x739   :  { %v3752_v7 = vpop.f32.mrb[134].mxu0 }
 0x73a   :  { %v9741_v59 = vpop.f32.mrb[135].mxu0 }
 0x73c   :  { %v12336_v28 = vpop.f32.mrb[128].mxu1 }
 0x73d   :  { %13763 = vst [vmem:[#allocation58_spill] sm:$0xff] %v12336_v28  ;;  %v9746_v12 = vpop.f32.mrb[129].mxu1 }
 0x73e   :  { %v3800_v5 = vpop.f32.mrb[130].mxu1 }
 0x73f   :  { %v9747_v38 = vpop.f32.mrb[131].mxu1  ;;  %v12338_v11 = vpop.f32.mrb[136].mxu0 }
 0x740   :  { %13764 = vst [vmem:[#allocation59_spill] sm:$0xff] %v12338_v11  ;;  %v9752_v21 = vpop.f32.mrb[137].mxu0  ;;  %v13775_v11 = vld [vmem:[#allocation16_spill] sm:$0xff] }
 0x741   :  { %v3848_v51 = vpop.f32.mrb[138].mxu0 }
 0x742   :  { %v9753_v24 = vpop.f32.mrb[139].mxu0 }
 0x743   :  { %v13768_v24 = vld [vmem:[#allocation9_spill] sm:$0xff] }
 0x744   :  { %v12342_v35 = vpop.f32.mrb[132].mxu1 }
 0x745   :  { %13765 = vst [vmem:[#allocation60_spill] sm:$0xff] %v12342_v35  ;;  %v9758_v42 = vpop.f32.mrb[133].mxu1 }
 0x746   :  { %v3896_v3 = vpop.f32.mrb[134].mxu1 }
 0x747   :  { %v9759_v34 = vpop.f32.mrb[135].mxu1  ;;  %v12344_v13 = vpop.f32.mrb[140].mxu0 }
 0x748   :  { %13766 = vst [vmem:[#allocation61_spill] sm:$0xff] %v12344_v13  ;;  %v9764_v20 = vpop.f32.mrb[141].mxu0  ;;  %v13773_v13 = vld [vmem:[#allocation14_spill] sm:$0xff] }
 0x749   :  { %v3944_v7 = vpop.f32.mrb[142].mxu0 }
 0x74a   :  { %v9765_v59 = vpop.f32.mrb[143].mxu0 }
 0x769   :  { %v12348_v12 = vpop.f32.mrb[144].mxu0 }
 0x76a   :  { %13767 = vst [vmem:[#allocation62_spill] sm:$0xff] %v12348_v12  ;;  %v9776_v5 = vpop.f32.mrb[145].mxu0  ;;  %v13772_v12 = vld [vmem:[#allocation12_spill] sm:$0xff] }
 0x76b   :  { %v4040_v38 = vpop.f32.mrb[146].mxu0 }
 0x76c   :  { %v9777_v21 = vpop.f32.mrb[147].mxu0 }
 0x775   :  { %v4137_v51 = vpop.f32.mrb[148].mxu0 }
 0x776   :  { %v12351_v26 = vadd.f32 %v4137_v51, %v13768_v24  ;;  %v9788_v42 = vpop.f32.mrb[149].mxu0 }
 0x777   :  { %v4140_v3 = vpop.f32.mrb[150].mxu0  ;;  %v13770_v42 = vld [vmem:[#allocation10_spill] sm:$0xff] }
 0x778   :  { %v12353_v34 = vpop.f32.mrb[136].mxu1  ;;  %v9789_v45 = vpop.f32.mrb[151].mxu0  ;;  %v4846_v60 = vsel %vm1353_vm5, %v12351_v26, -inf }
 0x779   :  { %13769 = vst [vmem:[#allocation63_spill] sm:$0xff] %v12353_v34  ;;  %v9770_v7 = vpop.f32.mrb[137].mxu1  ;;  %4847 = vmax.xlane.f32.xlu1 %v4846_v60  ;;  %v13771_v34 = vld [vmem:[#allocation11_spill] sm:$0xff] }
 0x77a   :  { %v3992_v59 = vpop.f32.mrb[138].mxu1 }
 0x77b   :  { %v9771_v5 = vpop.f32.mrb[139].mxu1 }
 0x77d   :  { %v4237_v38 = vpop.f32.mrb[152].mxu0 }
 0x77e   :  { %v9800_v21 = vpop.f32.mrb[153].mxu0 }
 0x77f   :  { %v4240_v9 = vpop.f32.mrb[154].mxu0 }
 0x780   :  { %v4087_v51 = vpop.f32.mrb[140].mxu1  ;;  %v9801_v44 = vpop.f32.mrb[155].mxu0 }
 0x781   :  { %v12360_v3 = vadd.f32 %v4087_v51, %v13770_v42  ;;  %v9782_v0 = vpop.f32.mrb[141].mxu1  ;;  %v12368_v51 = vadd.f32 %v4237_v38, %v13772_v12 }
 0x782   :  { %v4090_v45 = vpop.f32.mrb[142].mxu1 }
 0x783   :  { %v9783_v18 = vpop.f32.mrb[143].mxu1  ;;  %v4843_v35 = vsel %vm1353_vm5, %v12360_v3, -inf }
 0x784   :  { %4844 = vmax.xlane.f32.xlu0 %v4843_v35 }
 0x785   :  { %v4337_v20 = vpop.f32.mrb[156].mxu0 }
 0x786   :  { %v9812_v7 = vpop.f32.mrb[157].mxu0 }
 0x787   :  { %v4340_v60 = vpop.f32.mrb[158].mxu0  ;;  %v12373_v7 = vadd.f32 %v4337_v20, %v13773_v13 }
 0x788   :  { %v4187_v59 = vpop.f32.mrb[144].mxu1  ;;  %v9813_v5 = vpop.f32.mrb[159].mxu0 }
 0x789   :  { %v12365_v21 = vadd.f32 %v4187_v59, %v13771_v34  ;;  %v9794_v9 = vpop.f32.mrb[145].mxu1  ;;  %v4852_v59 = vsel %vm1353_vm5, %v12368_v51, -inf }
 0x78a   :  { %v4190_v44 = vpop.f32.mrb[146].mxu1 }
 0x78b   :  { %v9795_v0 = vpop.f32.mrb[147].mxu1  ;;  %v4849_v18 = vsel %vm1353_vm5, %v12365_v21, -inf  ;;  %v13774_v44 = vld [vmem:[#allocation13_spill] sm:$0xff] }
 0x78c   :  { %4850 = vmax.xlane.f32.xlu0 %v4849_v18 }
 0x78d   :  { %v4437_v45 = vpop.f32.mrb[160].mxu0 }
 0x78e   :  { %v9824_v35 = vpop.f32.mrb[161].mxu0  ;;  %v12381_v56 = vadd.f32 %v4437_v45, %v13775_v11 }
 0x78f   :  { %v4440_v60 = vpop.f32.mrb[162].mxu0  ;;  %v4858_v35 = vsel %vm1353_vm5, %v12373_v7, -inf }
 0x790   :  { %v4287_v5 = vpop.f32.mrb[148].mxu1  ;;  %4853 = vmax.xlane.f32.xlu0 %v4852_v59  ;;  %v9825_v9 = vpop.f32.mrb[163].mxu0 }
 0x791   :  { %v12378_v38 = vadd.f32 %v4287_v5, %v13774_v44  ;;  %v9806_v0 = vpop.f32.mrb[149].mxu1  ;;  %v13776_v9 = vld [vmem:[#allocation17_spill] sm:$0xff] }
 0x792   :  { %v4290_v28 = vpop.f32.mrb[150].mxu1 }
 0x793   :  { %v9807_v18 = vpop.f32.mrb[151].mxu1  ;;  %v4855_v20 = vsel %vm1353_vm5, %v12378_v38, -inf  ;;  %v4864_v28 = vsel %vm1353_vm5, %v12381_v56, -inf }
 0x794   :  { %4856 = vmax.xlane.f32.xlu1 %v4855_v20  ;;  %4859 = vmax.xlane.f32.xlu0 %v4858_v35  ;;  %v13777_v18 = vld [vmem:[#allocation15_spill] sm:$0xff] }
 0x795   :  { %v4537_v60 = vpop.f32.mrb[164].mxu0 }
 0x796   :  { %v9836_v59 = vpop.f32.mrb[165].mxu0  ;;  %v12388_v15 = vadd.f32 %v4537_v60, %v13776_v9 }
 0x797   :  { %v4540_v5 = vpop.f32.mrb[166].mxu0  ;;  %v13778_v59 = vld [vmem:[#allocation18_spill] sm:$0xff] }
 0x798   :  { %v4387_v45 = vpop.f32.mrb[152].mxu1  ;;  %4865 = vmax.xlane.f32.xlu0 %v4864_v28  ;;  %v9837_v0 = vpop.f32.mrb[167].mxu0  ;;  %v4870_v35 = vsel %vm1353_vm5, %v12388_v15, -inf }
 0x799   :  { %v12393_v30 = vadd.f32 %v4387_v45, %v13777_v18  ;;  %v9818_v25 = vpop.f32.mrb[153].mxu1 }
 0x79a   :  { %v4390_v32 = vpop.f32.mrb[154].mxu1 }
 0x79b   :  { %v9819_v2 = vpop.f32.mrb[155].mxu1  ;;  %v4861_v20 = vsel %vm1353_vm5, %v12393_v30, -inf }
 0x79c   :  { %4862 = vmax.xlane.f32.xlu1 %v4861_v20  ;;  %4871 = vmax.xlane.f32.xlu0 %v4870_v35  ;;  %v13779_v2 = vld [vmem:[#allocation19_spill] sm:$0xff] }
 0x79d   :  { %v4637_v60 = vpop.f32.mrb[168].mxu0 }
 0x79e   :  { %v12400_v5 = vadd.f32 %v4637_v60, %v13778_v59  ;;  %v9848_v28 = vpop.f32.mrb[169].mxu0  ;;  %v13780_v60 = vld [vmem:[#allocation20_spill] sm:$0xff] }
 0x79f   :  { %v4640_v0 = vpop.f32.mrb[170].mxu0 }
 0x7a0   :  { %v4487_v55 = vpop.f32.mrb[156].mxu1  ;;  %v9849_v45 = vpop.f32.mrb[171].mxu0  ;;  %v4876_v32 = vsel %vm1353_vm5, %v12400_v5, -inf }
 0x7a1   :  { %v12405_v25 = vadd.f32 %v4487_v55, %v13779_v2  ;;  %v9830_v46 = vpop.f32.mrb[157].mxu1  ;;  %4877 = vmax.xlane.f32.xlu0 %v4876_v32 }
 0x7a2   :  { %v4490_v1 = vpop.f32.mrb[158].mxu1 }
 0x7a3   :  { %v9831_v37 = vpop.f32.mrb[159].mxu1  ;;  %v4867_v20 = vsel %vm1353_vm5, %v12405_v25, -inf }
 0x7a4   :  { %4868 = vmax.xlane.f32.xlu1 %v4867_v20 }
 0x7a5   :  { %v4737_v35 = vpop.f32.mrb[172].mxu0 }
 0x7a6   :  { %v12410_v28 = vadd.f32 %v4737_v35, %v13780_v60  ;;  %v9860_v0 = vpop.f32.mrb[173].mxu0  ;;  %v13782_v60 = vld [vmem:[#allocation21_spill] sm:$0xff] }
 0x7a7   :  { %v4740_v45 = vpop.f32.mrb[174].mxu0 }
 0x7a8   :  { %v4587_v17 = vpop.f32.mrb[160].mxu1  ;;  %v9861_v39 = vpop.f32.mrb[175].mxu0  ;;  %v4882_v55 = vsel %vm1353_vm5, %v12410_v28, -inf }
 0x7a9   :  { %v12415_v46 = vadd.f32 %v4587_v17, %v13781_v61  ;;  %v9842_v1 = vpop.f32.mrb[161].mxu1  ;;  %4883 = vmax.xlane.f32.xlu0 %v4882_v55  ;;  %v13783_v61 = vld [vmem:[#allocation23_spill] sm:$0xff] }
 0x7aa   :  { %v4590_v37 = vpop.f32.mrb[162].mxu1 }
 0x7ab   :  { %v9843_v32 = vpop.f32.mrb[163].mxu1  ;;  %v4873_v20 = vsel %vm1353_vm5, %v12415_v46, -inf }
 0x7ac   :  { %4874 = vmax.xlane.f32.xlu1 %v4873_v20 }
 0x7ad   :  { %v4837_v35 = vpop.f32.mrb[176].mxu0 }
 0x7ae   :  { %v12420_v0 = vadd.f32 %v4837_v35, %v13782_v60  ;;  %v9872_v45 = vpop.f32.mrb[177].mxu0  ;;  %v13784_v60 = vld [vmem:[#allocation24_spill] sm:$0xff] }
 0x7af   :  { %v4840_v39 = vpop.f32.mrb[178].mxu0 }
 0x7b0   :  { %v4687_v2 = vpop.f32.mrb[164].mxu1  ;;  %v9873_v59 = vpop.f32.mrb[179].mxu0  ;;  %v4888_v17 = vsel %vm1353_vm5, %v12420_v0, -inf }
 0x7b1   :  { %v12425_v1 = vadd.f32 %v4687_v2, %v13783_v61  ;;  %v9854_v55 = vpop.f32.mrb[165].mxu1  ;;  %4889 = vmax.xlane.f32.xlu0 %v4888_v17  ;;  %v13785_v2 = vld [vmem:[#allocation32_spill] sm:$0xff]  ;;  %v13786_v17 = vld [vmem:[#allocation30_spill] sm:$0xff] }
 0x7b2   :  { %v4690_v37 = vpop.f32.mrb[166].mxu1  ;;  %v12438_v55 = vpop.permute.xlu1 %5131 }
 0x7b3   :  { %v9855_v32 = vpop.f32.mrb[167].mxu1  ;;  %v4879_v20 = vsel %vm1353_vm5, %v12425_v1, -inf }
 0x7b4   :  { %4880 = vmax.xlane.f32.xlu1 %v4879_v20 }
 0x7b6   :  { %v12440_v37 = vpop.permute.xlu1 %5227 }
 0x7b8   :  { %v4787_v35 = vpop.f32.mrb[168].mxu1 }
 0x7b9   :  { %v12430_v45 = vadd.f32 %v4787_v35, %v13784_v60  ;;  %v9866_v39 = vpop.f32.mrb[169].mxu1  ;;  %v12446_v35 = vpop.permute.xlu0 %5179 }
 0x7ba   :  { %v4790_v59 = vpop.f32.mrb[170].mxu1  ;;  %v12442_v32 = vpop.permute.xlu1 %5323 }
 0x7bb   :  { %v9867_v18 = vpop.f32.mrb[171].mxu1  ;;  %v4885_v9 = vsel %vm1353_vm5, %v12430_v45, -inf }
 0x7bc   :  { %4886 = vmax.xlane.f32.xlu1 %v4885_v9 }
 0x7bd   :  { %v12450_v39 = vpop.permute.xlu0 %5275 }
 0x7be   :  { %v12444_v20 = vpop.permute.xlu1 %5419 }
 0x7c2   :  { %v12448_v18 = vpop.permute.xlu1 %5515 }
 0x7c6   :  { %v12452_v9 = vpop.permute.xlu1 %5563 }
 0x7c7   :  { %5611 = vrot.lane.b32.xlu0 %v13785_v2, %s10876_s25  ;;  %v12454_v2 = vpop.permute.xlu0 %5371 }
 0x7cb   :  { %v12457_v61 = vpop.permute.xlu0 %5467 }
 0x7cd   :  { %5659 = vrot.lane.b32.xlu1 %v13786_v17, %s10876_s25 }
 0x806   :  { %v4848_v59 = vpop.xlane.xlu1 %4847 }
 0x807   :  { %v4892_v17 = vsub.f32 %v12351_v26, %v4848_v59 }
 0x809   :  { %v4909_v60 = vmul.f32 1.442695, %v4892_v17 }
 0x80b   :  { %10593 = vpow2.f32 %v4909_v60 }
 0x811   :  { %v4845_v11 = vpop.xlane.xlu0 %4844 }
 0x812   :  { %v4891_v44 = vsub.f32 %v12360_v3, %v4845_v11 }
 0x814   :  { %v4907_v13 = vmul.f32 1.442695, %v4891_v44 }
 0x815   :  { %v12460_v12 = vpop.eup %10593 }
 0x816   :  { %10595 = vpow2.f32 %v4907_v13  ;;  %v4942_v34 = vsel %vm1353_vm5, %v12460_v12, 0.0 }
 0x817   :  { %4943 = vadd.xlane.f32.xlu0 %v4942_v34 }
 0x819   :  { %v4851_v42 = vpop.xlane.xlu0 %4850 }
 0x81a   :  { %v4893_v24 = vsub.f32 %v12365_v21, %v4851_v42 }
 0x81c   :  { %v4911_v49 = vmul.f32 1.442695, %v4893_v24 }
 0x81d   :  { %v4854_v26 = vpop.xlane.xlu0 %4853 }
 0x81e   :  { %10597 = vpow2.f32 %v4911_v49  ;;  %v4894_v60 = vsub.f32 %v12368_v51, %v4854_v26 }
 0x820   :  { %v12466_v17 = vpop.eup %10595  ;;  %v4913_v59 = vmul.f32 1.442695, %v4894_v60 }
 0x821   :  { %v4860_v11 = vpop.xlane.xlu0 %4859  ;;  %v4857_v3 = vpop.xlane.xlu1 %4856  ;;  %v4939_v13 = vsel %vm1353_vm5, %v12466_v17, 0.0 }
 0x822   :  { %10599 = vpow2.f32 %v4913_v59  ;;  %v4896_v44 = vsub.f32 %v12373_v7, %v4860_v11  ;;  %v4895_v34 = vsub.f32 %v12378_v38, %v4857_v3  ;;  %4940 = vadd.xlane.f32.xlu1 %v4939_v13 }
 0x824   :  { %v4917_v42 = vmul.f32 1.442695, %v4896_v44  ;;  %v4915_v24 = vmul.f32 1.442695, %v4895_v34 }
 0x825   :  { %v4866_v21 = vpop.xlane.xlu0 %4865 }
 0x826   :  { %10601 = vpow2.f32 %v4917_v42  ;;  %v4898_v49 = vsub.f32 %v12381_v56, %v4866_v21 }
 0x827   :  { %10603 = vpow2.f32 %v4915_v24 }
 0x828   :  { %v12473_v51 = vpop.eup %10597  ;;  %v4921_v26 = vmul.f32 1.442695, %v4898_v49 }
 0x829   :  { %v4872_v60 = vpop.xlane.xlu0 %4871  ;;  %v4863_v47 = vpop.xlane.xlu1 %4862  ;;  %v4945_v59 = vsel %vm1353_vm5, %v12473_v51, 0.0 }
 0x82a   :  { %10605 = vpow2.f32 %v4921_v26  ;;  %v4900_v7 = vsub.f32 %v12388_v15, %v4872_v60  ;;  %v4897_v38 = vsub.f32 %v12393_v30, %v4863_v47  ;;  %4946 = vadd.xlane.f32.xlu1 %v4945_v59 }
 0x82c   :  { %v12479_v11 = vpop.eup %10599  ;;  %v4925_v3 = vmul.f32 1.442695, %v4900_v7  ;;  %v4919_v13 = vmul.f32 1.442695, %v4897_v38 }
 0x82d   :  { %v4948_v56 = vsel %vm1353_vm5, %v12479_v11, 0.0 }
 0x82e   :  { %10607 = vpow2.f32 %v4925_v3  ;;  %v4878_v44 = vpop.xlane.xlu0 %4877  ;;  %4949 = vadd.xlane.f32.xlu0 %v4948_v56 }
 0x82f   :  { %10609 = vpow2.f32 %v4919_v13  ;;  %v4902_v34 = vsub.f32 %v12400_v5, %v4878_v44 }
 0x830   :  { %v12484_v42 = vpop.eup %10601 }
 0x831   :  { %v12486_v24 = vpop.eup %10603  ;;  %v4929_v15 = vmul.f32 1.442695, %v4902_v34  ;;  %v4869_v47 = vpop.xlane.xlu1 %4868  ;;  %v4954_v30 = vsel %vm1353_vm5, %v12484_v42, 0.0 }
 0x832   :  { %v4899_v21 = vsub.f32 %v12405_v25, %v4869_v47  ;;  %4955 = vadd.xlane.f32.xlu0 %v4954_v30  ;;  %v4951_v49 = vsel %vm1353_vm5, %v12486_v24, 0.0 }
 0x833   :  { %10611 = vpow2.f32 %v4929_v15  ;;  %4952 = vadd.xlane.f32.xlu1 %v4951_v49 }
 0x834   :  { %v12493_v26 = vpop.eup %10605  ;;  %v4923_v5 = vmul.f32 1.442695, %v4899_v21 }
 0x835   :  { %v4960_v60 = vsel %vm1353_vm5, %v12493_v26, 0.0 }
 0x836   :  { %10613 = vpow2.f32 %v4923_v5  ;;  %v4884_v59 = vpop.xlane.xlu0 %4883  ;;  %4961 = vadd.xlane.f32.xlu0 %v4960_v60 }
 0x837   :  { %v4904_v7 = vsub.f32 %v12410_v28, %v4884_v59 }
 0x838   :  { %v12498_v38 = vpop.eup %10607 }
 0x839   :  { %v12500_v25 = vpop.eup %10609  ;;  %v4933_v3 = vmul.f32 1.442695, %v4904_v7  ;;  %v4875_v13 = vpop.xlane.xlu1 %4874  ;;  %v4966_v56 = vsel %vm1353_vm5, %v12498_v38, 0.0 }
 0x83a   :  { %v4901_v44 = vsub.f32 %v12415_v46, %v4875_v13  ;;  %4967 = vadd.xlane.f32.xlu0 %v4966_v56  ;;  %v4957_v34 = vsel %vm1353_vm5, %v12500_v25, 0.0 }
 0x83b   :  { %10615 = vpow2.f32 %v4933_v3  ;;  %4958 = vadd.xlane.f32.xlu1 %v4957_v34 }
 0x83c   :  { %v4927_v15 = vmul.f32 1.442695, %v4901_v44 }
 0x83d   :  { %v12507_v47 = vpop.eup %10611 }
 0x83e   :  { %10617 = vpow2.f32 %v4927_v15  ;;  %v4972_v28 = vsel %vm1353_vm5, %v12507_v47, 0.0  ;;  %v4890_v56 = vpop.xlane.xlu0 %4889 }
 0x83f   :  { %4973 = vadd.xlane.f32.xlu0 %v4972_v28  ;;  %v4906_v44 = vsub.f32 %v12420_v0, %v4890_v56 }
 0x840   :  { %v12511_v30 = vpop.eup %10613 }
 0x841   :  { %v4881_v21 = vpop.xlane.xlu1 %4880  ;;  %v4963_v46 = vsel %vm1353_vm5, %v12511_v30, 0.0  ;;  %v4937_v34 = vmul.f32 1.442695, %v4906_v44 }
 0x842   :  { %v4903_v49 = vsub.f32 %v12425_v1, %v4881_v21  ;;  %4964 = vadd.xlane.f32.xlu1 %v4963_v46  ;;  %v12554_v0 = vpop.permute.xlu0 %5611 }
 0x844   :  { %v4931_v5 = vmul.f32 1.442695, %v4903_v49 }
 0x845   :  { %v12516_v60 = vpop.eup %10615 }
 0x846   :  { %10619 = vpow2.f32 %v4931_v5  ;;  %v4978_v59 = vsel %vm1353_vm5, %v12516_v60, 0.0 }
 0x847   :  { %4979 = vadd.xlane.f32.xlu0 %v4978_v59  ;;  %10621 = vpow2.f32 %v4937_v34  ;;  %v5233_v34 = vsel %vm1549_vm3, %v12440_v37, 0 }
 0x848   :  { %v12520_v7 = vpop.eup %10617 }
 0x849   :  { %v4969_v3 = vsel %vm1353_vm5, %v12520_v7, 0.0  ;;  %v4887_v15 = vpop.xlane.xlu1 %4886 }
 0x84a   :  { %4970 = vadd.xlane.f32.xlu1 %v4969_v3  ;;  %v4905_v28 = vsub.f32 %v12430_v45, %v4887_v15  ;;  %v5185_v3 = vsel %vm1549_vm3, %v12446_v35, 0 }
 0x84c   :  { %v4935_v21 = vmul.f32 1.442695, %v4905_v28 }
 0x84e   :  { %10623 = vpow2.f32 %v4935_v21 }
 0x850   :  { %v12524_v13 = vpop.eup %10619 }
 0x851   :  { %v4975_v1 = vsel %vm1353_vm5, %v12524_v13, 0.0  ;;  %v12534_v46 = vpop.eup %10621 }
 0x852   :  { %4976 = vadd.xlane.f32.xlu1 %v4975_v1  ;;  %v4984_v49 = vsel %vm1353_vm5, %v12534_v46, 0.0 }
 0x858   :  { %v12538_v5 = vpop.eup %10623 }
 0x859   :  { %v4981_v59 = vsel %vm1353_vm5, %v12538_v5, 0.0 }
 0x85d   :  { %5707 = vrot.lane.b32.xlu0 %v11708_v31, %s10876_s25 }
 0x863   :  { %5755 = vrot.lane.b32.xlu1 %v11651_v19, %s10876_s25 }
 0x87c   :  { %4985 = vadd.xlane.f32.xlu0 %v4984_v49 }
 0x887   :  { %4982 = vadd.xlane.f32.xlu1 %v4981_v59 }
 0x892   :  { %5805 = vrot.lane.b32.xlu0 %v11025_v43, %s10877_s26 }
 0x896   :  { %5803 = vrot.lane.b32.xlu0 %v11025_v43, %s10878_s27 }
 0x898   :  { %5855 = vrot.lane.b32.xlu1 %v11002_v29, %s10877_s26 }
 0x89a   :  { %5905 = vrot.lane.b32.xlu0 %v11012_v36, %s10877_s26 }
 0x89c   :  { %5853 = vrot.lane.b32.xlu1 %v11002_v29, %s10878_s27  ;;  %v12568_v29 = vpop.permute.xlu1 %5659 }
 0x89e   :  { %5903 = vrot.lane.b32.xlu0 %v11012_v36, %s10878_s27 }
 0x8a0   :  { %5955 = vrot.lane.b32.xlu1 %v11019_v41, %s10877_s26 }
 0x8a2   :  { %6005 = vrot.lane.b32.xlu0 %v11033_v48, %s10877_s26 }
 0x8a4   :  { %v4944_v43 = vpop.xlane.xlu0 %4943  ;;  %5953 = vrot.lane.b32.xlu1 %v11019_v41, %s10878_s27 }
 0x8a5   :  { %10625 = vrcp.f32 %v4944_v43  ;;  %v5329_v43 = vsel %vm1549_vm3, %v12442_v32, 0  ;;  %v5377_v32 = vsel %vm1549_vm3, %v12454_v2, 0 }
 0x8a6   :  { %6003 = vrot.lane.b32.xlu0 %v11033_v48, %s10878_s27 }
 0x8a8   :  { %6055 = vrot.lane.b32.xlu1 %v11039_v52, %s10877_s26 }
 0x8aa   :  { %6105 = vrot.lane.b32.xlu0 %v11049_v58, %s10877_s26 }
 0x8ac   :  { %6053 = vrot.lane.b32.xlu1 %v11039_v52, %s10878_s27 }
 0x8ae   :  { %6103 = vrot.lane.b32.xlu0 %v11049_v58, %s10878_s27 }
 0x8af   :  { %v10626_v36 = vpop.eup %10625  ;;  %v4941_v41 = vpop.xlane.xlu1 %4940 }
 0x8b0   :  { %10627 = vrcp.f32 %v4941_v41  ;;  %6155 = vrot.lane.b32.xlu1 %v11055_v62, %s10877_s26  ;;  %v5004_v48 = vmul.f32 %v10626_v36, %v12460_v12 }
 0x8b2   :  { %6205 = vrot.lane.b32.xlu0 %v11065_v4, %s10877_s26  ;;  %v5020_v45 = vpack.c.bf16 %v5004_v48, %v5004_v48  ;;  %v5425_v48 = vsel %vm1549_vm3, %v12444_v20, 0 }
 0x8b4   :  { %9883 = vmatmul.mubr.msk.bf16.vlgmr.msra.gmra.mrb[180].mxu0 %vm1353_vm5, %v5020_v45  ;;  %6153 = vrot.lane.b32.xlu1 %v11055_v62, %s10878_s27 }
 0x8b5   :  { %9893 = vmatpush3.bf16.msra.mxu0 %v5185_v3  ;;  %9894 = vmatprep.mubr.msk.bf16.mxu0 %vm10870_vm1, %v13709_v54 }
 0x8b6   :  { %6203 = vrot.lane.b32.xlu0 %v11065_v4, %s10878_s27  ;;  %9904 = vmatprep.subr.bf16.mxu0 %v13709_v54  ;;  %v5137_v4 = vsel %vm1549_vm3, %v12438_v55, 0 }
 0x8b7   :  { %v4947_v52 = vpop.xlane.xlu1 %4946 }
 0x8b8   :  { %10629 = vrcp.f32 %v4947_v52  ;;  %6255 = vrot.lane.b32.xlu1 %v11071_v8, %s10877_s26  ;;  %v13787_v52 = vld [vmem:[#allocation27_spill] sm:$0xff] }
 0x8ba   :  { %v10628_v58 = vpop.eup %10627  ;;  %6305 = vrot.lane.b32.xlu0 %v11081_v14, %s10877_s26 }
 0x8bb   :  { %v4950_v12 = vpop.xlane.xlu0 %4949  ;;  %v5003_v62 = vmul.f32 %v10628_v58, %v12466_v17 }
 0x8bc   :  { %10631 = vrcp.f32 %v4950_v12  ;;  %6253 = vrot.lane.b32.xlu1 %v11071_v8, %s10878_s27  ;;  %v5617_v12 = vsel %vm1549_vm3, %v12554_v0, 0 }
 0x8bd   :  { %v5019_v35 = vpack.c.bf16 %v5003_v62, %v5003_v62 }
 0x8be   :  { %6303 = vrot.lane.b32.xlu0 %v11081_v14, %s10878_s27 }
 0x8bf   :  { %v4956_v1 = vpop.xlane.xlu0 %4955  ;;  %9877 = vmatmul.mubr.msk.bf16.vlgmr.msra.gmra.mrb[172].mxu1 %vm1353_vm5, %v5019_v35 }
 0x8c0   :  { %10633 = vrcp.f32 %v4956_v1  ;;  %9887 = vmatpush3.bf16.msra.mxu1 %v5137_v4  ;;  %v4953_v56 = vpop.xlane.xlu1 %4952  ;;  %6355 = vrot.lane.b32.xlu1 %v11087_v22, %s10877_s26 }
 0x8c1   :  { %10635 = vrcp.f32 %v4953_v56  ;;  %9888 = vmatprep.mubr.msk.bf16.mxu1 %vm10870_vm1, %v13709_v54  ;;  %9898 = vmatprep.subr.bf16.mxu1 %v13709_v54 }
 0x8c2   :  { %v10630_v8 = vpop.eup %10629  ;;  %6405 = vrot.lane.b32.xlu0 %v11097_v33, %s10877_s26 }
 0x8c3   :  { %v5005_v14 = vmul.f32 %v10630_v8, %v12473_v51  ;;  %v4962_v55 = vpop.xlane.xlu0 %4961  ;;  %v5281_v51 = vsel %vm1549_vm3, %v12450_v39, 0 }
 0x8c4   :  { %6353 = vrot.lane.b32.xlu1 %v11087_v22, %s10878_s27  ;;  %10637 = vrcp.f32 %v4962_v55 }
 0x8c5   :  { %v5021_v17 = vpack.c.bf16 %v5005_v14, %v5005_v14 }
 0x8c6   :  { %v10632_v44 = vpop.eup %10631  ;;  %6403 = vrot.lane.b32.xlu0 %v11097_v33, %s10878_s27 }
 0x8c7   :  { %9889 = vmatmul.mubr.msk.bf16.vlgmr.msra.gmra.mrb[176].mxu1 %vm1353_vm5, %v5021_v17  ;;  %v5006_v15 = vmul.f32 %v10632_v44, %v12479_v11  ;;  %v4968_v11 = vpop.xlane.xlu0 %4967 }
 0x8c8   :  { %9899 = vmatpush3.bf16.msra.mxu1 %v5233_v34  ;;  %v4959_v28 = vpop.xlane.xlu1 %4958  ;;  %6455 = vrot.lane.b32.xlu1 %v11103_v40, %s10877_s26 }
 0x8c9   :  { %10639 = vrcp.f32 %v4959_v28  ;;  %v5022_v22 = vpack.c.bf16 %v5006_v15, %v5006_v15  ;;  %9900 = vmatprep.mubr.msk.bf16.mxu1 %vm10870_vm1, %v13709_v54  ;;  %9910 = vmatprep.subr.bf16.mxu1 %v13709_v54 }
 0x8ca   :  { %v10634_v33 = vpop.eup %10633  ;;  %6505 = vrot.lane.b32.xlu0 %v11113_v50, %s10877_s26  ;;  %10641 = vrcp.f32 %v4968_v11 }
 0x8cb   :  { %v10636_v37 = vpop.eup %10635  ;;  %9895 = vmatmul.mubr.msk.bf16.vlgmr.msra.gmra.mrb[184].mxu0 %vm1353_vm5, %v5022_v22  ;;  %v5008_v49 = vmul.f32 %v10634_v33, %v12484_v42 }
 0x8cc   :  { %9905 = vmatpush3.bf16.msra.mxu0 %v5281_v51  ;;  %6453 = vrot.lane.b32.xlu1 %v11103_v40, %s10878_s27  ;;  %v5007_v21 = vmul.f32 %v10636_v37, %v12486_v24  ;;  %v4974_v24 = vpop.xlane.xlu0 %4973 }
 0x8cd   :  { %9906 = vmatprep.mubr.msk.bf16.mxu0 %vm10870_vm1, %v13709_v54  ;;  %9916 = vmatprep.subr.bf16.mxu0 %v13709_v54  ;;  %v5024_v40 = vpack.c.bf16 %v5008_v49, %v5008_v49 }
 0x8ce   :  { %6503 = vrot.lane.b32.xlu0 %v11113_v50, %s10878_s27  ;;  %v5023_v39 = vpack.c.bf16 %v5007_v21, %v5007_v21  ;;  %v10638_v42 = vpop.eup %10637 }
 0x8cf   :  { %v4965_v59 = vpop.xlane.xlu1 %4964 }
 0x8d0   :  { %9901 = vmatmul.mubr.msk.bf16.vlgmr.msra.gmra.mrb[180].mxu1 %vm1353_vm5, %v5023_v39  ;;  %10643 = vrcp.f32 %v4965_v59  ;;  %6555 = vrot.lane.b32.xlu1 %v11119_v57, %s10877_s26 }
 0x8d1   :  { %9911 = vmatpush3.bf16.msra.mxu1 %v5329_v43  ;;  %9912 = vmatprep.mubr.msk.bf16.mxu1 %vm10870_vm1, %v13709_v54  ;;  %10645 = vrcp.f32 %v4974_v24 }
 0x8d2   :  { %6843 = vrot.lane.b32.xlu0 %v11197_v27, %s10878_s27  ;;  %9922 = vmatprep.subr.bf16.mxu1 %v13709_v54  ;;  %v5010_v27 = vmul.f32 %v10638_v42, %v12493_v26 }
 0x8d3   :  { %v10640_v50 = vpop.eup %10639  ;;  %9907 = vmatmul.mubr.msk.bf16.vlgmr.msra.gmra.mrb[188].mxu0 %vm1353_vm5, %v5024_v40 }
 0x8d4   :  { %9917 = vmatpush3.bf16.msra.mxu0 %v5377_v32  ;;  %6553 = vrot.lane.b32.xlu1 %v11119_v57, %s10878_s27  ;;  %v5009_v36 = vmul.f32 %v10640_v50, %v12500_v25  ;;  %v10642_v57 = vpop.eup %10641  ;;  %v5026_v25 = vpack.c.bf16 %v5010_v27, %v5010_v27 }
 0x8d5   :  { %9918 = vmatprep.mubr.msk.bf16.mxu0 %vm10870_vm1, %v13709_v54  ;;  %9928 = vmatprep.subr.bf16.mxu0 %v13709_v54 }
 0x8d6   :  { %6939 = vrot.lane.b32.xlu0 %v11500_v63, %s10878_s27  ;;  %v5025_v2 = vpack.c.bf16 %v5009_v36, %v5009_v36  ;;  %v5473_v63 = vsel %vm1549_vm3, %v12457_v61, 0 }
 0x8d7   :  { %v4971_v41 = vpop.xlane.xlu1 %4970 }
 0x8d8   :  { %9913 = vmatmul.mubr.msk.bf16.vlgmr.msra.gmra.mrb[184].mxu1 %vm1353_vm5, %v5025_v2  ;;  %10647 = vrcp.f32 %v4971_v41  ;;  %6795 = vrot.lane.b32.xlu1 %v11226_v6, %s10878_s27  ;;  %v4980_v6 = vpop.xlane.xlu0 %4979 }
 0x8d9   :  { %9923 = vmatpush3.bf16.msra.mxu1 %v5425_v48  ;;  %9924 = vmatprep.mubr.msk.bf16.mxu1 %vm10870_vm1, %v13709_v54  ;;  %10649 = vrcp.f32 %v4980_v6 }
 0x8da   :  { %v10644_v26 = vpop.eup %10643  ;;  %7035 = vrot.lane.b32.xlu0 %v11508_v16, %s10878_s27  ;;  %9934 = vmatprep.subr.bf16.mxu1 %v13709_v54  ;;  %v5012_v16 = vmul.f32 %v10642_v57, %v12498_v38 }
 0x8db   :  { %9919 = vmatmul.mubr.msk.bf16.vlgmr.msra.gmra.mrb[192].mxu0 %vm1353_vm5, %v5026_v25  ;;  %v5011_v20 = vmul.f32 %v10644_v26, %v12511_v30  ;;  %v5521_v30 = vsel %vm1549_vm3, %v12448_v18, 0 }
 0x8dc   :  { %9929 = vmatpush3.bf16.msra.mxu0 %v5473_v63  ;;  %6891 = vrot.lane.b32.xlu1 %v11535_v53, %s10878_s27  ;;  %v10646_v53 = vpop.eup %10645  ;;  %v5028_v3 = vpack.c.bf16 %v5012_v16, %v5012_v16  ;;  %v5708_v4 = vpop.permute.xlu0 %5707 }
 0x8dd   :  { %v5027_v45 = vpack.c.bf16 %v5011_v20, %v5011_v20  ;;  %9930 = vmatprep.mubr.msk.bf16.mxu0 %vm10870_vm1, %v13709_v54  ;;  %9940 = vmatprep.subr.bf16.mxu0 %v13709_v54  ;;  %v5014_v58 = vmul.f32 %v10646_v53, %v12507_v47  ;;  %v5665_v47 = vsel %vm1549_vm3, %v12568_v29, 0  ;;  %v5713_v8 = vsel %vm1549_vm3, %v5708_v4, 0 }
 0x8de   :  { %7131 = vrot.lane.b32.xlu0 %v11517_v23, %s10878_s27  ;;  %v5569_v23 = vsel %vm1549_vm3, %v12452_v9, 0  ;;  %v13788_v9 = vld [vmem:[#allocation28_spill] sm:$0xff] }
 0x8df   :  { %v4977_v61 = vpop.xlane.xlu1 %4976  ;;  %v5030_v62 = vpack.c.bf16 %v5014_v58, %v5014_v58 }
 0x8e0   :  { %9925 = vmatmul.mubr.msk.bf16.vlgmr.msra.gmra.mrb[188].mxu1 %vm1353_vm5, %v5027_v45  ;;  %10651 = vrcp.f32 %v4977_v61  ;;  %6987 = vrot.lane.b32.xlu1 %v13747_v10, %s10878_s27 }
 0x8e1   :  { %9935 = vmatpush3.bf16.msra.mxu1 %v5521_v30  ;;  %9936 = vmatprep.mubr.msk.bf16.mxu1 %vm10870_vm1, %v13709_v54 }
 0x8e2   :  { %v10648_v38 = vpop.eup %10647  ;;  %9946 = vmatprep.subr.bf16.mxu1 %v13709_v54 }
 0x8e3   :  { %9931 = vmatmul.mubr.msk.bf16.vlgmr.msra.gmra.mrb[196].mxu0 %vm1353_vm5, %v5028_v3  ;;  %v5013_v18 = vmul.f32 %v10648_v38, %v12520_v7  ;;  %v10650_v7 = vpop.eup %10649  ;;  %v5756_v14 = vpop.permute.xlu1 %5755 }
 0x8e4   :  { %9941 = vmatpush3.bf16.msra.mxu0 %v5569_v23  ;;  %7083 = vrot.lane.b32.xlu1 %v13787_v52, %s10878_s27  ;;  %v5016_v56 = vmul.f32 %v10650_v7, %v12516_v60 }
 0x8e5   :  { %v5029_v10 = vpack.c.bf16 %v5013_v18, %v5013_v18  ;;  %9942 = vmatprep.mubr.msk.bf16.mxu0 %vm10870_vm1, %v13709_v54  ;;  %9952 = vmatprep.subr.bf16.mxu0 %v13709_v54 }
 0x8e6   :  { %v5032_v29 = vpack.c.bf16 %v5016_v56, %v5016_v56 }
 0x8e8   :  { %9937 = vmatmul.mubr.msk.bf16.vlgmr.msra.gmra.mrb[192].mxu1 %vm1353_vm5, %v5029_v10  ;;  %7179 = vrot.lane.b32.xlu1 %v13788_v9, %s10878_s27 }
 0x8e9   :  { %9947 = vmatpush3.bf16.msra.mxu1 %v5617_v12  ;;  %9948 = vmatprep.mubr.msk.bf16.mxu1 %vm10870_vm1, %v13709_v54 }
 0x8ea   :  { %v10652_v35 = vpop.eup %10651  ;;  %9958 = vmatprep.subr.bf16.mxu1 %v13709_v54 }
 0x8eb   :  { %9943 = vmatmul.mubr.msk.bf16.vlgmr.msra.gmra.mrb[200].mxu0 %vm1353_vm5, %v5030_v62  ;;  %v5015_v0 = vmul.f32 %v10652_v35, %v12524_v13  ;;  %v5761_v13 = vsel %vm1549_vm3, %v5756_v14, 0 }
 0x8ec   :  { %9953 = vmatpush3.bf16.msra.mxu0 %v5665_v47  ;;  %9954 = vmatprep.mubr.msk.bf16.mxu0 %vm10870_vm1, %v13709_v54 }
 0x8ed   :  { %v5031_v1 = vpack.c.bf16 %v5015_v0, %v5015_v0  ;;  %9964 = vmatprep.subr.bf16.mxu0 %v13709_v54 }
 0x8f0   :  { %9949 = vmatmul.mubr.msk.bf16.vlgmr.msra.gmra.mrb[196].mxu1 %vm1353_vm5, %v5031_v1 }
 0x8f1   :  { %9959 = vmatpush3.bf16.msra.mxu1 %v5713_v8  ;;  %9960 = vmatprep.mubr.msk.bf16.mxu1 %vm10870_vm1, %v13709_v54 }
 0x8f2   :  { %9970 = vmatprep.subr.bf16.mxu1 %v13709_v54 }
 0x8f3   :  { %9955 = vmatmul.mubr.msk.bf16.vlgmr.msra.gmra.mrb[204].mxu0 %vm1353_vm5, %v5032_v29 }
 0x8f4   :  { %9965 = vmatpush3.bf16.msra.mxu0 %v5761_v13  ;;  %9966 = vmatprep.mubr.msk.bf16.mxu0 %vm10870_vm1, %v13709_v54 }
 0x8f5   :  { %9976 = vmatprep.subr.bf16.mxu0 %v13709_v54 }
 0x909   :  { %v4986_v60 = vpop.xlane.xlu0 %4985 }
 0x90a   :  { %10653 = vrcp.f32 %v4986_v60 }
 0x90d   :  { %v5806_v55 = vpop.permute.xlu0 %5805 }
 0x90e   :  { %v5811_v42 = vsel %vm586_vm2, %v5806_v55, 0 }
 0x911   :  { %v5804_v17 = vpop.permute.xlu0 %5803 }
 0x914   :  { %v10654_v44 = vpop.eup %10653  ;;  %v4983_v34 = vpop.xlane.xlu1 %4982 }
 0x915   :  { %10655 = vrcp.f32 %v4983_v34  ;;  %v5906_v15 = vpop.permute.xlu0 %5905  ;;  %v5018_v28 = vmul.f32 %v10654_v44, %v12534_v46 }
 0x916   :  { %v5911_v27 = vsel %vm586_vm2, %v5906_v15, 0 }
 0x917   :  { %v5034_v22 = vpack.c.bf16 %v5018_v28, %v5018_v28 }
 0x918   :  { %v5856_v33 = vpop.permute.xlu1 %5855 }
 0x919   :  { %v5861_v37 = vsel %vm586_vm2, %v5856_v33, 0  ;;  %v5904_v51 = vpop.permute.xlu0 %5903  ;;  %9967 = vmatmul.mubr.msk.bf16.vlgmr.msra.gmra.mrb[208].mxu0 %vm1353_vm5, %v5034_v22 }
 0x91a   :  { %9977 = vmatpush3.bf16.xpose.msra.mxu0 %v5861_v37  ;;  %9978 = vmatprep.mubr.msk.bf16.mxu0 %vm10870_vm1, %v13709_v54 }
 0x91b   :  { %9988 = vmatprep.subr.bf16.mxu0 %v13709_v54 }
 0x91c   :  { %v5854_v11 = vpop.permute.xlu1 %5853 }
 0x91d   :  { %v6006_v21 = vpop.permute.xlu0 %6005 }
 0x91e   :  { %v6011_v26 = vsel %vm586_vm2, %v6006_v21, 0 }
 0x91f   :  { %v10656_v49 = vpop.eup %10655 }
 0x920   :  { %v5956_v39 = vpop.permute.xlu1 %5955  ;;  %v5017_v59 = vmul.f32 %v10656_v49, %v12538_v5 }
 0x921   :  { %v5961_v46 = vsel %vm586_vm2, %v5956_v39, 0  ;;  %v6004_v43 = vpop.permute.xlu0 %6003  ;;  %9979 = vmatmul.mubr.msk.bf16.vlgmr.msra.gmra.mrb[212].mxu0 %vm586_vm2, %v5854_v11 }
 0x922   :  { %9989 = vmatpush3.bf16.xpose.msra.mxu0 %v5961_v46  ;;  %v5033_v40 = vpack.c.bf16 %v5017_v59, %v5017_v59  ;;  %9990 = vmatprep.mubr.msk.bf16.mxu0 %vm10870_vm1, %v13709_v54 }
 0x923   :  { %10000 = vmatprep.subr.bf16.mxu0 %v13709_v54 }
 0x924   :  { %9961 = vmatmul.mubr.msk.bf16.vlgmr.msra.gmra.mrb[200].mxu1 %vm1353_vm5, %v5033_v40  ;;  %v5954_v50 = vpop.permute.xlu1 %5953 }
 0x925   :  { %9971 = vmatpush3.bf16.xpose.msra.mxu1 %v5811_v42  ;;  %v6106_v32 = vpop.permute.xlu0 %6105  ;;  %9972 = vmatprep.mubr.msk.bf16.mxu1 %vm10870_vm1, %v13709_v54 }
 0x926   :  { %9982 = vmatprep.subr.bf16.mxu1 %v13709_v54  ;;  %v6111_v61 = vsel %vm586_vm2, %v6106_v32, 0 }
 0x928   :  { %v6056_v5 = vpop.permute.xlu1 %6055 }
 0x929   :  { %v6061_v24 = vsel %vm586_vm2, %v6056_v5, 0  ;;  %v6104_v36 = vpop.permute.xlu0 %6103  ;;  %9991 = vmatmul.mubr.msk.bf16.vlgmr.msra.gmra.mrb[216].mxu0 %vm586_vm2, %v5954_v50 }
 0x92a   :  { %10001 = vmatpush3.bf16.xpose.msra.mxu0 %v6061_v24  ;;  %10002 = vmatprep.mubr.msk.bf16.mxu0 %vm10870_vm1, %v13709_v54 }
 0x92b   :  { %10012 = vmatprep.subr.bf16.mxu0 %v13709_v54 }
 0x92c   :  { %9973 = vmatmul.mubr.msk.bf16.vlgmr.msra.gmra.mrb[204].mxu1 %vm586_vm2, %v5804_v17  ;;  %v6054_v2 = vpop.permute.xlu1 %6053 }
 0x92d   :  { %9983 = vmatpush3.bf16.xpose.msra.mxu1 %v5911_v27  ;;  %v6206_v41 = vpop.permute.xlu0 %6205  ;;  %9984 = vmatprep.mubr.msk.bf16.mxu1 %vm10870_vm1, %v13709_v54 }
 0x92e   :  { %9994 = vmatprep.subr.bf16.mxu1 %v13709_v54  ;;  %v6211_v23 = vsel %vm586_vm2, %v6206_v41, 0 }
 0x930   :  { %v6156_v48 = vpop.permute.xlu1 %6155 }
 0x931   :  { %v6161_v57 = vsel %vm586_vm2, %v6156_v48, 0  ;;  %v6204_v25 = vpop.permute.xlu0 %6203  ;;  %10003 = vmatmul.mubr.msk.bf16.vlgmr.msra.gmra.mrb[220].mxu0 %vm586_vm2, %v6054_v2 }
 0x932   :  { %10013 = vmatpush3.bf16.xpose.msra.mxu0 %v6161_v57  ;;  %10014 = vmatprep.mubr.msk.bf16.mxu0 %vm10870_vm1, %v13709_v54 }
 0x933   :  { %10024 = vmatprep.subr.bf16.mxu0 %v13709_v54 }
 0x934   :  { %9985 = vmatmul.mubr.msk.bf16.vlgmr.msra.gmra.mrb[208].mxu1 %vm586_vm2, %v5904_v51  ;;  %v6154_v63 = vpop.permute.xlu1 %6153 }
 0x935   :  { %9995 = vmatpush3.bf16.xpose.msra.mxu1 %v6011_v26  ;;  %v6306_v20 = vpop.permute.xlu0 %6305  ;;  %9996 = vmatprep.mubr.msk.bf16.mxu1 %vm10870_vm1, %v13709_v54 }
 0x936   :  { %10006 = vmatprep.subr.bf16.mxu1 %v13709_v54  ;;  %v6311_v9 = vsel %vm586_vm2, %v6306_v20, 0 }
 0x938   :  { %v6256_v6 = vpop.permute.xlu1 %6255 }
 0x939   :  { %v6261_v45 = vsel %vm586_vm2, %v6256_v6, 0  ;;  %v6304_v16 = vpop.permute.xlu0 %6303  ;;  %10015 = vmatmul.mubr.msk.bf16.vlgmr.msra.gmra.mrb[224].mxu0 %vm586_vm2, %v6154_v63 }
 0x93a   :  { %10025 = vmatpush3.bf16.xpose.msra.mxu0 %v6261_v45  ;;  %10026 = vmatprep.mubr.msk.bf16.mxu0 %vm10870_vm1, %v13709_v54 }
 0x93b   :  { %10036 = vmatprep.subr.bf16.mxu0 %v13709_v54 }
 0x93c   :  { %9997 = vmatmul.mubr.msk.bf16.vlgmr.msra.gmra.mrb[212].mxu1 %vm586_vm2, %v6004_v43  ;;  %v6254_v30 = vpop.permute.xlu1 %6253 }
 0x93d   :  { %10007 = vmatpush3.bf16.xpose.msra.mxu1 %v6111_v61  ;;  %10008 = vmatprep.mubr.msk.bf16.mxu1 %vm10870_vm1, %v13709_v54  ;;  %v6406_v53 = vpop.permute.xlu0 %6405 }
 0x93e   :  { %10018 = vmatprep.subr.bf16.mxu1 %v13709_v54  ;;  %v6411_v0 = vsel %vm586_vm2, %v6406_v53, 0 }
 0x940   :  { %v6356_v3 = vpop.permute.xlu1 %6355 }
 0x941   :  { %v6361_v38 = vsel %vm586_vm2, %v6356_v3, 0  ;;  %10027 = vmatmul.mubr.msk.bf16.vlgmr.msra.gmra.mrb[228].mxu0 %vm586_vm2, %v6254_v30  ;;  %v6404_v18 = vpop.permute.xlu0 %6403 }
 0x942   :  { %10037 = vmatpush3.bf16.xpose.msra.mxu0 %v6361_v38  ;;  %10038 = vmatprep.mubr.msk.bf16.mxu0 %vm10870_vm1, %v13709_v54 }
 0x943   :  { %10048 = vmatprep.subr.bf16.mxu0 %v13709_v54 }
 0x944   :  { %10009 = vmatmul.mubr.msk.bf16.vlgmr.msra.gmra.mrb[216].mxu1 %vm586_vm2, %v6104_v36  ;;  %v6354_v52 = vpop.permute.xlu1 %6353 }
 0x945   :  { %10019 = vmatpush3.bf16.xpose.msra.mxu1 %v6211_v23  ;;  %10020 = vmatprep.mubr.msk.bf16.mxu1 %vm10870_vm1, %v13709_v54  ;;  %v6506_v12 = vpop.permute.xlu0 %6505 }
 0x946   :  { %10030 = vmatprep.subr.bf16.mxu1 %v13709_v54  ;;  %v6511_v8 = vsel %vm586_vm2, %v6506_v12, 0 }
 0x948   :  { %v6456_v10 = vpop.permute.xlu1 %6455 }
 0x949   :  { %v6461_v58 = vsel %vm586_vm2, %v6456_v10, 0  ;;  %10039 = vmatmul.mubr.msk.bf16.vlgmr.msra.gmra.mrb[232].mxu0 %vm586_vm2, %v6354_v52  ;;  %v6504_v62 = vpop.permute.xlu0 %6503 }
 0x94a   :  { %10049 = vmatpush3.bf16.xpose.msra.mxu0 %v6461_v58  ;;  %10050 = vmatprep.mubr.msk.bf16.mxu0 %vm10870_vm1, %v13709_v54 }
 0x94b   :  { %10060 = vmatprep.subr.bf16.mxu0 %v13709_v54 }
 0x94c   :  { %10021 = vmatmul.mubr.msk.bf16.vlgmr.msra.gmra.mrb[220].mxu1 %vm586_vm2, %v6204_v25  ;;  %v6454_v7 = vpop.permute.xlu1 %6453 }
 0x94d   :  { %10031 = vmatpush3.bf16.xpose.msra.mxu1 %v6311_v9  ;;  %10032 = vmatprep.mubr.msk.bf16.mxu1 %vm10870_vm1, %v13709_v54  ;;  %v6844_v4 = vpop.permute.xlu0 %6843 }
 0x94e   :  { %10042 = vmatprep.subr.bf16.mxu1 %v13709_v54  ;;  %v6849_v56 = vsel %vm1549_vm3, %v6844_v4, 0 }
 0x950   :  { %v6556_v35 = vpop.permute.xlu1 %6555 }
 0x951   :  { %v6561_v47 = vsel %vm586_vm2, %v6556_v35, 0  ;;  %10051 = vmatmul.mubr.msk.bf16.vlgmr.msra.gmra.mrb[236].mxu0 %vm586_vm2, %v6454_v7 }
 0x952   :  { %10061 = vmatpush3.bf16.xpose.msra.mxu0 %v6561_v47  ;;  %10062 = vmatprep.mubr.msk.bf16.mxu0 %vm10870_vm1, %v13709_v54 }
 0x953   :  { %10072 = vmatprep.subr.bf16.mxu0 %v13709_v54 }
 0x954   :  { %10033 = vmatmul.mubr.msk.bf16.vlgmr.msra.gmra.mrb[224].mxu1 %vm586_vm2, %v6304_v16  ;;  %v6554_v1 = vpop.permute.xlu1 %6553 }
 0x955   :  { %10043 = vmatpush3.bf16.xpose.msra.mxu1 %v6411_v0  ;;  %10044 = vmatprep.mubr.msk.bf16.mxu1 %vm10870_vm1, %v13709_v54 }
 0x956   :  { %10054 = vmatprep.subr.bf16.mxu1 %v13709_v54 }
 0x958   :  { %v6796_v14 = vpop.permute.xlu1 %6795 }
 0x959   :  { %10063 = vmatmul.mubr.msk.bf16.vlgmr.msra.gmra.mrb[240].mxu0 %vm586_vm2, %v6554_v1  ;;  %v6801_v29 = vsel %vm1549_vm3, %v6796_v14, 0 }
 0x95a   :  { %10073 = vmatpush3.bf16.msra.mxu0 %v6849_v56  ;;  %10074 = vmatprep.mubr.msk.bf16.mxu0 %vm10870_vm1, %v13709_v54 }
 0x95b   :  { %10084 = vmatprep.subr.bf16.mxu0 %v13709_v54 }
 0x95c   :  { %10045 = vmatmul.mubr.msk.bf16.vlgmr.msra.gmra.mrb[228].mxu1 %vm586_vm2, %v6404_v18 }
 0x95d   :  { %10055 = vmatpush3.bf16.xpose.msra.mxu1 %v6511_v8  ;;  %10056 = vmatprep.mubr.msk.bf16.mxu1 %vm10870_vm1, %v13709_v54 }
 0x95e   :  { %10066 = vmatprep.subr.bf16.mxu1 %v13709_v54 }
 0x964   :  { %10057 = vmatmul.mubr.msk.bf16.vlgmr.msra.gmra.mrb[232].mxu1 %vm586_vm2, %v6504_v62 }
 0x965   :  { %10067 = vmatpush3.bf16.msra.mxu1 %v6801_v29  ;;  %10068 = vmatprep.mubr.msk.bf16.mxu1 %vm10870_vm1, %v13709_v54 }
 0x966   :  { %10078 = vmatprep.subr.bf16.mxu1 %v13709_v54 }
 0x987   :  { %v12816_v13 = vpop.f32.mrb[180].mxu0 }
 0x988   :  { %v9884_v60 = vpop.f32.mrb[181].mxu0 }
 0x989   :  { %v5128_v55 = vpop.f32.mrb[182].mxu0 }
 0x98a   :  { %v9885_v17 = vpop.f32.mrb[183].mxu0 }
 0x992   :  { %v12818_v44 = vpop.f32.mrb[172].mxu1 }
 0x993   :  { %v10323_v34 = vpack.i.bf16 %v12816_v13, %v12818_v44  ;;  %v9878_v15 = vpop.f32.mrb[173].mxu1  ;;  %v13819_v13 = vld [vmem:[#allocation55_spill] sm:$0xff]  ;;  %v13820_v44 = vld [vmem:[#allocation54_spill] sm:$0xff] }
 0x994   :  { %v5080_v28 = vpop.f32.mrb[174].mxu1 }
 0x995   :  { %v9879_v22 = vpop.f32.mrb[175].mxu1 }
 0x99a   :  { %v12822_v33 = vpop.f32.mrb[176].mxu1 }
 0x99b   :  { %v9890_v37 = vpop.f32.mrb[177].mxu1 }
 0x99c   :  { %v5176_v51 = vpop.f32.mrb[178].mxu1 }
 0x99d   :  { %v9891_v11 = vpop.f32.mrb[179].mxu1  ;;  %v13789_v51 = vld [vmem:[#allocation9_spill] sm:$0xff] }
 0x99e   :  { %v12824_v21 = vpop.f32.mrb[184].mxu0 }
 0x99f   :  { %v10328_v49 = vpack.i.bf16 %v12824_v21, %v12822_v33  ;;  %v9896_v39 = vpop.f32.mrb[185].mxu0  ;;  %v13825_v21 = vld [vmem:[#allocation59_spill] sm:$0xff] }
 0x9a0   :  { %v5224_v59 = vpop.f32.mrb[186].mxu0 }
 0x9a1   :  { %v9897_v46 = vpop.f32.mrb[187].mxu0 }
 0x9a3   :  { %v12828_v43 = vpop.f32.mrb[180].mxu1 }
 0x9a4   :  { %v9902_v40 = vpop.f32.mrb[181].mxu1 }
 0x9a5   :  { %v5272_v42 = vpop.f32.mrb[182].mxu1 }
 0x9a6   :  { %v9903_v50 = vpop.f32.mrb[183].mxu1  ;;  %v12830_v32 = vpop.f32.mrb[188].mxu0 }
 0x9a7   :  { %v10343_v5 = vpack.i.bf16 %v12830_v32, %v12828_v43  ;;  %v9908_v24 = vpop.f32.mrb[189].mxu0 }
 0x9a8   :  { %v5320_v36 = vpop.f32.mrb[190].mxu0 }
 0x9a9   :  { %v9909_v27 = vpop.f32.mrb[191].mxu0 }
 0x9ab   :  { %v12834_v2 = vpop.f32.mrb[184].mxu1 }
 0x9ac   :  { %v9914_v41 = vpop.f32.mrb[185].mxu1 }
 0x9ad   :  { %v5368_v48 = vpop.f32.mrb[186].mxu1 }
 0x9ae   :  { %v9915_v57 = vpop.f32.mrb[187].mxu1  ;;  %v12836_v25 = vpop.f32.mrb[192].mxu0 }
 0x9af   :  { %v10348_v26 = vpack.i.bf16 %v12836_v25, %v12834_v2  ;;  %v9920_v63 = vpop.f32.mrb[193].mxu0 }
 0x9b0   :  { %v5416_v20 = vpop.f32.mrb[194].mxu0 }
 0x9b1   :  { %v9921_v6 = vpop.f32.mrb[195].mxu0 }
 0x9b2   :  { %v13790_v6 = vld [vmem:[#allocation10_spill] sm:$0xff] }
 0x9b3   :  { %v12840_v45 = vpop.f32.mrb[188].mxu1 }
 0x9b4   :  { %v9926_v16 = vpop.f32.mrb[189].mxu1 }
 0x9b5   :  { %v5464_v61 = vpop.f32.mrb[190].mxu1 }
 0x9b6   :  { %v9927_v30 = vpop.f32.mrb[191].mxu1  ;;  %v12842_v53 = vpop.f32.mrb[196].mxu0 }
 0x9b7   :  { %v10368_v3 = vpack.i.bf16 %v12842_v53, %v12840_v45  ;;  %v9932_v38 = vpop.f32.mrb[197].mxu0 }
 0x9b8   :  { %v5512_v23 = vpop.f32.mrb[198].mxu0 }
 0x9b9   :  { %v9933_v18 = vpop.f32.mrb[199].mxu0 }
 0x9bb   :  { %v12846_v52 = vpop.f32.mrb[192].mxu1 }
 0x9bc   :  { %v9938_v10 = vpop.f32.mrb[193].mxu1 }
 0x9bd   :  { %v5560_v58 = vpop.f32.mrb[194].mxu1 }
 0x9be   :  { %v9939_v12 = vpop.f32.mrb[195].mxu1  ;;  %v12848_v9 = vpop.f32.mrb[200].mxu0 }
 0x9bf   :  { %v10378_v7 = vpack.i.bf16 %v12848_v9, %v12846_v52  ;;  %v9944_v62 = vpop.f32.mrb[201].mxu0 }
 0x9c0   :  { %v5608_v35 = vpop.f32.mrb[202].mxu0 }
 0x9c1   :  { %v9945_v47 = vpop.f32.mrb[203].mxu0  ;;  %v13791_v35 = vld [vmem:[#allocation11_spill] sm:$0xff] }
 0x9c3   :  { %v12852_v0 = vpop.f32.mrb[196].mxu1 }
 0x9c4   :  { %v9950_v4 = vpop.f32.mrb[197].mxu1 }
 0x9c5   :  { %v5656_v1 = vpop.f32.mrb[198].mxu1 }
 0x9c6   :  { %v9951_v56 = vpop.f32.mrb[199].mxu1  ;;  %v12854_v8 = vpop.f32.mrb[204].mxu0 }
 0x9c7   :  { %v10408_v14 = vpack.i.bf16 %v12854_v8, %v12852_v0  ;;  %v9956_v29 = vpop.f32.mrb[205].mxu0  ;;  %v13792_v56 = vld [vmem:[#allocation12_spill] sm:$0xff] }
 0x9c8   :  { %v5704_v60 = vpop.f32.mrb[206].mxu0 }
 0x9c9   :  { %v9957_v55 = vpop.f32.mrb[207].mxu0 }
 0x9ec   :  { %v12858_v17 = vpop.f32.mrb[208].mxu0 }
 0x9ed   :  { %v9968_v15 = vpop.f32.mrb[209].mxu0 }
 0x9ee   :  { %v5800_v28 = vpop.f32.mrb[210].mxu0 }
 0x9ef   :  { %v9969_v22 = vpop.f32.mrb[211].mxu0 }
 0x9f0   :  { %v13793_v22 = vld [vmem:[#allocation14_spill] sm:$0xff] }
 0x9f4   :  { %v5897_v37 = vpop.f32.mrb[212].mxu0 }
 0x9f5   :  { %v12861_v11 = vadd.f32 %v5897_v37, %v13789_v51  ;;  %v9980_v39 = vpop.f32.mrb[213].mxu0 }
 0x9f6   :  { %v5900_v59 = vpop.f32.mrb[214].mxu0 }
 0x9f7   :  { %v12863_v46 = vpop.f32.mrb[200].mxu1  ;;  %v9981_v40 = vpop.f32.mrb[215].mxu0  ;;  %v6606_v42 = vsel %vm1353_vm5, %v12861_v11, -inf }
 0x9f8   :  { %v10418_v50 = vpack.i.bf16 %v12858_v17, %v12863_v46  ;;  %v9962_v24 = vpop.f32.mrb[201].mxu1  ;;  %6607 = vmax.xlane.f32.xlu1 %v6606_v42  ;;  %v13794_v42 = vld [vmem:[#allocation13_spill] sm:$0xff]  ;;  %v10459_v17 = vld [vmem:[%s13611_s6] sm:$0xff]   ;;  %v10460_v46 = vld [vmem:[%s13611_s6 + $0x8] sm:$0xff]  }
 0x9f9   :  { %v5752_v36 = vpop.f32.mrb[202].mxu1 }
 0x9fa   :  { %v9963_v27 = vpop.f32.mrb[203].mxu1 }
 0x9fc   :  { %v5997_v41 = vpop.f32.mrb[216].mxu0 }
 0x9fd   :  { %v9992_v48 = vpop.f32.mrb[217].mxu0  ;;  %v12878_v29 = vadd.f32 %v5997_v41, %v13792_v56  ;;  %v13795_v41 = vld [vmem:[#allocation16_spill] sm:$0xff] }
 0x9fe   :  { %v6000_v57 = vpop.f32.mrb[218].mxu0 }
 0x9ff   :  { %v5847_v63 = vpop.f32.mrb[204].mxu1  ;;  %v9993_v20 = vpop.f32.mrb[219].mxu0  ;;  %v6612_v39 = vsel %vm1353_vm5, %v12878_v29, -inf }
 0xa00   :  { %v12870_v16 = vadd.f32 %v5847_v63, %v13790_v6  ;;  %v9974_v61 = vpop.f32.mrb[205].mxu1 }
 0xa01   :  { %v5850_v30 = vpop.f32.mrb[206].mxu1 }
 0xa02   :  { %v9975_v38 = vpop.f32.mrb[207].mxu1  ;;  %v6603_v23 = vsel %vm1353_vm5, %v12870_v16, -inf  ;;  %v13796_v30 = vld [vmem:[#allocation17_spill] sm:$0xff] }
 0xa03   :  { %6604 = vmax.xlane.f32.xlu0 %v6603_v23 }
 0xa04   :  { %v6097_v18 = vpop.f32.mrb[220].mxu0 }
 0xa05   :  { %v10004_v10 = vpop.f32.mrb[221].mxu0  ;;  %v12883_v37 = vadd.f32 %v6097_v18, %v13793_v22 }
 0xa06   :  { %v6100_v58 = vpop.f32.mrb[222].mxu0 }
 0xa07   :  { %v5947_v12 = vpop.f32.mrb[208].mxu1  ;;  %v10005_v62 = vpop.f32.mrb[223].mxu0  ;;  %v6618_v20 = vsel %vm1353_vm5, %v12883_v37, -inf }
 0xa08   :  { %v12875_v47 = vadd.f32 %v5947_v12, %v13791_v35  ;;  %v9986_v4 = vpop.f32.mrb[209].mxu1  ;;  %v13797_v12 = vld [vmem:[#allocation15_spill] sm:$0xff] }
 0xa09   :  { %v5950_v1 = vpop.f32.mrb[210].mxu1 }
 0xa0a   :  { %v9987_v60 = vpop.f32.mrb[211].mxu1  ;;  %v6609_v55 = vsel %vm1353_vm5, %v12875_v47, -inf }
 0xa0b   :  { %6610 = vmax.xlane.f32.xlu0 %v6609_v55 }
 0xa0c   :  { %v6197_v15 = vpop.f32.mrb[224].mxu0 }
 0xa0d   :  { %v10016_v28 = vpop.f32.mrb[225].mxu0  ;;  %v12891_v48 = vadd.f32 %v6197_v15, %v13795_v41  ;;  %v13798_v15 = vld [vmem:[#allocation18_spill] sm:$0xff] }
 0xa0e   :  { %v6200_v51 = vpop.f32.mrb[226].mxu0 }
 0xa0f   :  { %v6047_v59 = vpop.f32.mrb[212].mxu1  ;;  %6613 = vmax.xlane.f32.xlu0 %v6612_v39  ;;  %v10017_v40 = vpop.f32.mrb[227].mxu0  ;;  %v6624_v18 = vsel %vm1353_vm5, %v12891_v48, -inf }
 0xa10   :  { %v12888_v24 = vadd.f32 %v6047_v59, %v13794_v42  ;;  %v9998_v36 = vpop.f32.mrb[213].mxu1  ;;  %v13799_v42 = vld [vmem:[#allocation19_spill] sm:$0xff] }
 0xa11   :  { %v6050_v27 = vpop.f32.mrb[214].mxu1 }
 0xa12   :  { %v9999_v57 = vpop.f32.mrb[215].mxu1  ;;  %v6615_v63 = vsel %vm1353_vm5, %v12888_v24, -inf }
 0xa13   :  { %6616 = vmax.xlane.f32.xlu1 %v6615_v63  ;;  %6619 = vmax.xlane.f32.xlu0 %v6618_v20 }
 0xa14   :  { %v6297_v6 = vpop.f32.mrb[228].mxu0 }
 0xa15   :  { %v10028_v61 = vpop.f32.mrb[229].mxu0  ;;  %v12898_v38 = vadd.f32 %v6297_v6, %v13796_v30  ;;  %v13800_v6 = vld [vmem:[#allocation20_spill] sm:$0xff] }
 0xa16   :  { %v6300_v23 = vpop.f32.mrb[230].mxu0 }
 0xa17   :  { %v6147_v10 = vpop.f32.mrb[216].mxu1  ;;  %6625 = vmax.xlane.f32.xlu0 %v6624_v18  ;;  %v10029_v58 = vpop.f32.mrb[231].mxu0  ;;  %v6630_v60 = vsel %vm1353_vm5, %v12898_v38, -inf }
 0xa18   :  { %v12903_v62 = vadd.f32 %v6147_v10, %v13797_v12  ;;  %v10010_v35 = vpop.f32.mrb[217].mxu1  ;;  %v13801_v12 = vld [vmem:[#allocation22_spill] sm:$0xff] }
 0xa19   :  { %v6150_v4 = vpop.f32.mrb[218].mxu1 }
 0xa1a   :  { %v10011_v1 = vpop.f32.mrb[219].mxu1  ;;  %v6621_v56 = vsel %vm1353_vm5, %v12903_v62, -inf }
 0xa1b   :  { %6622 = vmax.xlane.f32.xlu1 %v6621_v56  ;;  %6631 = vmax.xlane.f32.xlu0 %v6630_v60 }
 0xa1c   :  { %v6397_v55 = vpop.f32.mrb[232].mxu0 }
 0xa1d   :  { %v12910_v28 = vadd.f32 %v6397_v55, %v13798_v15  ;;  %v10040_v22 = vpop.f32.mrb[233].mxu0  ;;  %v13802_v15 = vld [vmem:[#allocation21_spill] sm:$0xff] }
 0xa1e   :  { %v6400_v51 = vpop.f32.mrb[234].mxu0 }
 0xa1f   :  { %v6247_v39 = vpop.f32.mrb[220].mxu1  ;;  %v10041_v59 = vpop.f32.mrb[235].mxu0  ;;  %v6636_v40 = vsel %vm1353_vm5, %v12910_v28, -inf }
 0xa20   :  { %v12915_v36 = vadd.f32 %v6247_v39, %v13799_v42  ;;  %v10022_v27 = vpop.f32.mrb[221].mxu1  ;;  %6637 = vmax.xlane.f32.xlu0 %v6636_v40 }
 0xa21   :  { %v6250_v41 = vpop.f32.mrb[222].mxu1  ;;  %v13803_v27 = vld [vmem:[#allocation23_spill] sm:$0xff] }
 0xa22   :  { %v10023_v57 = vpop.f32.mrb[223].mxu1  ;;  %v6627_v63 = vsel %vm1353_vm5, %v12915_v36, -inf }
 0xa23   :  { %6628 = vmax.xlane.f32.xlu1 %v6627_v63 }
 0xa24   :  { %v6497_v20 = vpop.f32.mrb[236].mxu0 }
 0xa25   :  { %v12920_v61 = vadd.f32 %v6497_v20, %v13800_v6  ;;  %v10052_v30 = vpop.f32.mrb[237].mxu0 }
 0xa26   :  { %v6500_v23 = vpop.f32.mrb[238].mxu0 }
 0xa27   :  { %v6347_v18 = vpop.f32.mrb[224].mxu1  ;;  %v10053_v10 = vpop.f32.mrb[239].mxu0  ;;  %v6642_v58 = vsel %vm1353_vm5, %v12920_v61, -inf  ;;  %v13804_v23 = vld [vmem:[#allocation24_spill] sm:$0xff] }
 0xa28   :  { %v12925_v35 = vadd.f32 %v6347_v18, %v13801_v12  ;;  %v10034_v4 = vpop.f32.mrb[225].mxu1  ;;  %6643 = vmax.xlane.f32.xlu0 %v6642_v58 }
 0xa29   :  { %v6350_v1 = vpop.f32.mrb[226].mxu1 }
 0xa2a   :  { %v10035_v56 = vpop.f32.mrb[227].mxu1  ;;  %v6633_v60 = vsel %vm1353_vm5, %v12925_v35, -inf  ;;  %v13805_v1 = vld [vmem:[#allocation25_spill] sm:$0xff] }
 0xa2b   :  { %6634 = vmax.xlane.f32.xlu1 %v6633_v60  ;;  %v13806_v56 = vld [vmem:[#allocation31_spill] sm:$0xff]  ;;  %v13807_v60 = vld [vmem:[#allocation29_spill] sm:$0xff] }
 0xa2c   :  { %v6597_v55 = vpop.f32.mrb[240].mxu0 }
 0xa2d   :  { %v12930_v22 = vadd.f32 %v6597_v55, %v13802_v15  ;;  %v10064_v51 = vpop.f32.mrb[241].mxu0  ;;  %v12950_v55 = vpop.permute.xlu1 %6891 }
 0xa2e   :  { %v6600_v39 = vpop.f32.mrb[242].mxu0 }
 0xa2f   :  { %v6447_v59 = vpop.f32.mrb[228].mxu1  ;;  %v10065_v40 = vpop.f32.mrb[243].mxu0  ;;  %v6648_v42 = vsel %vm1353_vm5, %v12930_v22, -inf }
 0xa30   :  { %v12935_v41 = vadd.f32 %v6447_v59, %v13803_v27  ;;  %v10046_v57 = vpop.f32.mrb[229].mxu1  ;;  %6649 = vmax.xlane.f32.xlu0 %v6648_v42  ;;  %v12956_v39 = vpop.permute.xlu0 %6939 }
 0xa31   :  { %v6450_v63 = vpop.f32.mrb[230].mxu1  ;;  %v12952_v15 = vpop.permute.xlu1 %6987  ;;  %v6945_v2 = vsel %vm1549_vm3, %v12956_v39, 0 }
 0xa32   :  { %v10047_v20 = vpop.f32.mrb[231].mxu1  ;;  %v6639_v6 = vsel %vm1353_vm5, %v12935_v41, -inf }
 0xa33   :  { %6640 = vmax.xlane.f32.xlu1 %v6639_v6 }
 0xa34   :  { %v12960_v42 = vpop.permute.xlu0 %7035 }
 0xa35   :  { %v12954_v51 = vpop.permute.xlu1 %7083 }
 0xa37   :  { %v6547_v30 = vpop.f32.mrb[232].mxu1 }
 0xa38   :  { %v12940_v18 = vadd.f32 %v6547_v30, %v13804_v23  ;;  %v10058_v10 = vpop.f32.mrb[233].mxu1  ;;  %v12963_v63 = vpop.permute.xlu0 %7131 }
 0xa39   :  { %v6550_v58 = vpop.f32.mrb[234].mxu1  ;;  %v12958_v59 = vpop.permute.xlu1 %7179 }
 0xa3a   :  { %v10059_v12 = vpop.f32.mrb[235].mxu1  ;;  %v6645_v4 = vsel %vm1353_vm5, %v12940_v18, -inf }
 0xa3b   :  { %6646 = vmax.xlane.f32.xlu1 %v6645_v4 }
 0xa46   :  { %7227 = vrot.lane.b32.xlu0 %v13805_v1, %s10878_s27 }
 0xa4c   :  { %7275 = vrot.lane.b32.xlu1 %v13806_v56, %s10878_s27 }
 0xa50   :  { %7323 = vrot.lane.b32.xlu1 %v13807_v60, %s10878_s27 }
 0xa85   :  { %v6608_v40 = vpop.xlane.xlu1 %6607 }
 0xa86   :  { %v6652_v27 = vsub.f32 %v12861_v11, %v6608_v40 }
 0xa88   :  { %v6669_v57 = vmul.f32 1.442695, %v6652_v27 }
 0xa8a   :  { %10657 = vpow2.f32 %v6669_v57 }
 0xa90   :  { %v6605_v20 = vpop.xlane.xlu0 %6604 }
 0xa91   :  { %v6651_v6 = vsub.f32 %v12870_v16, %v6605_v20 }
 0xa93   :  { %v6667_v30 = vmul.f32 1.442695, %v6651_v6 }
 0xa94   :  { %v12966_v23 = vpop.eup %10657 }
 0xa95   :  { %10659 = vpow2.f32 %v6667_v30  ;;  %v6702_v10 = vsel %vm1353_vm5, %v12966_v23, 0.0 }
 0xa96   :  { %6703 = vadd.xlane.f32.xlu0 %v6702_v10 }
 0xa98   :  { %v6611_v58 = vpop.xlane.xlu0 %6610 }
 0xa99   :  { %v6653_v12 = vsub.f32 %v12875_v47, %v6611_v58 }
 0xa9b   :  { %v6671_v4 = vmul.f32 1.442695, %v6653_v12 }
 0xa9c   :  { %v6614_v11 = vpop.xlane.xlu0 %6613 }
 0xa9d   :  { %10661 = vpow2.f32 %v6671_v4  ;;  %v6654_v1 = vsub.f32 %v12878_v29, %v6614_v11 }
 0xa9f   :  { %v12972_v56 = vpop.eup %10659  ;;  %v6673_v60 = vmul.f32 1.442695, %v6654_v1 }
 0xaa0   :  { %v6620_v16 = vpop.xlane.xlu0 %6619  ;;  %v6617_v40 = vpop.xlane.xlu1 %6616  ;;  %v6699_v27 = vsel %vm1353_vm5, %v12972_v56, 0.0 }
 0xaa1   :  { %10663 = vpow2.f32 %v6673_v60  ;;  %v6656_v57 = vsub.f32 %v12883_v37, %v6620_v16  ;;  %v6655_v20 = vsub.f32 %v12888_v24, %v6617_v40  ;;  %6700 = vadd.xlane.f32.xlu1 %v6699_v27 }
 0xaa3   :  { %v6677_v47 = vmul.f32 1.442695, %v6656_v57  ;;  %v6675_v6 = vmul.f32 1.442695, %v6655_v20 }
 0xaa4   :  { %v6626_v30 = vpop.xlane.xlu0 %6625 }
 0xaa5   :  { %10665 = vpow2.f32 %v6677_v47  ;;  %v6658_v29 = vsub.f32 %v12891_v48, %v6626_v30 }
 0xaa6   :  { %10667 = vpow2.f32 %v6675_v6 }
 0xaa7   :  { %v12979_v10 = vpop.eup %10661  ;;  %v6681_v58 = vmul.f32 1.442695, %v6658_v29 }
 0xaa8   :  { %v6632_v12 = vpop.xlane.xlu0 %6631  ;;  %v6623_v4 = vpop.xlane.xlu1 %6622  ;;  %v6705_v11 = vsel %vm1353_vm5, %v12979_v10, 0.0 }
 0xaa9   :  { %10669 = vpow2.f32 %v6681_v58  ;;  %v6660_v37 = vsub.f32 %v12898_v38, %v6632_v12  ;;  %v6657_v24 = vsub.f32 %v12903_v62, %v6623_v4  ;;  %6706 = vadd.xlane.f32.xlu1 %v6705_v11 }
 0xaab   :  { %v12985_v1 = vpop.eup %10663  ;;  %v6685_v60 = vmul.f32 1.442695, %v6660_v37  ;;  %v6679_v16 = vmul.f32 1.442695, %v6657_v24 }
 0xaac   :  { %v6708_v48 = vsel %vm1353_vm5, %v12985_v1, 0.0 }
 0xaad   :  { %10671 = vpow2.f32 %v6685_v60  ;;  %v6638_v40 = vpop.xlane.xlu0 %6637  ;;  %6709 = vadd.xlane.f32.xlu0 %v6708_v48 }
 0xaae   :  { %10673 = vpow2.f32 %v6679_v16  ;;  %v6662_v27 = vsub.f32 %v12910_v28, %v6638_v40 }
 0xaaf   :  { %v12990_v57 = vpop.eup %10665 }
 0xab0   :  { %v12992_v20 = vpop.eup %10667  ;;  %v6689_v38 = vmul.f32 1.442695, %v6662_v27  ;;  %v6629_v62 = vpop.xlane.xlu1 %6628  ;;  %v6714_v47 = vsel %vm1353_vm5, %v12990_v57, 0.0 }
 0xab1   :  { %v6659_v6 = vsub.f32 %v12915_v36, %v6629_v62  ;;  %6715 = vadd.xlane.f32.xlu0 %v6714_v47  ;;  %v6711_v30 = vsel %vm1353_vm5, %v12992_v20, 0.0  ;;  %v13808_v62 = vld [vmem:[#allocation32_spill] sm:$0xff] }
 0xab2   :  { %10675 = vpow2.f32 %v6689_v38  ;;  %6712 = vadd.xlane.f32.xlu1 %v6711_v30 }
 0xab3   :  { %v12999_v29 = vpop.eup %10669  ;;  %v6683_v28 = vmul.f32 1.442695, %v6659_v6  ;;  %v13809_v6 = vld [vmem:[#allocation30_spill] sm:$0xff] }
 0xab4   :  { %v6720_v58 = vsel %vm1353_vm5, %v12999_v29, 0.0 }
 0xab5   :  { %10677 = vpow2.f32 %v6683_v28  ;;  %6721 = vadd.xlane.f32.xlu0 %v6720_v58  ;;  %v6644_v47 = vpop.xlane.xlu0 %6643 }
 0xab6   :  { %v6664_v30 = vsub.f32 %v12920_v61, %v6644_v47 }
 0xab7   :  { %v13003_v12 = vpop.eup %10671 }
 0xab8   :  { %v13005_v4 = vpop.eup %10673  ;;  %v6635_v11 = vpop.xlane.xlu1 %6634  ;;  %v6726_v36 = vsel %vm1353_vm5, %v13003_v12, 0.0  ;;  %v6693_v58 = vmul.f32 1.442695, %v6664_v30 }
 0xab9   :  { %v6661_v37 = vsub.f32 %v12925_v35, %v6635_v11  ;;  %6727 = vadd.xlane.f32.xlu0 %v6726_v36  ;;  %v6717_v24 = vsel %vm1353_vm5, %v13005_v4, 0.0 }
 0xaba   :  { %6718 = vadd.xlane.f32.xlu1 %v6717_v24 }
 0xabb   :  { %v6687_v60 = vmul.f32 1.442695, %v6661_v37 }
 0xabc   :  { %v13012_v16 = vpop.eup %10675 }
 0xabd   :  { %10679 = vpow2.f32 %v6687_v60  ;;  %v6732_v48 = vsel %vm1353_vm5, %v13012_v16, 0.0  ;;  %v6650_v28 = vpop.xlane.xlu0 %6649 }
 0xabe   :  { %6733 = vadd.xlane.f32.xlu0 %v6732_v48  ;;  %v6666_v11 = vsub.f32 %v12930_v22, %v6650_v28  ;;  %10681 = vpow2.f32 %v6693_v58  ;;  %v13810_v28 = vld [vmem:[#allocation26_spill] sm:$0xff]  ;;  %v13811_v58 = vld [vmem:[#allocation49_spill] sm:$0xff] }
 0xabf   :  { %v13016_v40 = vpop.eup %10677 }
 0xac0   :  { %v6723_v27 = vsel %vm1353_vm5, %v13016_v40, 0.0  ;;  %v6697_v36 = vmul.f32 1.442695, %v6666_v11  ;;  %v6641_v37 = vpop.xlane.xlu1 %6640  ;;  %v13812_v11 = vpack.i.bf16 %v13810_v28, %v13811_v58 }
 0xac1   :  { %6724 = vadd.xlane.f32.xlu1 %v6723_v27  ;;  %v6663_v24 = vsub.f32 %v12935_v41, %v6641_v37  ;;  %v13814_v37 = vld [vmem:[#allocation50_spill] sm:$0xff] }
 0xac2   :  { %10683 = vpow2.f32 %v6697_v36  ;;  %v13813_v36 = vld [vmem:[#allocation51_spill] sm:$0xff] }
 0xac3   :  { %v6691_v48 = vmul.f32 1.442695, %v6663_v24  ;;  %v13815_v24 = vpack.i.bf16 %v13813_v36, %v13814_v37  ;;  %v6897_v36 = vsel %vm1549_vm3, %v12950_v55, 0  ;;  %v6993_v55 = vsel %vm1549_vm3, %v12952_v15, 0 }
 0xac5   :  { %10685 = vpow2.f32 %v6691_v48 }
 0xac7   :  { %v13020_v35 = vpop.eup %10679 }
 0xac8   :  { %v6729_v38 = vsel %vm1353_vm5, %v13020_v35, 0.0  ;;  %v6647_v60 = vpop.xlane.xlu1 %6646 }
 0xac9   :  { %6730 = vadd.xlane.f32.xlu1 %v6729_v38  ;;  %v6665_v27 = vsub.f32 %v12940_v18, %v6647_v60  ;;  %v13032_v38 = vpop.eup %10681  ;;  %v13817_v60 = vld [vmem:[#allocation52_spill] sm:$0xff] }
 0xaca   :  { %v6738_v61 = vsel %vm1353_vm5, %v13032_v38, 0.0 }
 0xacc   :  { %v13036_v47 = vpop.eup %10683  ;;  %v13090_v33 = vpop.permute.xlu1 %7275 }
 0xacd   :  { %v6744_v22 = vsel %vm1353_vm5, %v13036_v47, 0.0 }
 0xacf   :  { %v13040_v41 = vpop.eup %10685 }
 0xad0   :  { %v6735_v18 = vsel %vm1353_vm5, %v13040_v41, 0.0  ;;  %v13096_v32 = vpop.permute.xlu1 %7323 }
 0xad4   :  { %7371 = vrot.lane.b32.xlu0 %v13808_v62, %s10878_s27  ;;  %v6695_v62 = vmul.f32 1.442695, %v6665_v27  ;;  %v13822_v27 = vld [vmem:[#allocation57_spill] sm:$0xff] }
 0xad6   :  { %10687 = vpow2.f32 %v6695_v62  ;;  %v13823_v62 = vld [vmem:[#allocation56_spill] sm:$0xff] }
 0xada   :  { %7419 = vrot.lane.b32.xlu1 %v13809_v6, %s10878_s27 }
 0xae0   :  { %v13044_v6 = vpop.eup %10687 }
 0xae1   :  { %v6741_v30 = vsel %vm1353_vm5, %v13044_v6, 0.0 }
 0xaf3   :  { %6739 = vadd.xlane.f32.xlu0 %v6738_v61  ;;  %v13824_v61 = vpack.i.bf16 %v13822_v27, %v13823_v62  ;;  %v7041_v62 = vsel %vm1549_vm3, %v12960_v42, 0 }
 0xaf7   :  { %6745 = vadd.xlane.f32.xlu0 %v6744_v22 }
 0xafe   :  { %6736 = vadd.xlane.f32.xlu1 %v6735_v18 }
 0xb02   :  { %6742 = vadd.xlane.f32.xlu1 %v6741_v30 }
 0xb0d   :  { %7467 = vrot.lane.b32.xlu0 %v11708_v31, %s10878_s27  ;;  %v13816_v31 = vld [vmem:[#allocation53_spill] sm:$0xff] }
 0xb0e   :  { %v13818_v48 = vpack.i.bf16 %v13816_v31, %v13817_v60 }
 0xb11   :  { %10314 = vrot.lane.b32.xlu0 %v13812_v11, %s10877_s26 }
 0xb13   :  { %7515 = vrot.lane.b32.xlu1 %v11651_v19, %s10878_s27  ;;  %v13076_v19 = vpop.permute.xlu0 %7227 }
 0xb15   :  { %10324 = vrot.lane.b32.xlu0 %v10323_v34, %s10875_s24  ;;  %v13821_v34 = vpack.i.bf16 %v13819_v13, %v13820_v44 }
 0xb17   :  { %10319 = vrot.lane.b32.xlu1 %v13815_v24, %s10877_s26 }
 0xb19   :  { %10334 = vrot.lane.b32.xlu0 %v13818_v48, %s10877_s26 }
 0xb1b   :  { %10329 = vrot.lane.b32.xlu1 %v10328_v49, %s10875_s24  ;;  %v13826_v49 = vld [vmem:[#allocation58_spill] sm:$0xff] }
 0xb1c   :  { %v13827_v43 = vpack.i.bf16 %v13825_v21, %v13826_v49  ;;  %v7089_v49 = vsel %vm1549_vm3, %v12954_v51, 0 }
 0xb1d   :  { %10344 = vrot.lane.b32.xlu0 %v10343_v5, %s10875_s24 }
 0xb1f   :  { %10339 = vrot.lane.b32.xlu1 %v13821_v34, %s10877_s26 }
 0xb21   :  { %10354 = vrot.lane.b32.xlu0 %v13824_v61, %s10877_s26 }
 0xb23   :  { %v6704_v22 = vpop.xlane.xlu0 %6703  ;;  %10349 = vrot.lane.b32.xlu1 %v10348_v26, %s10875_s24 }
 0xb24   :  { %10689 = vrcp.f32 %v6704_v22 }
 0xb27   :  { %10359 = vrot.lane.b32.xlu1 %v13827_v43, %s10877_s26  ;;  %v7137_v43 = vsel %vm1549_vm3, %v12963_v63, 0 }
 0xb2e   :  { %v10690_v5 = vpop.eup %10689  ;;  %v6701_v18 = vpop.xlane.xlu1 %6700 }
 0xb2f   :  { %v6764_v30 = vmul.f32 %v10690_v5, %v12966_v23  ;;  %10691 = vrcp.f32 %v6701_v18 }
 0xb31   :  { %v6780_v28 = vpack.c.bf16 %v6764_v30, %v6764_v30 }
 0xb33   :  { %10075 = vmatmul.mubr.msk.bf16.vlgmr.msra.gmra.mrb[244].mxu0 %vm1353_vm5, %v6780_v28 }
 0xb34   :  { %10085 = vmatpush3.bf16.msra.mxu0 %v6945_v2  ;;  %10086 = vmatprep.mubr.msk.bf16.mxu0 %vm10870_vm1, %v13709_v54  ;;  %v7185_v2 = vsel %vm1549_vm3, %v12958_v59, 0 }
 0xb35   :  { %10096 = vmatprep.subr.bf16.mxu0 %v13709_v54 }
 0xb36   :  { %v6707_v25 = vpop.xlane.xlu1 %6706 }
 0xb37   :  { %10693 = vrcp.f32 %v6707_v25 }
 0xb39   :  { %v10692_v26 = vpop.eup %10691 }
 0xb3a   :  { %v6763_v58 = vmul.f32 %v10692_v26, %v12972_v56  ;;  %v6710_v11 = vpop.xlane.xlu0 %6709 }
 0xb3b   :  { %10695 = vrcp.f32 %v6710_v11  ;;  %v7281_v11 = vsel %vm1549_vm3, %v13090_v33, 0 }
 0xb3c   :  { %v6779_v23 = vpack.c.bf16 %v6763_v58, %v6763_v58 }
 0xb3e   :  { %v6716_v39 = vpop.xlane.xlu0 %6715  ;;  %10069 = vmatmul.mubr.msk.bf16.vlgmr.msra.gmra.mrb[236].mxu1 %vm1353_vm5, %v6779_v23 }
 0xb3f   :  { %10697 = vrcp.f32 %v6716_v39  ;;  %10079 = vmatpush3.bf16.msra.mxu1 %v6897_v36  ;;  %v6713_v37 = vpop.xlane.xlu1 %6712  ;;  %10080 = vmatprep.mubr.msk.bf16.mxu1 %vm10870_vm1, %v13709_v54 }
 0xb40   :  { %10699 = vrcp.f32 %v6713_v37  ;;  %10090 = vmatprep.subr.bf16.mxu1 %v13709_v54 }
 0xb41   :  { %v10694_v24 = vpop.eup %10693 }
 0xb42   :  { %v6765_v56 = vmul.f32 %v10694_v24, %v12979_v10  ;;  %v6722_v31 = vpop.xlane.xlu0 %6721 }
 0xb43   :  { %10701 = vrcp.f32 %v6722_v31 }
 0xb44   :  { %v6781_v60 = vpack.c.bf16 %v6765_v56, %v6765_v56 }
 0xb45   :  { %v10696_v48 = vpop.eup %10695 }
 0xb46   :  { %v6766_v13 = vmul.f32 %v10696_v48, %v12985_v1  ;;  %10081 = vmatmul.mubr.msk.bf16.vlgmr.msra.gmra.mrb[240].mxu1 %vm1353_vm5, %v6781_v60  ;;  %v6728_v1 = vpop.xlane.xlu0 %6727 }
 0xb47   :  { %10091 = vmatpush3.bf16.msra.mxu1 %v6993_v55  ;;  %v6719_v44 = vpop.xlane.xlu1 %6718  ;;  %10092 = vmatprep.mubr.msk.bf16.mxu1 %vm10870_vm1, %v13709_v54 }
 0xb48   :  { %10703 = vrcp.f32 %v6719_v44  ;;  %v6782_v34 = vpack.c.bf16 %v6766_v13, %v6766_v13  ;;  %10102 = vmatprep.subr.bf16.mxu1 %v13709_v54 }
 0xb49   :  { %v10698_v10 = vpop.eup %10697  ;;  %10705 = vrcp.f32 %v6728_v1 }
 0xb4a   :  { %v10700_v27 = vpop.eup %10699  ;;  %10087 = vmatmul.mubr.msk.bf16.vlgmr.msra.gmra.mrb[248].mxu0 %vm1353_vm5, %v6782_v34  ;;  %v6768_v61 = vmul.f32 %v10698_v10, %v12990_v57 }
 0xb4b   :  { %v6767_v15 = vmul.f32 %v10700_v27, %v12992_v20  ;;  %10097 = vmatpush3.bf16.msra.mxu0 %v7041_v62  ;;  %10098 = vmatprep.mubr.msk.bf16.mxu0 %vm10870_vm1, %v13709_v54  ;;  %v6734_v51 = vpop.xlane.xlu0 %6733 }
 0xb4c   :  { %10108 = vmatprep.subr.bf16.mxu0 %v13709_v54  ;;  %v6784_v42 = vpack.c.bf16 %v6768_v61, %v6768_v61 }
 0xb4d   :  { %v6783_v22 = vpack.c.bf16 %v6767_v15, %v6767_v15  ;;  %v10702_v20 = vpop.eup %10701 }
 0xb4e   :  { %v6725_v21 = vpop.xlane.xlu1 %6724  ;;  %v6770_v18 = vmul.f32 %v10702_v20, %v12999_v29  ;;  %v7233_v29 = vsel %vm1549_vm3, %v13076_v19, 0 }
 0xb4f   :  { %10093 = vmatmul.mubr.msk.bf16.vlgmr.msra.gmra.mrb[244].mxu1 %vm1353_vm5, %v6783_v22  ;;  %10707 = vrcp.f32 %v6725_v21  ;;  %v7372_v39 = vpop.permute.xlu0 %7371 }
 0xb50   :  { %10103 = vmatpush3.bf16.msra.mxu1 %v7089_v49  ;;  %10104 = vmatprep.mubr.msk.bf16.mxu1 %vm10870_vm1, %v13709_v54  ;;  %10709 = vrcp.f32 %v6734_v51  ;;  %v7377_v24 = vsel %vm1549_vm3, %v7372_v39, 0  ;;  %v10456_v51 = vld [vmem:[%s13609_s4 + $0x8] sm:$0xff]  }
 0xb51   :  { %10114 = vmatprep.subr.bf16.mxu1 %v13709_v54 }
 0xb52   :  { %v10704_v57 = vpop.eup %10703  ;;  %10099 = vmatmul.mubr.msk.bf16.vlgmr.msra.gmra.mrb[252].mxu0 %vm1353_vm5, %v6784_v42 }
 0xb53   :  { %v6769_v5 = vmul.f32 %v10704_v57, %v13005_v4  ;;  %10109 = vmatpush3.bf16.msra.mxu0 %v7137_v43  ;;  %10110 = vmatprep.mubr.msk.bf16.mxu0 %vm10870_vm1, %v13709_v54  ;;  %v10706_v63 = vpop.eup %10705  ;;  %v6786_v4 = vpack.c.bf16 %v6770_v18, %v6770_v18  ;;  %v10455_v43 = vld [vmem:[%s13609_s4] sm:$0xff]  }
 0xb54   :  { %10120 = vmatprep.subr.bf16.mxu0 %v13709_v54  ;;  %v6772_v59 = vmul.f32 %v10706_v63, %v13003_v12  ;;  %v7329_v12 = vsel %vm1549_vm3, %v13096_v32, 0  ;;  %v10458_v63 = vld [vmem:[%s13609_s4 + $0x18] sm:$0xff]  }
 0xb55   :  { %v6785_v30 = vpack.c.bf16 %v6769_v5, %v6769_v5 }
 0xb56   :  { %v6731_v28 = vpop.xlane.xlu1 %6730  ;;  %v6788_v19 = vpack.c.bf16 %v6772_v59, %v6772_v59 }
 0xb57   :  { %10105 = vmatmul.mubr.msk.bf16.vlgmr.msra.gmra.mrb[248].mxu1 %vm1353_vm5, %v6785_v30  ;;  %10711 = vrcp.f32 %v6731_v28 }
 0xb58   :  { %10115 = vmatpush3.bf16.msra.mxu1 %v7185_v2  ;;  %10116 = vmatprep.mubr.msk.bf16.mxu1 %vm10870_vm1, %v13709_v54 }
 0xb59   :  { %v10708_v25 = vpop.eup %10707  ;;  %10126 = vmatprep.subr.bf16.mxu1 %v13709_v54 }
 0xb5a   :  { %v6771_v26 = vmul.f32 %v10708_v25, %v13016_v40  ;;  %10111 = vmatmul.mubr.msk.bf16.vlgmr.msra.gmra.mrb[0].mxu0 %vm1353_vm5, %v6786_v4  ;;  %v10710_v23 = vpop.eup %10709  ;;  %v7420_v56 = vpop.permute.xlu1 %7419 }
 0xb5b   :  { %10121 = vmatpush3.bf16.msra.mxu0 %v7233_v29  ;;  %10122 = vmatprep.mubr.msk.bf16.mxu0 %vm10870_vm1, %v13709_v54  ;;  %v6774_v33 = vmul.f32 %v10710_v23, %v13012_v16 }
 0xb5c   :  { %v6787_v58 = vpack.c.bf16 %v6771_v26, %v6771_v26  ;;  %10132 = vmatprep.subr.bf16.mxu0 %v13709_v54 }
 0xb5d   :  { %v6790_v32 = vpack.c.bf16 %v6774_v33, %v6774_v33 }
 0xb5f   :  { %10117 = vmatmul.mubr.msk.bf16.vlgmr.msra.gmra.mrb[252].mxu1 %vm1353_vm5, %v6787_v58 }
 0xb60   :  { %10127 = vmatpush3.bf16.msra.mxu1 %v7281_v11  ;;  %10128 = vmatprep.mubr.msk.bf16.mxu1 %vm10870_vm1, %v13709_v54 }
 0xb61   :  { %v10712_v40 = vpop.eup %10711  ;;  %10138 = vmatprep.subr.bf16.mxu1 %v13709_v54 }
 0xb62   :  { %v6773_v36 = vmul.f32 %v10712_v40, %v13020_v35  ;;  %10123 = vmatmul.mubr.msk.bf16.vlgmr.msra.gmra.mrb[4].mxu0 %vm1353_vm5, %v6788_v19  ;;  %v7425_v35 = vsel %vm1549_vm3, %v7420_v56, 0 }
 0xb63   :  { %10133 = vmatpush3.bf16.msra.mxu0 %v7329_v12  ;;  %10134 = vmatprep.mubr.msk.bf16.mxu0 %vm10870_vm1, %v13709_v54 }
 0xb64   :  { %v6789_v37 = vpack.c.bf16 %v6773_v36, %v6773_v36  ;;  %10144 = vmatprep.subr.bf16.mxu0 %v13709_v54 }
 0xb67   :  { %10129 = vmatmul.mubr.msk.bf16.vlgmr.msra.gmra.mrb[0].mxu1 %vm1353_vm5, %v6789_v37 }
 0xb68   :  { %10139 = vmatpush3.bf16.msra.mxu1 %v7377_v24  ;;  %10140 = vmatprep.mubr.msk.bf16.mxu1 %vm10870_vm1, %v13709_v54 }
 0xb69   :  { %10150 = vmatprep.subr.bf16.mxu1 %v13709_v54 }
 0xb6a   :  { %10135 = vmatmul.mubr.msk.bf16.vlgmr.msra.gmra.mrb[8].mxu0 %vm1353_vm5, %v6790_v32 }
 0xb6b   :  { %10145 = vmatpush3.bf16.msra.mxu0 %v7425_v35  ;;  %10146 = vmatprep.mubr.msk.bf16.mxu0 %vm10870_vm1, %v13709_v54  ;;  %v13828_v35 = vld [vmem:[#allocation61_spill] sm:$0xff] }
 0xb6c   :  { %10156 = vmatprep.subr.bf16.mxu0 %v13709_v54 }
 0xb80   :  { %v6740_v16 = vpop.xlane.xlu0 %6739 }
 0xb81   :  { %10713 = vrcp.f32 %v6740_v16  ;;  %v13829_v16 = vld [vmem:[#allocation60_spill] sm:$0xff] }
 0xb84   :  { %v6746_v31 = vpop.xlane.xlu0 %6745 }
 0xb85   :  { %10715 = vrcp.f32 %v6746_v31  ;;  %v13830_v31 = vpack.i.bf16 %v13828_v35, %v13829_v16  ;;  %v13835_v16 = vld [vmem:[#allocation34_spill] sm:$0xff] }
 0xb88   :  { %v7468_v61 = vpop.permute.xlu0 %7467 }
 0xb89   :  { %v7473_v49 = vsel %vm1549_vm3, %v7468_v61, 0 }
 0xb8b   :  { %v10714_v60 = vpop.eup %10713  ;;  %v6737_v48 = vpop.xlane.xlu1 %6736 }
 0xb8c   :  { %v6776_v55 = vmul.f32 %v10714_v60, %v13032_v38  ;;  %10717 = vrcp.f32 %v6737_v48 }
 0xb8e   :  { %v6792_v13 = vpack.c.bf16 %v6776_v55, %v6776_v55 }
 0xb8f   :  { %v10716_v44 = vpop.eup %10715  ;;  %v6743_v34 = vpop.xlane.xlu1 %6742 }
 0xb90   :  { %10719 = vrcp.f32 %v6743_v34  ;;  %10147 = vmatmul.mubr.msk.bf16.vlgmr.msra.gmra.mrb[12].mxu0 %vm1353_vm5, %v6792_v13  ;;  %v6778_v10 = vmul.f32 %v10716_v44, %v13036_v47 }
 0xb91   :  { %10158 = vmatprep.mubr.msk.bf16.mxu0 %vm10870_vm1, %v13709_v54 }
 0xb92   :  { %v6794_v1 = vpack.c.bf16 %v6778_v10, %v6778_v10  ;;  %v13831_v10 = vld [vmem:[#allocation62_spill] sm:$0xff] }
 0xb93   :  { %v7516_v27 = vpop.permute.xlu1 %7515 }
 0xb94   :  { %v7521_v62 = vsel %vm1549_vm3, %v7516_v27, 0  ;;  %v13832_v27 = vld [vmem:[#allocation63_spill] sm:$0xff] }
 0xb95   :  { %10157 = vmatpush3.bf16.msra.mxu0 %v7521_v62  ;;  %v13833_v62 = vpack.i.bf16 %v13831_v10, %v13832_v27 }
 0xb96   :  { %v10718_v15 = vpop.eup %10717  ;;  %10186 = vmatprep.subr.bf16.mxu0 %v10459_v17 }
 0xb97   :  { %v6775_v38 = vmul.f32 %v10718_v15, %v13040_v41 }
 0xb98   :  { %10159 = vmatmul.mubr.msk.bf16.vlgmr.msra.gmra.mrb[16].mxu0 %vm1353_vm5, %v6794_v1 }
 0xb99   :  { %v6791_v22 = vpack.c.bf16 %v6775_v38, %v6775_v38  ;;  %10187 = vmatpush3.bf16.msra.mxu0 %v10459_v17 }
 0xb9a   :  { %v10720_v21 = vpop.eup %10719  ;;  %10188 = vmatprep.subr.bf16.mxu0 %v10460_v46 }
 0xb9b   :  { %10141 = vmatmul.mubr.msk.bf16.vlgmr.msra.gmra.mrb[4].mxu1 %vm1353_vm5, %v6791_v22  ;;  %v6777_v47 = vmul.f32 %v10720_v21, %v13044_v6 }
 0xb9c   :  { %10151 = vmatpush3.bf16.msra.mxu1 %v7473_v49  ;;  %10152 = vmatprep.mubr.msk.bf16.mxu1 %vm10870_vm1, %v13709_v54  ;;  %v10457_v54 = vld [vmem:[%s13609_s4 + $0x10] sm:$0xff]  }
 0xb9d   :  { %v6793_v42 = vpack.c.bf16 %v6777_v47, %v6777_v47  ;;  %10162 = vmatprep.subr.bf16.mxu1 %v10455_v43  ;;  %10189 = vmatpush3.bf16.msra.mxu0 %v10460_v46 }
 0xba3   :  { %10153 = vmatmul.mubr.msk.bf16.vlgmr.msra.gmra.mrb[8].mxu1 %vm1353_vm5, %v6793_v42 }
 0xba4   :  { %10163 = vmatpush3.bf16.msra.mxu1 %v10455_v43 }
 0xba5   :  { %10164 = vmatprep.subr.bf16.mxu1 %v10456_v51 }
 0xba8   :  { %10165 = vmatpush3.bf16.msra.mxu1 %v10456_v51 }
 0xba9   :  { %10166 = vmatprep.subr.bf16.mxu1 %v10457_v54 }
 0xbac   :  { %10167 = vmatpush3.bf16.msra.mxu1 %v10457_v54 }
 0xbad   :  { %10168 = vmatprep.subr.bf16.mxu1 %v10458_v63 }
 0xbb0   :  { %10169 = vmatpush3.bf16.msra.mxu1 %v10458_v63 }
 0xc06   :  { %v6885_v20 = vpop.f32.mrb[244].mxu0 }
 0xc07   :  { %v10076_v41 = vpop.f32.mrb[245].mxu0 }
 0xc08   :  { %v6888_v57 = vpop.f32.mrb[246].mxu0 }
 0xc09   :  { %v10077_v5 = vpop.f32.mrb[247].mxu0 }
 0xc11   :  { %v6837_v6 = vpop.f32.mrb[236].mxu1 }
 0xc12   :  { %v10363_v18 = vpack.i.bf16 %v6885_v20, %v6837_v6  ;;  %v10070_v30 = vpop.f32.mrb[237].mxu1 }
 0xc13   :  { %v6840_v28 = vpop.f32.mrb[238].mxu1 }
 0xc14   :  { %10364 = vrot.lane.b32.xlu0 %v10363_v18, %s10873_s1  ;;  %v10071_v2 = vpop.f32.mrb[239].mxu1  ;;  %v10315_v28 = vpop.permute.xlu0 %10314 }
 0xc18   :  { %10369 = vrot.lane.b32.xlu0 %v10368_v3, %s10875_s24 }
 0xc19   :  { %v6933_v4 = vpop.f32.mrb[240].mxu1 }
 0xc1a   :  { %v10082_v25 = vpop.f32.mrb[241].mxu1 }
 0xc1b   :  { %v6936_v29 = vpop.f32.mrb[242].mxu1 }
 0xc1c   :  { %v10083_v26 = vpop.f32.mrb[243].mxu1 }
 0xc1d   :  { %v6981_v59 = vpop.f32.mrb[248].mxu0 }
 0xc1e   :  { %v10373_v58 = vpack.i.bf16 %v6981_v59, %v6933_v4  ;;  %v10088_v11 = vpop.f32.mrb[249].mxu0  ;;  %v10325_v4 = vpop.permute.xlu0 %10324 }
 0xc1f   :  { %v6984_v23 = vpop.f32.mrb[250].mxu0 }
 0xc20   :  { %v10089_v19 = vpop.f32.mrb[251].mxu0  ;;  %10374 = vrot.lane.b32.xlu1 %v10373_v58, %s10873_s1  ;;  %v10320_v58 = vpop.permute.xlu1 %10319 }
 0xc21   :  { %v10322_v10 = vunpack.i.h.bf16 %v10320_v58  ;;  %v10321_v27 = vunpack.i.l.bf16 %v10320_v58 }
 0xc22   :  { %v7029_v40 = vpop.f32.mrb[244].mxu1 }
 0xc23   :  { %v10094_v12 = vpop.f32.mrb[245].mxu1 }
 0xc24   :  { %v7032_v36 = vpop.f32.mrb[246].mxu1  ;;  %10379 = vrot.lane.b32.xlu1 %v10378_v7, %s10875_s24 }
 0xc25   :  { %v10095_v45 = vpop.f32.mrb[247].mxu1  ;;  %v7077_v53 = vpop.f32.mrb[252].mxu0 }
 0xc26   :  { %v10383_v3 = vpack.i.bf16 %v7077_v53, %v7029_v40  ;;  %v10100_v33 = vpop.f32.mrb[253].mxu0  ;;  %v10330_v45 = vpop.permute.xlu1 %10329 }
 0xc27   :  { %v7080_v39 = vpop.f32.mrb[254].mxu0  ;;  %v10317_v33 = vunpack.i.h.bf16 %v10315_v28 }
 0xc28   :  { %v10101_v37 = vpop.f32.mrb[255].mxu0  ;;  %10384 = vrot.lane.b32.xlu0 %v10383_v3, %s10873_s1  ;;  %v10316_v39 = vunpack.i.l.bf16 %v10315_v28  ;;  %v13838_v28 = vld [vmem:[#allocation38_spill] sm:$0xff] }
 0xc29   :  { %v10327_v37 = vunpack.i.h.bf16 %v10325_v4 }
 0xc2a   :  { %v7125_v24 = vpop.f32.mrb[248].mxu1  ;;  %v10340_v3 = vpop.permute.xlu1 %10339 }
 0xc2b   :  { %v10106_v56 = vpop.f32.mrb[249].mxu1  ;;  %v10342_v46 = vunpack.i.h.bf16 %v10340_v3 }
 0xc2c   :  { %v7128_v32 = vpop.f32.mrb[250].mxu1  ;;  %10389 = vrot.lane.b32.xlu0 %v13830_v31, %s10877_s26  ;;  %v7755_v31 = vsel %vm586_vm2, %v13835_v16, %v10316_v39 }
 0xc2d   :  { %v10107_v60 = vpop.f32.mrb[251].mxu1  ;;  %v7173_v48 = vpop.f32.mrb[0].mxu0  ;;  %v13834_v32 = vld [vmem:[#allocation33_spill] sm:$0xff] }
 0xc2e   :  { %v10393_v52 = vpack.i.bf16 %v7173_v48, %v7125_v24  ;;  %v10112_v9 = vpop.f32.mrb[1].mxu0  ;;  %v10326_v24 = vunpack.i.l.bf16 %v10325_v4  ;;  %v7756_v35 = vsel %vm586_vm2, %v13834_v32, %v10317_v33 }
 0xc2f   :  { %v7176_v7 = vpop.f32.mrb[2].mxu0  ;;  %v7773_v9 = vsel %vm7771_vm7, %v7756_v35, %v10327_v37 }
 0xc30   :  { %v10113_v55 = vpop.f32.mrb[3].mxu0  ;;  %10394 = vrot.lane.b32.xlu1 %v10393_v52, %s10873_s1  ;;  %v7772_v52 = vsel %vm7771_vm7, %v7755_v31, %v10326_v24  ;;  %v10350_v7 = vpop.permute.xlu1 %10349 }
 0xc31   :  { %v10352_v58 = vunpack.i.h.bf16 %v10350_v7 }
 0xc32   :  { %v7221_v13 = vpop.f32.mrb[252].mxu1 }
 0xc33   :  { %v10118_v44 = vpop.f32.mrb[253].mxu1 }
 0xc34   :  { %v7224_v34 = vpop.f32.mrb[254].mxu1  ;;  %10399 = vrot.lane.b32.xlu1 %v13833_v62, %s10877_s26  ;;  %v10332_v62 = vunpack.i.h.bf16 %v10330_v45 }
 0xc35   :  { %v10119_v15 = vpop.f32.mrb[255].mxu1  ;;  %v7269_v1 = vpop.f32.mrb[4].mxu0 }
 0xc36   :  { %v10403_v38 = vpack.i.bf16 %v7269_v1, %v7221_v13  ;;  %v10124_v61 = vpop.f32.mrb[5].mxu0  ;;  %v13255_v34 = vpop.permute.xlu1 %10359  ;;  %v10331_v15 = vunpack.i.l.bf16 %v10330_v45 }
 0xc37   :  { %v7272_v22 = vpop.f32.mrb[6].mxu0 }
 0xc38   :  { %v10125_v21 = vpop.f32.mrb[7].mxu0  ;;  %10404 = vrot.lane.b32.xlu0 %v10403_v38, %s10873_s1  ;;  %v13836_v38 = vld [vmem:[#allocation36_spill] sm:$0xff]  ;;  %v13837_v22 = vld [vmem:[#allocation35_spill] sm:$0xff] }
 0xc39   :  { %v7758_v61 = vsel %vm586_vm2, %v13836_v38, %v10322_v10  ;;  %v7757_v21 = vsel %vm586_vm2, %v13837_v22, %v10321_v27  ;;  %v10362_v38 = vunpack.i.h.bf16 %v13255_v34 }
 0xc3a   :  { %v7317_v49 = vpop.f32.mrb[0].mxu1 }
 0xc3b   :  { %v10130_v47 = vpop.f32.mrb[1].mxu1 }
 0xc3c   :  { %v7320_v42 = vpop.f32.mrb[2].mxu1  ;;  %10409 = vrot.lane.b32.xlu0 %v10408_v14, %s10875_s24 }
 0xc3d   :  { %v10131_v20 = vpop.f32.mrb[3].mxu1  ;;  %v7365_v41 = vpop.f32.mrb[8].mxu0  ;;  %v7774_v42 = vsel %vm7771_vm7, %v7757_v21, %v10331_v15 }
 0xc3e   :  { %v10413_v57 = vpack.i.bf16 %v7365_v41, %v7317_v49  ;;  %v10136_v43 = vpop.f32.mrb[9].mxu0  ;;  %v7775_v20 = vsel %vm7771_vm7, %v7758_v61, %v10332_v62  ;;  %v10361_v61 = vunpack.i.l.bf16 %v13255_v34 }
 0xc3f   :  { %v7368_v5 = vpop.f32.mrb[10].mxu0 }
 0xc40   :  { %v10137_v51 = vpop.f32.mrb[11].mxu0  ;;  %10414 = vrot.lane.b32.xlu1 %v10413_v57, %s10873_s1 }
 0xc44   :  { %10419 = vrot.lane.b32.xlu1 %v10418_v50, %s10875_s24  ;;  %v10335_v50 = vpop.permute.xlu0 %10334 }
 0xc45   :  { %v10337_v51 = vunpack.i.h.bf16 %v10335_v50 }
 0xc48   :  { %v10345_v36 = vpop.permute.xlu0 %10344 }
 0xc4c   :  { %v13244_v53 = vpop.permute.xlu0 %10354 }
 0xc4d   :  { %v10357_v35 = vunpack.i.h.bf16 %v13244_v53  ;;  %v10356_v16 = vunpack.i.l.bf16 %v13244_v53 }
 0xc63   :  { %v7461_v54 = vpop.f32.mrb[12].mxu0 }
 0xc64   :  { %v10148_v6 = vpop.f32.mrb[13].mxu0 }
 0xc65   :  { %v7464_v18 = vpop.f32.mrb[14].mxu0  ;;  %v10347_v6 = vunpack.i.h.bf16 %v10345_v36 }
 0xc66   :  { %v10149_v30 = vpop.f32.mrb[15].mxu0  ;;  %v10346_v18 = vunpack.i.l.bf16 %v10345_v36 }
 0xc6b   :  { %v7557_v0 = vpop.f32.mrb[16].mxu0 }
 0xc6c   :  { %v10160_v8 = vpop.f32.mrb[17].mxu0 }
 0xc6d   :  { %v7560_v14 = vpop.f32.mrb[18].mxu0  ;;  %v13839_v8 = vld [vmem:[#allocation37_spill] sm:$0xff] }
 0xc6e   :  { %v7413_v2 = vpop.f32.mrb[4].mxu1  ;;  %v10161_v63 = vpop.f32.mrb[19].mxu0 }
 0xc6f   :  { %v10423_v25 = vpack.i.bf16 %v7461_v54, %v7413_v2  ;;  %v10142_v29 = vpop.f32.mrb[5].mxu1  ;;  %v10336_v54 = vunpack.i.l.bf16 %v10335_v50  ;;  %v10341_v50 = vunpack.i.l.bf16 %v10340_v3 }
 0xc70   :  { %v7416_v26 = vpop.f32.mrb[6].mxu1 }
 0xc71   :  { %10424 = vrot.lane.b32.xlu0 %v10423_v25, %s10873_s1  ;;  %v10143_v59 = vpop.f32.mrb[7].mxu1  ;;  %v7759_v14 = vsel %vm586_vm2, %v13839_v8, %v10336_v54 }
 0xc72   :  { %v7776_v4 = vsel %vm7771_vm7, %v7759_v14, %v10346_v18 }
 0xc76   :  { %v7509_v11 = vpop.f32.mrb[8].mxu1 }
 0xc77   :  { %v10428_v23 = vpack.i.bf16 %v7557_v0, %v7509_v11  ;;  %v10154_v19 = vpop.f32.mrb[9].mxu1  ;;  %v7760_v0 = vsel %vm586_vm2, %v13838_v28, %v10337_v51  ;;  %v10351_v11 = vunpack.i.l.bf16 %v10350_v7  ;;  %v13843_v7 = vld [vmem:[#allocation45_spill] sm:$0xff] }
 0xc78   :  { %v7512_v40 = vpop.f32.mrb[10].mxu1  ;;  %v7777_v25 = vsel %vm7771_vm7, %v7760_v0, %v10347_v6  ;;  %v13840_v19 = vld [vmem:[#allocation40_spill] sm:$0xff] }
 0xc79   :  { %v10155_v12 = vpop.f32.mrb[11].mxu1  ;;  %10429 = vrot.lane.b32.xlu1 %v10428_v23, %s10873_s1  ;;  %v7762_v40 = vsel %vm586_vm2, %v13840_v19, %v10342_v46 }
 0xc7a   :  { %v13841_v12 = vld [vmem:[#allocation39_spill] sm:$0xff]  ;;  %v7779_v37 = vsel %vm7771_vm7, %v7762_v40, %v10352_v58 }
 0xc7b   :  { %v7761_v36 = vsel %vm586_vm2, %v13841_v12, %v10341_v50 }
 0xc7c   :  { %v7778_v39 = vsel %vm7771_vm7, %v7761_v36, %v10351_v11 }
 0xc86   :  { %v10365_v56 = vpop.permute.xlu0 %10364 }
 0xc87   :  { %v10367_v60 = vunpack.i.h.bf16 %v10365_v56  ;;  %v10366_v48 = vunpack.i.l.bf16 %v10365_v56 }
 0xc89   :  { %v7790_v55 = vsel %vm7788_vm8, %v7773_v9, %v10367_v60  ;;  %v7789_v13 = vsel %vm7788_vm8, %v7772_v52, %v10366_v48  ;;  %v13842_v52 = vld [vmem:[#allocation41_spill] sm:$0xff] }
 0xc8a   :  { %v7805_v44 = vpack.c.bf16 %v7790_v55, %v7789_v13  ;;  %v10370_v43 = vpop.permute.xlu0 %10369  ;;  %v7764_v9 = vsel %vm586_vm2, %v13842_v52, %v10357_v35  ;;  %v7763_v55 = vsel %vm586_vm2, %v13843_v7, %v10356_v16  ;;  %v9016_v52 = vld [vmem:[%s13610_s5] ss:$0 sm:$0xff] }
 0xc8b   :  { %v10372_v31 = vunpack.i.h.bf16 %v10370_v43  ;;  %v10371_v60 = vunpack.i.l.bf16 %v10370_v43 }
 0xc8c   :  { %10170 = vmatprep.mubr.msk.bf16.mxu1 %vm350_vm0, %v7805_v44 }
 0xc8d   :  { %v7781_v10 = vsel %vm7771_vm7, %v7764_v9, %v10372_v31  ;;  %v7780_v27 = vsel %vm7771_vm7, %v7763_v55, %v10371_v60  ;;  %v10461_v31 = vld [vmem:[%s13611_s6 + $0x10] sm:$0xff]  }
 0xc8e   :  { %10190 = vmatprep.subr.bf16.mxu0 %v10461_v31 }
 0xc8f   :  { %10191 = vmatpush3.bf16.msra.mxu0 %v10461_v31 }
 0xc92   :  { %v10375_v1 = vpop.permute.xlu1 %10374 }
 0xc93   :  { %v10377_v49 = vunpack.i.h.bf16 %v10375_v1  ;;  %v10376_v47 = vunpack.i.l.bf16 %v10375_v1 }
 0xc95   :  { %v7791_v41 = vsel %vm7788_vm8, %v7774_v42, %v10376_v47  ;;  %v7792_v57 = vsel %vm7788_vm8, %v7775_v20, %v10377_v49  ;;  %v13844_v47 = vld [vmem:[#allocation42_spill] sm:$0xff] }
 0xc96   :  { %v7806_v5 = vpack.c.bf16 %v7792_v57, %v7791_v41  ;;  %v10380_v59 = vpop.permute.xlu1 %10379  ;;  %v7766_v42 = vsel %vm586_vm2, %v13844_v47, %v10362_v38  ;;  %v13845_v20 = vld [vmem:[#allocation46_spill] sm:$0xff] }
 0xc97   :  { %v10382_v22 = vunpack.i.h.bf16 %v10380_v59  ;;  %v10381_v21 = vunpack.i.l.bf16 %v10380_v59  ;;  %v7765_v41 = vsel %vm586_vm2, %v13845_v20, %v10361_v61 }
 0xc98   :  { %10171 = vmatmul.mubr.msk.bf16.vlgmr.msra.gmra.mrb[12].mxu1 %vm350_vm0, %v7806_v5 }
 0xc99   :  { %v7782_v5 = vsel %vm7771_vm7, %v7765_v41, %v10381_v21  ;;  %v7783_v51 = vsel %vm7771_vm7, %v7766_v42, %v10382_v22 }
 0xc9a   :  { %v10385_v30 = vpop.permute.xlu0 %10384 }
 0xc9b   :  { %v10387_v2 = vunpack.i.h.bf16 %v10385_v30  ;;  %v10386_v63 = vunpack.i.l.bf16 %v10385_v30 }
 0xc9d   :  { %v7794_v29 = vsel %vm7788_vm8, %v7777_v25, %v10387_v2  ;;  %v7793_v26 = vsel %vm7788_vm8, %v7776_v4, %v10386_v63  ;;  %v13846_v2 = vld [vmem:[#allocation43_spill] sm:$0xff] }
 0xc9e   :  { %v7807_v17 = vpack.c.bf16 %v7794_v29, %v7793_v26  ;;  %v10390_v56 = vpop.permute.xlu0 %10389  ;;  %v13847_v4 = vld [vmem:[#allocation47_spill] sm:$0xff] }
 0xc9f   :  { %v10392_v30 = vunpack.i.h.bf16 %v10390_v56  ;;  %v10391_v28 = vunpack.i.l.bf16 %v10390_v56 }
 0xca0   :  { %10174 = vmatprep.mubr.msk.bf16.mxu1 %vm350_vm0, %v7807_v17 }
 0xca1   :  { %v7768_v63 = vsel %vm586_vm2, %v13846_v2, %v10392_v30  ;;  %v7767_v25 = vsel %vm586_vm2, %v13847_v4, %v10391_v28 }
 0xca2   :  { %v10395_v23 = vpop.permute.xlu1 %10394 }
 0xca3   :  { %v10397_v45 = vunpack.i.h.bf16 %v10395_v23  ;;  %v10396_v33 = vunpack.i.l.bf16 %v10395_v23 }
 0xca5   :  { %v7795_v24 = vsel %vm7788_vm8, %v7778_v39, %v10396_v33  ;;  %v7796_v3 = vsel %vm7788_vm8, %v7779_v37, %v10397_v45  ;;  %v13848_v45 = vld [vmem:[#allocation44_spill] sm:$0xff] }
 0xca6   :  { %v7808_v32 = vpack.c.bf16 %v7796_v3, %v7795_v24  ;;  %v10400_v15 = vpop.permute.xlu1 %10399  ;;  %v13849_v39 = vld [vmem:[#allocation48_spill] sm:$0xff] }
 0xca7   :  { %v10402_v23 = vunpack.i.h.bf16 %v10400_v15  ;;  %v10401_v19 = vunpack.i.l.bf16 %v10400_v15 }
 0xca8   :  { %10175 = vmatmul.mubr.msk.bf16.gmra.mrb[16].mxu1 %vm350_vm0, %v7808_v32 }
 0xca9   :  { %v7770_v33 = vsel %vm586_vm2, %v13848_v45, %v10402_v23  ;;  %v7769_v37 = vsel %vm586_vm2, %v13849_v39, %v10401_v19 }
 0xcaa   :  { %v10405_v48 = vpop.permute.xlu0 %10404 }
 0xcab   :  { %v10407_v13 = vunpack.i.h.bf16 %v10405_v48  ;;  %v10406_v44 = vunpack.i.l.bf16 %v10405_v48  ;;  %v10462_v48 = vld [vmem:[%s13611_s6 + $0x18] sm:$0xff]  }
 0xcac   :  { %10192 = vmatprep.subr.bf16.mxu0 %v10462_v48 }
 0xcad   :  { %v7798_v62 = vsel %vm7788_vm8, %v7781_v10, %v10407_v13  ;;  %v7797_v53 = vsel %vm7788_vm8, %v7780_v27, %v10406_v44  ;;  %10193 = vmatpush3.bf16.msra.mxu0 %v10462_v48 }
 0xcae   :  { %v7809_v1 = vpack.c.bf16 %v7798_v62, %v7797_v53  ;;  %v10410_v18 = vpop.permute.xlu0 %10409 }
 0xcaf   :  { %v10412_v0 = vunpack.i.h.bf16 %v10410_v18  ;;  %v10411_v8 = vunpack.i.l.bf16 %v10410_v18 }
 0xcb0   :  { %10178 = vmatprep.mubr.msk.bf16.mxu1 %vm350_vm0, %v7809_v1 }
 0xcb1   :  { %v7785_v59 = vsel %vm7771_vm7, %v7768_v63, %v10412_v0  ;;  %v7784_v17 = vsel %vm7771_vm7, %v7767_v25, %v10411_v8 }
 0xcb2   :  { %v10415_v49 = vpop.permute.xlu1 %10414 }
 0xcb3   :  { %v10417_v57 = vunpack.i.h.bf16 %v10415_v49  ;;  %v10416_v43 = vunpack.i.l.bf16 %v10415_v49 }
 0xcb5   :  { %v7799_v54 = vsel %vm7788_vm8, %v7782_v5, %v10416_v43  ;;  %v7800_v34 = vsel %vm7788_vm8, %v7783_v51, %v10417_v57 }
 0xcb6   :  { %v7810_v6 = vpack.c.bf16 %v7800_v34, %v7799_v54  ;;  %v10420_v46 = vpop.permute.xlu1 %10419 }
 0xcb7   :  { %v10422_v40 = vunpack.i.h.bf16 %v10420_v46  ;;  %v10421_v12 = vunpack.i.l.bf16 %v10420_v46 }
 0xcb8   :  { %10179 = vmatmul.mubr.msk.bf16.gmra.mrb[20].mxu1 %vm350_vm0, %v7810_v6 }
 0xcb9   :  { %v7786_v56 = vsel %vm7771_vm7, %v7769_v37, %v10421_v12  ;;  %v7787_v32 = vsel %vm7771_vm7, %v7770_v33, %v10422_v40 }
 0xce3   :  { %v10425_v14 = vpop.permute.xlu0 %10424 }
 0xce4   :  { %v10427_v29 = vunpack.i.h.bf16 %v10425_v14  ;;  %v10426_v26 = vunpack.i.l.bf16 %v10425_v14 }
 0xce6   :  { %v7802_v50 = vsel %vm7788_vm8, %v7785_v59, %v10427_v29  ;;  %v7801_v58 = vsel %vm7788_vm8, %v7784_v17, %v10426_v26 }
 0xce7   :  { %v7811_v11 = vpack.c.bf16 %v7802_v50, %v7801_v58 }
 0xce9   :  { %10182 = vmatprep.mubr.msk.bf16.mxu1 %vm350_vm0, %v7811_v11 }
 0xceb   :  { %v10430_v36 = vpop.permute.xlu1 %10429 }
 0xcec   :  { %v10432_v24 = vunpack.i.h.bf16 %v10430_v36  ;;  %v10431_v3 = vunpack.i.l.bf16 %v10430_v36 }
 0xcee   :  { %v7803_v35 = vsel %vm7788_vm8, %v7786_v56, %v10431_v3  ;;  %v7804_v16 = vsel %vm7788_vm8, %v7787_v32, %v10432_v24  ;;  %v10463_v56 = vld [vmem:[%s13613_s8] sm:$0xff]   ;;  %v10464_v32 = vld [vmem:[%s13613_s8 + $0x8] sm:$0xff]  }
 0xcef   :  { %v7812_v60 = vpack.c.bf16 %v7804_v16, %v7803_v35  ;;  %10210 = vmatprep.subr.bf16.mxu1 %v10463_v56  ;;  %v13430_v35 = vld [vmem:[%s13612_s7] ss:$0 sm:$0xff]  ;;  %s10880_s7 = smov [#allocation5]  }
 0xcf0   :  { %10211 = vmatpush3.bf16.msra.mxu1 %v10463_v56  ;;  %s8820_s8 = sshll.u32 %s10880_s7, 4  ;;  %s8821_s8 = int_to_ptr.vmem [resolvable:$true] %s8820_s8 }
 0xcf1   :  { %10183 = vmatmul.mubr.msk.bf16.gmra.mrb[24].mxu1 %vm350_vm0, %v7812_v60  ;;  %10212 = vmatprep.subr.bf16.mxu1 %v10464_v32  ;;  %s10839_s26 = scalar_lea.vmem %s8821_s8, 256  ;;  %p10844_p9 = scmp.lt.s32.totalorder %s8821_s8, %s8821_s8 }
 0xcf2   :  { %p10840_p8 = scmp.ne.s32.totalorder %s8821_s8, %s10839_s26  ;;  %p10845_p10 = scmp.lt.s32.totalorder %s10839_s26, %s10839_s26 }
 0xcf4   :  { %10213 = vmatpush3.bf16.msra.mxu1 %v10464_v32  ;;  %p10846_p11 = por %p10845_p10, %p10844_p9 }
 0xcf6   :  { %p10847_p12 = pnand %p10846_p11, %p10840_p8 }
 0xd6b   :  { %v10172_v9 = vpop.f32.mrb[12].mxu1 }
 0xd6c   :  { %v7910_v7 = vpop.f32.mrb[13].mxu1  ;;  %v13335_v44 = vadd.f32 %v10172_v9, %v9016_v52 }
 0xd6d   :  { %v13333_v55 = vadd.f32 %v9016_v52, %v7910_v7  ;;  %v10173_v13 = vpop.f32.mrb[14].mxu1 }
 0xd6e   :  { %v13337_v10 = vadd.f32 %v10173_v13, %v9016_v52  ;;  %v7913_v27 = vpop.f32.mrb[15].mxu1  ;;  %v7975_v38 = vmax.f32 %v13335_v44, 0.0 }
 0xd6f   :  { %v13339_v62 = vadd.f32 %v9016_v52, %v7913_v27  ;;  %v7973_v15 = vmax.f32 %v13333_v55, 0.0 }
 0xd70   :  { %v7976_v53 = vmax.f32 %v13337_v10, 0.0 }
 0xd71   :  { %v7974_v1 = vmax.f32 %v13339_v62, 0.0 }
 0xd72   :  { %v7990_v22 = vpack.c.bf16 %v7976_v53, %v7975_v38 }
 0xd73   :  { %v7989_v61 = vpack.c.bf16 %v7974_v1, %v7973_v15 }
 0xd75   :  { %10194 = vmatprep.mubr.msk.bf16.mxu0 %vm350_vm0, %v7989_v61 }
 0xd76   :  { %10195 = vmatmul.mubr.msk.bf16.vlgmr.msra.gmra.mrb[20].mxu0 %vm350_vm0, %v7990_v22 }
 0xd7b   :  { %v10176_v21 = vpop.f32.mrb[16].mxu1 }
 0xd7c   :  { %v7926_v49 = vpop.f32.mrb[17].mxu1  ;;  %v13357_v20 = vadd.f32 %v10176_v21, %v9016_v52 }
 0xd7d   :  { %v13355_v47 = vadd.f32 %v9016_v52, %v7926_v49  ;;  %v10177_v42 = vpop.f32.mrb[18].mxu1 }
 0xd7e   :  { %v13359_v41 = vadd.f32 %v10177_v42, %v9016_v52  ;;  %v7929_v57 = vpop.f32.mrb[19].mxu1  ;;  %v7979_v34 = vmax.f32 %v13357_v20, 0.0 }
 0xd7f   :  { %v13361_v43 = vadd.f32 %v9016_v52, %v7929_v57  ;;  %v7977_v51 = vmax.f32 %v13355_v47, 0.0 }
 0xd80   :  { %v13691_v5 = vmax.f32 %v13359_v41, 0.0 }
 0xd81   :  { %v7978_v54 = vmax.f32 %v13361_v43, 0.0 }
 0xd82   :  { %v7992_v18 = vpack.c.bf16 %v13691_v5, %v7979_v34 }
 0xd83   :  { %v7991_v6 = vpack.c.bf16 %v7978_v54, %v7977_v51 }
 0xd85   :  { %10198 = vmatprep.mubr.msk.bf16.mxu0 %vm350_vm0, %v7991_v6 }
 0xd86   :  { %10199 = vmatmul.mubr.msk.bf16.gmra.mrb[24].mxu0 %vm350_vm0, %v7992_v18 }
 0xd8b   :  { %v10180_v30 = vpop.f32.mrb[20].mxu1 }
 0xd8c   :  { %v7942_v28 = vpop.f32.mrb[21].mxu1  ;;  %v13379_v14 = vadd.f32 %v10180_v30, %v9016_v52 }
 0xd8d   :  { %v13377_v0 = vadd.f32 %v9016_v52, %v7942_v28  ;;  %v10181_v8 = vpop.f32.mrb[22].mxu1 }
 0xd8e   :  { %v13381_v2 = vadd.f32 %v10181_v8, %v9016_v52  ;;  %v7945_v63 = vpop.f32.mrb[23].mxu1  ;;  %v13688_v59 = vmax.f32 %v13379_v14, 0.0 }
 0xd8f   :  { %v13383_v4 = vadd.f32 %v9016_v52, %v7945_v63  ;;  %v13690_v29 = vmax.f32 %v13377_v0, 0.0 }
 0xd90   :  { %v13687_v25 = vmax.f32 %v13381_v2, 0.0 }
 0xd91   :  { %v13689_v26 = vmax.f32 %v13383_v4, 0.0 }
 0xd92   :  { %v7994_v46 = vpack.c.bf16 %v13687_v25, %v13688_v59 }
 0xd93   :  { %v7993_v17 = vpack.c.bf16 %v13689_v26, %v13690_v29 }
 0xd95   :  { %10202 = vmatprep.mubr.msk.bf16.mxu0 %vm350_vm0, %v7993_v17 }
 0xd96   :  { %10203 = vmatmul.mubr.msk.bf16.gmra.mrb[28].mxu0 %vm350_vm0, %v7994_v46 }
 0xdc4   :  { %v10184_v50 = vpop.f32.mrb[24].mxu1 }
 0xdc5   :  { %v7958_v58 = vpop.f32.mrb[25].mxu1  ;;  %v13401_v19 = vadd.f32 %v10184_v50, %v9016_v52 }
 0xdc6   :  { %v13399_v11 = vadd.f32 %v9016_v52, %v7958_v58  ;;  %v10185_v23 = vpop.f32.mrb[26].mxu1 }
 0xdc7   :  { %v13403_v40 = vadd.f32 %v10185_v23, %v9016_v52  ;;  %v7961_v12 = vpop.f32.mrb[27].mxu1  ;;  %v13684_v37 = vmax.f32 %v13401_v19, 0.0 }
 0xdc8   :  { %v13405_v36 = vadd.f32 %v9016_v52, %v7961_v12  ;;  %v13686_v33 = vmax.f32 %v13399_v11, 0.0 }
 0xdc9   :  { %v13683_v45 = vmax.f32 %v13403_v40, 0.0 }
 0xdca   :  { %v13685_v39 = vmax.f32 %v13405_v36, 0.0 }
 0xdcb   :  { %v7996_v3 = vpack.c.bf16 %v13683_v45, %v13684_v37 }
 0xdcc   :  { %v7995_v24 = vpack.c.bf16 %v13685_v39, %v13686_v33 }
 0xdce   :  { %10206 = vmatprep.mubr.msk.bf16.mxu0 %vm350_vm0, %v7995_v24 }
 0xdcf   :  { %10207 = vmatmul.mubr.msk.bf16.gmra.mrb[32].mxu0 %vm350_vm0, %v7996_v3 }
 0xe49   :  { %v10196_v16 = vpop.f32.mrb[20].mxu0 }
 0xe4a   :  { %v8103_v31 = vadd.f32 %v10196_v16, %v13430_v35  ;;  %v8094_v60 = vpop.f32.mrb[21].mxu0 }
 0xe4b   :  { %v8095_v48 = vadd.f32 %v13430_v35, %v8094_v60  ;;  %v10197_v52 = vpop.f32.mrb[22].mxu0 }
 0xe4c   :  { %10721 = vtanh.f32 %v8103_v31  ;;  %v8106_v9 = vadd.f32 %v10197_v52, %v13430_v35  ;;  %v8097_v7 = vpop.f32.mrb[23].mxu0 }
 0xe4d   :  { %10723 = vtanh.f32 %v8095_v48  ;;  %v8098_v13 = vadd.f32 %v13430_v35, %v8097_v7 }
 0xe4e   :  { %10725 = vtanh.f32 %v8106_v9 }
 0xe4f   :  { %10727 = vtanh.f32 %v8098_v13 }
 0xe56   :  { %v10722_v27 = vpop.eup %10721 }
 0xe57   :  { %v10724_v61 = vpop.eup %10723 }
 0xe58   :  { %v10726_v22 = vpop.eup %10725 }
 0xe59   :  { %v10728_v21 = vpop.eup %10727  ;;  %v8174_v49 = vpack.c.bf16 %v10726_v22, %v10722_v27  ;;  %v10200_v42 = vpop.f32.mrb[24].mxu0 }
 0xe5a   :  { %v8119_v57 = vadd.f32 %v10200_v42, %v13430_v35  ;;  %v8110_v6 = vpop.f32.mrb[25].mxu0  ;;  %v8173_v18 = vpack.c.bf16 %v10728_v21, %v10724_v61 }
 0xe5b   :  { %v8111_v30 = vadd.f32 %v13430_v35, %v8110_v6  ;;  %v10201_v28 = vpop.f32.mrb[26].mxu0 }
 0xe5c   :  { %10729 = vtanh.f32 %v8119_v57  ;;  %v8122_v8 = vadd.f32 %v10201_v28, %v13430_v35  ;;  %v8113_v63 = vpop.f32.mrb[27].mxu0  ;;  %10214 = vmatprep.mubr.msk.bf16.mxu1 %vm7771_vm7, %v8173_v18 }
 0xe5d   :  { %10731 = vtanh.f32 %v8111_v30  ;;  %v8114_v17 = vadd.f32 %v13430_v35, %v8113_v63  ;;  %10215 = vmatmul.mubr.msk.bf16.vlgmr.msra.gmra.mrb[28].mxu1 %vm7771_vm7, %v8174_v49 }
 0xe5e   :  { %10733 = vtanh.f32 %v8122_v8 }
 0xe5f   :  { %10735 = vtanh.f32 %v8114_v17 }
 0xe66   :  { %v10730_v46 = vpop.eup %10729 }
 0xe67   :  { %v10732_v50 = vpop.eup %10731 }
 0xe68   :  { %v10734_v58 = vpop.eup %10733 }
 0xe69   :  { %v10736_v23 = vpop.eup %10735  ;;  %v8176_v12 = vpack.c.bf16 %v10734_v58, %v10730_v46  ;;  %v10204_v24 = vpop.f32.mrb[28].mxu0 }
 0xe6a   :  { %v8135_v3 = vadd.f32 %v10204_v24, %v13430_v35  ;;  %v8126_v56 = vpop.f32.mrb[29].mxu0  ;;  %v8175_v32 = vpack.c.bf16 %v10736_v23, %v10732_v50 }
 0xe6b   :  { %v8127_v16 = vadd.f32 %v13430_v35, %v8126_v56  ;;  %v10205_v31 = vpop.f32.mrb[30].mxu0 }
 0xe6c   :  { %10737 = vtanh.f32 %v8135_v3  ;;  %v8138_v60 = vadd.f32 %v10205_v31, %v13430_v35  ;;  %v8129_v48 = vpop.f32.mrb[31].mxu0  ;;  %10218 = vmatprep.mubr.msk.bf16.mxu1 %vm7771_vm7, %v8175_v32 }
 0xe6d   :  { %10739 = vtanh.f32 %v8127_v16  ;;  %v8130_v52 = vadd.f32 %v13430_v35, %v8129_v48  ;;  %10219 = vmatmul.mubr.msk.bf16.gmra.mrb[32].mxu1 %vm7771_vm7, %v8176_v12 }
 0xe6e   :  { %10741 = vtanh.f32 %v8138_v60 }
 0xe6f   :  { %10743 = vtanh.f32 %v8130_v52 }
 0xe76   :  { %v10738_v9 = vpop.eup %10737 }
 0xe77   :  { %v10740_v7 = vpop.eup %10739 }
 0xe78   :  { %v10742_v13 = vpop.eup %10741 }
 0xe79   :  { %v10744_v27 = vpop.eup %10743  ;;  %v8178_v61 = vpack.c.bf16 %v10742_v13, %v10738_v9 }
 0xe7a   :  { %v8177_v22 = vpack.c.bf16 %v10744_v27, %v10740_v7 }
 0xe7c   :  { %10222 = vmatprep.mubr.msk.bf16.mxu1 %vm7771_vm7, %v8177_v22 }
 0xe7d   :  { %10223 = vmatmul.mubr.msk.bf16.gmra.mrb[36].mxu1 %vm7771_vm7, %v8178_v61 }
 0xea2   :  { %v10208_v21 = vpop.f32.mrb[32].mxu0 }
 0xea3   :  { %v8151_v49 = vadd.f32 %v10208_v21, %v13430_v35  ;;  %v8142_v42 = vpop.f32.mrb[33].mxu0 }
 0xea4   :  { %v8143_v57 = vadd.f32 %v13430_v35, %v8142_v42  ;;  %v10209_v6 = vpop.f32.mrb[34].mxu0 }
 0xea5   :  { %10745 = vtanh.f32 %v8151_v49  ;;  %v8154_v18 = vadd.f32 %v10209_v6, %v13430_v35  ;;  %v8145_v30 = vpop.f32.mrb[35].mxu0 }
 0xea6   :  { %10747 = vtanh.f32 %v8143_v57  ;;  %v8146_v28 = vadd.f32 %v13430_v35, %v8145_v30 }
 0xea7   :  { %10749 = vtanh.f32 %v8154_v18 }
 0xea8   :  { %10751 = vtanh.f32 %v8146_v28 }
 0xeaf   :  { %v10746_v8 = vpop.eup %10745 }
 0xeb0   :  { %v10748_v63 = vpop.eup %10747 }
 0xeb1   :  { %v10750_v17 = vpop.eup %10749 }
 0xeb2   :  { %v10752_v46 = vpop.eup %10751  ;;  %v8180_v50 = vpack.c.bf16 %v10750_v17, %v10746_v8 }
 0xeb3   :  { %v8179_v58 = vpack.c.bf16 %v10752_v46, %v10748_v63 }
 0xeb5   :  { %10226 = vmatprep.mubr.msk.bf16.mxu1 %vm7771_vm7, %v8179_v58 }
 0xeb6   :  { %10227 = vmatmul.mubr.msk.bf16.gmra.mrb[40].mxu1 %vm7771_vm7, %v8180_v50 }
 0xf30   :  { %v10216_v23 = vpop.f32.mrb[28].mxu1 }
 0xf31   :  { %v8333_v12 = vsel %vm8318_vm9, %v10216_v23, -inf  ;;  %v8255_v24 = vpop.f32.mrb[29].mxu1 }
 0xf32   :  { %v8334_v3 = vrot.slane %v8333_v12, 4  ;;  %v8319_v35 = vsel %vm8318_vm9, %v8255_v24, -inf  ;;  %v10217_v56 = vpop.f32.mrb[30].mxu1 }
 0xf33   :  { %v8320_v32 = vrot.slane %v8319_v35, 4  ;;  %v8340_v16 = vsel %vm8318_vm9, %v10217_v56, -inf  ;;  %v8258_v31 = vpop.f32.mrb[31].mxu1 }
 0xf34   :  { %v8335_v60 = vmax.f32 %v8333_v12, %v8334_v3  ;;  %v8341_v48 = vrot.slane %v8340_v16, 4  ;;  %v8326_v52 = vsel %vm8318_vm9, %v8258_v31, -inf }
 0xf35   :  { %v8321_v9 = vmax.f32 %v8319_v35, %v8320_v32  ;;  %v8327_v7 = vrot.slane %v8326_v52, 4 }
 0xf36   :  { %v8336_v13 = vrot.slane %v8335_v60, 2  ;;  %v8342_v27 = vmax.f32 %v8340_v16, %v8341_v48 }
 0xf37   :  { %v8322_v61 = vrot.slane %v8321_v9, 2  ;;  %v8328_v22 = vmax.f32 %v8326_v52, %v8327_v7 }
 0xf38   :  { %v8337_v21 = vmax.f32 %v8335_v60, %v8336_v13  ;;  %v8343_v49 = vrot.slane %v8342_v27, 2 }
 0xf39   :  { %v8323_v42 = vmax.f32 %v8321_v9, %v8322_v61  ;;  %v8329_v57 = vrot.slane %v8328_v22, 2 }
 0xf3a   :  { %v8338_v6 = vrot.slane %v8337_v21, 1  ;;  %v8344_v18 = vmax.f32 %v8342_v27, %v8343_v49 }
 0xf3b   :  { %v8324_v30 = vrot.slane %v8323_v42, 1  ;;  %v8330_v28 = vmax.f32 %v8328_v22, %v8329_v57 }
 0xf3c   :  { %v8339_v8 = vmax.f32 %v8337_v21, %v8338_v6  ;;  %v8345_v63 = vrot.slane %v8344_v18, 1 }
 0xf3d   :  { %v8325_v17 = vmax.f32 %v8323_v42, %v8324_v30  ;;  %v8331_v46 = vrot.slane %v8330_v28, 1 }
 0xf3e   :  { %v8433_v50 = vsub.f32 %v10216_v23, %v8339_v8  ;;  %v8346_v58 = vmax.f32 %v8344_v18, %v8345_v63 }
 0xf3f   :  { %v8431_v12 = vsub.f32 %v8255_v24, %v8325_v17  ;;  %v8332_v3 = vmax.f32 %v8330_v28, %v8331_v46 }
 0xf40   :  { %v8451_v35 = vmul.f32 1.442695, %v8433_v50  ;;  %v8434_v32 = vsub.f32 %v10217_v56, %v8346_v58  ;;  %v10220_v16 = vpop.f32.mrb[32].mxu1 }
 0xf41   :  { %v8447_v48 = vmul.f32 1.442695, %v8431_v12  ;;  %v8432_v60 = vsub.f32 %v8258_v31, %v8332_v3  ;;  %v8361_v52 = vsel %vm8318_vm9, %v10220_v16, -inf  ;;  %v8271_v9 = vpop.f32.mrb[33].mxu1 }
 0xf42   :  { %10753 = vpow2.f32 %v8451_v35  ;;  %v8453_v7 = vmul.f32 1.442695, %v8434_v32  ;;  %v8362_v13 = vrot.slane %v8361_v52, 4  ;;  %v8347_v27 = vsel %vm8318_vm9, %v8271_v9, -inf  ;;  %v10221_v61 = vpop.f32.mrb[34].mxu1 }
 0xf43   :  { %10755 = vpow2.f32 %v8447_v48  ;;  %v8449_v22 = vmul.f32 1.442695, %v8432_v60  ;;  %v8348_v23 = vrot.slane %v8347_v27, 4  ;;  %v8368_v24 = vsel %vm8318_vm9, %v10221_v61, -inf  ;;  %v8274_v21 = vpop.f32.mrb[35].mxu1 }
 0xf44   :  { %10757 = vpow2.f32 %v8453_v7  ;;  %v8363_v56 = vmax.f32 %v8361_v52, %v8362_v13  ;;  %v8369_v49 = vrot.slane %v8368_v24, 4  ;;  %v8354_v31 = vsel %vm8318_vm9, %v8274_v21, -inf }
 0xf45   :  { %10759 = vpow2.f32 %v8449_v22  ;;  %v8349_v42 = vmax.f32 %v8347_v27, %v8348_v23  ;;  %v8355_v57 = vrot.slane %v8354_v31, 4 }
 0xf46   :  { %v8364_v6 = vrot.slane %v8363_v56, 2  ;;  %v8370_v18 = vmax.f32 %v8368_v24, %v8369_v49 }
 0xf47   :  { %v8350_v30 = vrot.slane %v8349_v42, 2  ;;  %v8356_v28 = vmax.f32 %v8354_v31, %v8355_v57 }
 0xf48   :  { %v8365_v8 = vmax.f32 %v8363_v56, %v8364_v6  ;;  %v8371_v63 = vrot.slane %v8370_v18, 2 }
 0xf49   :  { %v8351_v17 = vmax.f32 %v8349_v42, %v8350_v30  ;;  %v8357_v46 = vrot.slane %v8356_v28, 2 }
 0xf4a   :  { %v8366_v50 = vrot.slane %v8365_v8, 1  ;;  %v8372_v58 = vmax.f32 %v8370_v18, %v8371_v63 }
 0xf4b   :  { %v8352_v12 = vrot.slane %v8351_v17, 1  ;;  %v8358_v3 = vmax.f32 %v8356_v28, %v8357_v46 }
 0xf4c   :  { %v13464_v35 = vpop.eup %10753  ;;  %v8367_v32 = vmax.f32 %v8365_v8, %v8366_v50  ;;  %v8373_v48 = vrot.slane %v8372_v58, 1 }
 0xf4d   :  { %v13466_v60 = vpop.eup %10755  ;;  %v8493_v52 = vsel %vm8318_vm9, %v13464_v35, 0.0  ;;  %v8353_v7 = vmax.f32 %v8351_v17, %v8352_v12  ;;  %v8359_v13 = vrot.slane %v8358_v3, 1 }
 0xf4e   :  { %v13470_v27 = vpop.eup %10757  ;;  %v8494_v22 = vrot.slane %v8493_v52, 4  ;;  %v8479_v23 = vsel %vm8318_vm9, %v13466_v60, 0.0  ;;  %v8437_v24 = vsub.f32 %v10220_v16, %v8367_v32  ;;  %v8374_v56 = vmax.f32 %v8372_v58, %v8373_v48 }
 0xf4f   :  { %v13474_v49 = vpop.eup %10759  ;;  %v8480_v31 = vrot.slane %v8479_v23, 4  ;;  %v8500_v42 = vsel %vm8318_vm9, %v13470_v27, 0.0  ;;  %v8435_v57 = vsub.f32 %v8271_v9, %v8353_v7  ;;  %v8360_v6 = vmax.f32 %v8358_v3, %v8359_v13 }
 0xf50   :  { %v8495_v18 = vadd.f32 %v8494_v22, %v8493_v52  ;;  %v8501_v30 = vrot.slane %v8500_v42, 4  ;;  %v8486_v28 = vsel %vm8318_vm9, %v13474_v49, 0.0  ;;  %v8459_v8 = vmul.f32 1.442695, %v8437_v24  ;;  %v13480_v63 = vpop.f32.mrb[36].mxu1 }
 0xf51   :  { %v8481_v17 = vadd.f32 %v8480_v31, %v8479_v23  ;;  %v8487_v46 = vrot.slane %v8486_v28, 4  ;;  %v8455_v16 = vmul.f32 1.442695, %v8435_v57  ;;  %v8438_v50 = vsub.f32 %v10221_v61, %v8374_v56  ;;  %v13482_v58 = vpop.f32.mrb[37].mxu1 }
 0xf52   :  { %v8496_v12 = vrot.slane %v8495_v18, 2  ;;  %v8502_v32 = vadd.f32 %v8501_v30, %v8500_v42  ;;  %10761 = vpow2.f32 %v8459_v8  ;;  %v8436_v48 = vsub.f32 %v8274_v21, %v8360_v6  ;;  %v13484_v9 = vpop.f32.mrb[38].mxu1 }
 0xf53   :  { %v8482_v3 = vrot.slane %v8481_v17, 2  ;;  %v8488_v52 = vadd.f32 %v8487_v46, %v8486_v28  ;;  %10763 = vpow2.f32 %v8455_v16  ;;  %v8461_v7 = vmul.f32 1.442695, %v8438_v50  ;;  %v13486_v13 = vpop.f32.mrb[39].mxu1 }
 0xf54   :  { %v8497_v22 = vadd.f32 %v8496_v12, %v8495_v18  ;;  %v8503_v24 = vrot.slane %v8502_v32, 2  ;;  %v8457_v23 = vmul.f32 1.442695, %v8436_v48  ;;  %v8389_v61 = vsel %vm8318_vm9, %v13480_v63, -inf }
 0xf55   :  { %v8483_v56 = vadd.f32 %v8482_v3, %v8481_v17  ;;  %v8489_v31 = vrot.slane %v8488_v52, 2  ;;  %10765 = vpow2.f32 %v8461_v7  ;;  %v8390_v42 = vrot.slane %v8389_v61, 4 }
 0xf56   :  { %v8498_v57 = vrot.slane %v8497_v22, 1  ;;  %v8504_v21 = vadd.f32 %v8503_v24, %v8502_v32  ;;  %10767 = vpow2.f32 %v8457_v23  ;;  %v8375_v6 = vsel %vm8318_vm9, %v13482_v58, -inf }
 0xf57   :  { %v8484_v30 = vrot.slane %v8483_v56, 1  ;;  %v8490_v28 = vadd.f32 %v8489_v31, %v8488_v52  ;;  %v8391_v8 = vmax.f32 %v8389_v61, %v8390_v42  ;;  %v8376_v46 = vrot.slane %v8375_v6, 4 }
 0xf58   :  { %v8505_v18 = vrot.slane %v8504_v21, 1  ;;  %v8396_v16 = vsel %vm8318_vm9, %v13484_v9, -inf  ;;  %v8382_v17 = vsel %vm8318_vm9, %v13486_v13, -inf  ;;  %v8499_v32 = vadd.f32 %v8498_v57, %v8497_v22 }
 0xf59   :  { %v8485_v50 = vadd.f32 %v8484_v30, %v8483_v56  ;;  %v8491_v12 = vrot.slane %v8490_v28, 1  ;;  %v8392_v48 = vrot.slane %v8391_v8, 2  ;;  %v8377_v3 = vmax.f32 %v8375_v6, %v8376_v46 }
 0xf5a   :  { %v8506_v7 = vadd.f32 %v8505_v18, %v8504_v21  ;;  %v8397_v24 = vrot.slane %v8396_v16, 4  ;;  %v8383_v23 = vrot.slane %v8382_v17, 4 }
 0xf5b   :  { %v8492_v45 = vadd.f32 %v8491_v12, %v8490_v28  ;;  %v8393_v37 = vmax.f32 %v8391_v8, %v8392_v48  ;;  %v8378_v52 = vrot.slane %v8377_v3, 2  ;;  %10769 = vrcp.f32 %v8485_v50 }
 0xf5c   :  { %v13496_v61 = vpop.eup %10761  ;;  %v8398_v31 = vmax.f32 %v8396_v16, %v8397_v24  ;;  %v8384_v42 = vmax.f32 %v8382_v17, %v8383_v23  ;;  %10771 = vrcp.f32 %v8506_v7 }
 0xf5d   :  { %v13498_v39 = vpop.eup %10763  ;;  %v8521_v56 = vsel %vm8318_vm9, %v13496_v61, 0.0  ;;  %v8394_v30 = vrot.slane %v8393_v37, 1  ;;  %v8379_v6 = vmax.f32 %v8377_v3, %v8378_v52  ;;  %10773 = vrcp.f32 %v8492_v45 }
 0xf5e   :  { %v8522_v22 = vrot.slane %v8521_v56, 4  ;;  %v8507_v57 = vsel %vm8318_vm9, %v13498_v39, 0.0  ;;  %v8399_v21 = vrot.slane %v8398_v31, 2  ;;  %v8385_v28 = vrot.slane %v8384_v42, 2 }
 0xf5f   :  { %v13504_v8 = vpop.eup %10765  ;;  %v8508_v46 = vrot.slane %v8507_v57, 4  ;;  %v8395_v18 = vmax.f32 %v8393_v37, %v8394_v30  ;;  %v8380_v16 = vrot.slane %v8379_v6, 1  ;;  %10775 = vrcp.f32 %v8499_v32 }
 0xf60   :  { %v13506_v17 = vpop.eup %10767  ;;  %v8523_v50 = vadd.f32 %v8522_v22, %v8521_v56  ;;  %v8528_v12 = vsel %vm8318_vm9, %v13504_v8, 0.0  ;;  %v8400_v48 = vmax.f32 %v8398_v31, %v8399_v21  ;;  %v8386_v45 = vmax.f32 %v8384_v42, %v8385_v28 }
 0xf61   :  { %v8509_v3 = vadd.f32 %v8508_v46, %v8507_v57  ;;  %v8529_v7 = vrot.slane %v8528_v12, 4  ;;  %v8514_v24 = vsel %vm8318_vm9, %v13506_v17, 0.0  ;;  %v8441_v23 = vsub.f32 %v13480_v63, %v8395_v18 }
 0xf62   :  { %v8524_v52 = vrot.slane %v8523_v50, 2  ;;  %v8515_v33 = vrot.slane %v8514_v24, 4  ;;  %v8381_v37 = vmax.f32 %v8379_v6, %v8380_v16  ;;  %v8401_v30 = vrot.slane %v8400_v48, 1 }
 0xf63   :  { %v8510_v32 = vrot.slane %v8509_v3, 2  ;;  %v8530_v25 = vadd.f32 %v8529_v7, %v8528_v12  ;;  %v8467_v59 = vmul.f32 1.442695, %v8441_v23  ;;  %v8387_v56 = vrot.slane %v8386_v45, 1 }
 0xf64   :  { %v8525_v22 = vadd.f32 %v8524_v52, %v8523_v50  ;;  %v8516_v26 = vadd.f32 %v8515_v33, %v8514_v24  ;;  %v8439_v31 = vsub.f32 %v13482_v58, %v8381_v37  ;;  %v8402_v42 = vmax.f32 %v8400_v48, %v8401_v30 }
 0xf65   :  { %v10770_v57 = vpop.eup %10769  ;;  %v8511_v21 = vadd.f32 %v8510_v32, %v8509_v3  ;;  %v8531_v28 = vrot.slane %v8530_v25, 2  ;;  %10777 = vpow2.f32 %v8467_v59  ;;  %v8388_v46 = vmax.f32 %v8386_v45, %v8387_v56 }
 0xf66   :  { %v10772_v29 = vpop.eup %10771  ;;  %v8526_v63 = vrot.slane %v8525_v22, 1  ;;  %v8517_v18 = vrot.slane %v8516_v26, 2  ;;  %v8463_v5 = vmul.f32 1.442695, %v8439_v31  ;;  %v8442_v6 = vsub.f32 %v13484_v9, %v8402_v42 }
 0xf67   :  { %v10774_v16 = vpop.eup %10773  ;;  %v8512_v12 = vrot.slane %v8511_v21, 1  ;;  %v8532_v7 = vadd.f32 %v8531_v28, %v8530_v25  ;;  %v8440_v50 = vsub.f32 %v13486_v13, %v8388_v46  ;;  %v8607_v33 = vmul.f32 %v10770_v57, %v13466_v60 }
 0xf68   :  { %v8527_v58 = vadd.f32 %v8526_v63, %v8525_v22  ;;  %v8518_v48 = vadd.f32 %v8517_v18, %v8516_v26  ;;  %10779 = vpow2.f32 %v8463_v5  ;;  %v8469_v3 = vmul.f32 1.442695, %v8442_v6 }
 0xf69   :  { %v10776_v24 = vpop.eup %10775  ;;  %v8513_v59 = vadd.f32 %v8512_v12, %v8511_v21  ;;  %v8533_v45 = vrot.slane %v8532_v7, 1  ;;  %v8465_v23 = vmul.f32 1.442695, %v8440_v50  ;;  %8625 = vperm.xlu0 %10433, %v8607_v33   ;;  %v8608_v52 = vmul.f32 %v10774_v16, %v13474_v49 }
 0xf6a   :  { %v8519_v37 = vrot.slane %v8518_v48, 1  ;;  %10781 = vpow2.f32 %v8469_v3  ;;  %v8610_v25 = vmul.f32 %v10772_v29, %v13470_v27  ;;  %v8609_v5 = vmul.f32 %v10776_v24, %v13464_v35 }
 0xf6b   :  { %10783 = vpow2.f32 %v8465_v23  ;;  %8630 = vperm.xlu1 %10434, %v8608_v52   ;;  %v8534_v9 = vadd.f32 %v8533_v45, %v8532_v7 }
 0xf6c   :  { %v8520_v13 = vadd.f32 %v8519_v37, %v8518_v48  ;;  %10785 = vrcp.f32 %v8513_v59 }
 0xf6d   :  { %8640 = vperm.xlu0 %10433, %v8610_v25   ;;  %10787 = vrcp.f32 %v8527_v58 }
 0xf6e   :  { %10789 = vrcp.f32 %v8520_v13 }
 0xf6f   :  { %v13520_v26 = vpop.eup %10777  ;;  %8635 = vperm.xlu1 %10434, %v8609_v5   ;;  %10791 = vrcp.f32 %v8534_v9 }
 0xf70   :  { %v8549_v60 = vsel %vm8318_vm9, %v13520_v26, 0.0 }
 0xf71   :  { %v8550_v49 = vrot.slane %v8549_v60, 4 }
 0xf72   :  { %v10780_v30 = vpop.eup %10779 }
 0xf73   :  { %v8551_v32 = vadd.f32 %v8550_v49, %v8549_v60  ;;  %v8535_v29 = vsel %vm8318_vm9, %v10780_v30, 0.0 }
 0xf74   :  { %v13525_v27 = vpop.eup %10781  ;;  %v8536_v56 = vrot.slane %v8535_v29, 4 }
 0xf75   :  { %v10784_v22 = vpop.eup %10783  ;;  %v8552_v31 = vrot.slane %v8551_v32, 2  ;;  %v8556_v35 = vsel %vm8318_vm9, %v13525_v27, 0.0 }
 0xf76   :  { %v10786_v42 = vpop.eup %10785  ;;  %v8537_v57 = vadd.f32 %v8536_v56, %v8535_v29  ;;  %v8557_v21 = vrot.slane %v8556_v35, 4  ;;  %v8542_v28 = vsel %vm8318_vm9, %v10784_v22, 0.0 }
 0xf77   :  { %v10788_v46 = vpop.eup %10787  ;;  %v8553_v63 = vadd.f32 %v8552_v31, %v8551_v32  ;;  %v8543_v18 = vrot.slane %v8542_v28, 4  ;;  %v8611_v6 = vmul.f32 %v10786_v42, %v13498_v39 }
 0xf78   :  { %v10790_v16 = vpop.eup %10789  ;;  %v8538_v12 = vrot.slane %v8537_v57, 2  ;;  %v8558_v7 = vadd.f32 %v8557_v21, %v8556_v35  ;;  %v8613_v45 = vmul.f32 %v10788_v46, %v13496_v61 }
 0xf79   :  { %v8544_v50 = vadd.f32 %v8543_v18, %v8542_v28  ;;  %8645 = vperm.xlu1 %10434, %v8611_v6   ;;  %v8612_v33 = vmul.f32 %v10790_v16, %v13506_v17  ;;  %v10792_v58 = vpop.eup %10791  ;;  %v8554_v48 = vrot.slane %v8553_v63, 1 }
 0xf7a   :  { %v8539_v3 = vadd.f32 %v8538_v12, %v8537_v57  ;;  %v8559_v24 = vrot.slane %v8558_v7, 2  ;;  %v8614_v39 = vmul.f32 %v10792_v58, %v13504_v8 }
 0xf7b   :  { %v8545_v59 = vrot.slane %v8544_v50, 2  ;;  %8650 = vperm.xlu0 %10433, %v8612_v33   ;;  %v8555_v25 = vadd.f32 %v8554_v48, %v8553_v63 }
 0xf7c   :  { %v8540_v23 = vrot.slane %v8539_v3, 1  ;;  %v8560_v52 = vadd.f32 %v8559_v24, %v8558_v7 }
 0xf7d   :  { %v8546_v37 = vadd.f32 %v8545_v59, %v8544_v50  ;;  %8655 = vperm.xlu1 %10434, %v8613_v45  }
 0xf7e   :  { %v8541_v9 = vadd.f32 %v8540_v23, %v8539_v3  ;;  %v8561_v13 = vrot.slane %v8560_v52, 1 }
 0xf7f   :  { %v8547_v5 = vrot.slane %v8546_v37, 1  ;;  %8660 = vperm.xlu0 %10433, %v8614_v39  }
 0xf80   :  { %10793 = vrcp.f32 %v8541_v9  ;;  %v8562_v17 = vadd.f32 %v8561_v13, %v8560_v52 }
 0xf81   :  { %v8548_v60 = vadd.f32 %v8547_v5, %v8546_v37  ;;  %10795 = vrcp.f32 %v8555_v25 }
 0xf83   :  { %10797 = vrcp.f32 %v8548_v60 }
 0xf84   :  { %10799 = vrcp.f32 %v8562_v17 }
 0xf89   :  { %v10228_v49 = vpop.f32.mrb[40].mxu1 }
 0xf8a   :  { %v10794_v32 = vpop.eup %10793  ;;  %v8417_v61 = vsel %vm8318_vm9, %v10228_v49, -inf  ;;  %v8303_v29 = vpop.f32.mrb[41].mxu1 }
 0xf8b   :  { %v8615_v56 = vmul.f32 %v10794_v32, %v10780_v30  ;;  %v8418_v31 = vrot.slane %v8417_v61, 4  ;;  %v8403_v8 = vsel %vm8318_vm9, %v8303_v29, -inf  ;;  %v10229_v35 = vpop.f32.mrb[42].mxu1  ;;  %v10796_v42 = vpop.eup %10795 }
 0xf8c   :  { %v8404_v57 = vrot.slane %v8403_v8, 4  ;;  %v8424_v21 = vsel %vm8318_vm9, %v10229_v35, -inf  ;;  %v8306_v28 = vpop.f32.mrb[43].mxu1  ;;  %v8617_v58 = vmul.f32 %v10796_v42, %v13520_v26 }
 0xf8d   :  { %v10798_v46 = vpop.eup %10797  ;;  %8665 = vperm.xlu1 %10434, %v8615_v56   ;;  %v8419_v63 = vmax.f32 %v8417_v61, %v8418_v31  ;;  %v8425_v18 = vrot.slane %v8424_v21, 4  ;;  %v8410_v6 = vsel %vm8318_vm9, %v8306_v28, -inf }
 0xf8e   :  { %v8616_v16 = vmul.f32 %v10798_v46, %v10784_v22  ;;  %v8405_v12 = vmax.f32 %v8403_v8, %v8404_v57  ;;  %v8411_v7 = vrot.slane %v8410_v6, 4  ;;  %v10800_v50 = vpop.eup %10799 }
 0xf8f   :  { %v8420_v30 = vrot.slane %v8419_v63, 2  ;;  %v8426_v33 = vmax.f32 %v8424_v21, %v8425_v18  ;;  %v8618_v52 = vmul.f32 %v10800_v50, %v13525_v27 }
 0xf90   :  { %8670 = vperm.xlu0 %10433, %v8616_v16   ;;  %v8406_v48 = vrot.slane %v8405_v12, 2  ;;  %v8412_v3 = vmax.f32 %v8410_v6, %v8411_v7 }
 0xf91   :  { %v8421_v24 = vmax.f32 %v8419_v63, %v8420_v30  ;;  %v8427_v59 = vrot.slane %v8426_v33, 2  ;;  %8675 = vperm.xlu1 %10434, %v8617_v58  }
 0xf92   :  { %v8407_v45 = vmax.f32 %v8405_v12, %v8406_v48  ;;  %v8413_v23 = vrot.slane %v8412_v3, 2 }
 0xf93   :  { %v8422_v37 = vrot.slane %v8421_v24, 1  ;;  %v8428_v39 = vmax.f32 %v8426_v33, %v8427_v59 }
 0xf94   :  { %v8408_v22 = vrot.slane %v8407_v45, 1  ;;  %v8414_v25 = vmax.f32 %v8412_v3, %v8413_v23  ;;  %8680 = vperm.xlu0 %10433, %v8618_v52  }
 0xf95   :  { %v8423_v9 = vmax.f32 %v8421_v24, %v8422_v37  ;;  %v8429_v13 = vrot.slane %v8428_v39, 1 }
 0xf96   :  { %v8409_v5 = vmax.f32 %v8407_v45, %v8408_v22  ;;  %v8415_v17 = vrot.slane %v8414_v25, 1 }
 0xf97   :  { %v8445_v26 = vsub.f32 %v10228_v49, %v8423_v9  ;;  %v8430_v60 = vmax.f32 %v8428_v39, %v8429_v13 }
 0xf98   :  { %v8443_v32 = vsub.f32 %v8303_v29, %v8409_v5  ;;  %v8416_v61 = vmax.f32 %v8414_v25, %v8415_v17 }
 0xf99   :  { %v8475_v56 = vmul.f32 1.442695, %v8445_v26  ;;  %v8446_v31 = vsub.f32 %v10229_v35, %v8430_v60 }
 0xf9a   :  { %v8471_v8 = vmul.f32 1.442695, %v8443_v32  ;;  %v8444_v42 = vsub.f32 %v8306_v28, %v8416_v61 }
 0xf9b   :  { %10801 = vpow2.f32 %v8475_v56  ;;  %v8477_v57 = vmul.f32 1.442695, %v8446_v31 }
 0xf9c   :  { %10803 = vpow2.f32 %v8471_v8  ;;  %v8473_v27 = vmul.f32 1.442695, %v8444_v42 }
 0xf9d   :  { %10805 = vpow2.f32 %v8477_v57 }
 0xf9e   :  { %10807 = vpow2.f32 %v8473_v27  ;;  %v13850_v27 = vlaneseq }
 0xfa5   :  { %v10802_v21 = vpop.eup %10801 }
 0xfa6   :  { %v10804_v46 = vpop.eup %10803  ;;  %v8577_v63 = vsel %vm8318_vm9, %v10802_v21, 0.0 }
 0xfa7   :  { %v10806_v18 = vpop.eup %10805  ;;  %v8578_v6 = vrot.slane %v8577_v63, 4  ;;  %v8563_v49 = vsel %vm8318_vm9, %v10804_v46, 0.0 }
 0xfa8   :  { %v10808_v29 = vpop.eup %10807  ;;  %v8564_v16 = vrot.slane %v8563_v49, 4  ;;  %v8584_v35 = vsel %vm8318_vm9, %v10806_v18, 0.0 }
 0xfa9   :  { %v8579_v12 = vadd.f32 %v8578_v6, %v8577_v63  ;;  %v8585_v28 = vrot.slane %v8584_v35, 4  ;;  %v8570_v7 = vsel %vm8318_vm9, %v10808_v29, 0.0  ;;  %v13545_v63 = vand.u32 127, %v13850_v27  ;;  %v13851_v6 = vld [vmem:[#allocation8_spill] sm:$0xff] }
 0xfaa   :  { %v8565_v50 = vadd.f32 %v8564_v16, %v8563_v49  ;;  %v8571_v30 = vrot.slane %v8570_v7, 4  ;;  %v8724_v49 = vmul.u32 8, %v13851_v6  ;;  %v8728_v16 = vadd.s32 1, %v13851_v6 }
 0xfab   :  { %v8580_v33 = vrot.slane %v8579_v12, 2  ;;  %v8586_v58 = vadd.f32 %v8585_v28, %v8584_v35 }
 0xfac   :  { %v8566_v48 = vrot.slane %v8565_v50, 2  ;;  %v8572_v3 = vadd.f32 %v8571_v30, %v8570_v7  ;;  %vm8726_vm10 = vcmp.ge.s32.totalorder %v13545_v63, %v8724_v49  ;;  %v8730_v35 = vmul.u32 8, %v8728_v16 }
 0xfad   :  { %v8581_v24 = vadd.f32 %v8580_v33, %v8579_v12  ;;  %v8587_v59 = vrot.slane %v8586_v58, 2 }
 0xfae   :  { %v8567_v45 = vadd.f32 %v8566_v48, %v8565_v50  ;;  %v8573_v23 = vrot.slane %v8572_v3, 2  ;;  %vm8732_vm11 = vcmp.lt.s32.totalorder %v13545_v63, %v8730_v35 }
 0xfaf   :  { %v8582_v52 = vrot.slane %v8581_v24, 1  ;;  %v8588_v37 = vadd.f32 %v8587_v59, %v8586_v58  ;;  %vm8734_vm12 = vmand %vm8726_vm10, %vm8732_vm11 }
 0xfb0   :  { %v8568_v39 = vrot.slane %v8567_v45, 1  ;;  %v8574_v22 = vadd.f32 %v8573_v23, %v8572_v3 }
 0xfb1   :  { %v8583_v25 = vadd.f32 %v8582_v52, %v8581_v24  ;;  %v8589_v9 = vrot.slane %v8588_v37, 1 }
 0xfb2   :  { %v8569_v13 = vadd.f32 %v8568_v39, %v8567_v45  ;;  %v8575_v5 = vrot.slane %v8574_v22, 1 }
 0xfb3   :  { %v8590_v17 = vadd.f32 %v8589_v9, %v8588_v37  ;;  %v13856_v37 = vmax.f32 %v13381_v2, 0.0 }
 0xfb4   :  { %v8576_v26 = vadd.f32 %v8575_v5, %v8574_v22  ;;  %10809 = vrcp.f32 %v8569_v13  ;;  %v13857_v13 = vmax.f32 %v13399_v11, 0.0 }
 0xfb5   :  { %10811 = vrcp.f32 %v8583_v25 }
 0xfb6   :  { %10813 = vrcp.f32 %v8576_v26 }
 0xfb7   :  { %10815 = vrcp.f32 %v8590_v17  ;;  %v13858_v17 = vmax.f32 %v13405_v36, 0.0 }
 0xfbe   :  { %v10810_v60 = vpop.eup %10809 }
 0xfbf   :  { %v10812_v32 = vpop.eup %10811  ;;  %v8619_v61 = vmul.f32 %v10810_v60, %v10804_v46  ;;  %v10879_v46 = vmov 1.0  }
 0xfc0   :  { %v10814_v56 = vpop.eup %10813  ;;  %v8621_v42 = vmul.f32 %v10812_v32, %v10802_v21  ;;  %10262 = vmatprep.mubr.msk.f32.mxu0 %vm8734_vm12, %v10879_v46 }
 0xfc1   :  { %8685 = vperm.xlu1 %10434, %v8619_v61   ;;  %v8620_v31 = vmul.f32 %v10814_v56, %v10808_v29  ;;  %v10816_v8 = vpop.eup %10815  ;;  %v13859_v56 = vmax.f32 %v13401_v19, 0.0 }
 0xfc2   :  { %v8622_v57 = vmul.f32 %v10816_v8, %v10806_v18  ;;  %v13860_v8 = vmax.f32 %v13403_v40, 0.0 }
 0xfc3   :  { %8690 = vperm.xlu0 %10433, %v8620_v31  }
 0xfc5   :  { %8695 = vperm.xlu1 %10434, %v8621_v42  }
 0xfc7   :  { %8700 = vperm.xlu0 %10433, %v8622_v57  }
 0xfe8   :  { %v8626_v21 = vpop.permute.xlu0 %8625 }
 0xfe9   :  { %v8703_v18 = vmul.f32 %v8626_v21, %v7973_v15 }
 0xfea   :  { %v8631_v29 = vpop.permute.xlu1 %8630 }
 0xfeb   :  { %v8704_v12 = vmul.f32 %v8631_v29, %v7974_v1 }
 0xfec   :  { %v8641_v28 = vpop.permute.xlu0 %8640 }
 0xfed   :  { %v10265_v7 = vpack.c.bf16 %v8704_v12, %v8703_v18  ;;  %v8706_v30 = vmul.f32 %v8641_v28, %v7976_v53  ;;  %v13852_v53 = vmax.f32 %v13359_v41, 0.0 }
 0xfee   :  { %v8636_v50 = vpop.permute.xlu1 %8635 }
 0xfef   :  { %v8705_v33 = vmul.f32 %v8636_v50, %v7975_v38  ;;  %10266 = vmatprep.subr.bf16.mxu0 %v10265_v7 }
 0xff0   :  { %10268 = vmatpush3.bf16.msra.mxu0 %v10265_v7 }
 0xff1   :  { %v10269_v58 = vpack.c.bf16 %v8706_v30, %v8705_v33 }
 0xff3   :  { %10270 = vmatprep.subr.bf16.mxu0 %v10269_v58 }
 0xff4   :  { %10272 = vmatpush3.bf16.msra.mxu0 %v10269_v58 }
 0xff8   :  { %v8646_v48 = vpop.permute.xlu1 %8645 }
 0xff9   :  { %v8707_v62 = vmul.f32 %v8646_v48, %v7977_v51  ;;  %v13853_v51 = vmax.f32 %v13377_v0, 0.0  ;;  %v8723_v0 = vadd.s32 8, %v13851_v6 }
 0xffa   :  { %v8651_v55 = vpop.permute.xlu0 %8650 }
 0xffb   :  { %v8708_v15 = vmul.f32 %v8651_v55, %v7978_v54  ;;  %v13854_v54 = vmax.f32 %v13383_v4, 0.0  ;;  %v8729_v9 = vadd.s32 1, %v8723_v0  ;;  %v8725_v2 = vmul.u32 8, %v8723_v0 }
 0xffc   :  { %v8656_v1 = vpop.permute.xlu1 %8655 }
 0xffd   :  { %v10273_v3 = vpack.c.bf16 %v8708_v15, %v8707_v62  ;;  %v8709_v44 = vmul.f32 %v8656_v1, %v7979_v34  ;;  %v13855_v34 = vmax.f32 %v13379_v14, 0.0  ;;  %v8731_v32 = vmul.u32 8, %v8729_v9 }
 0xffe   :  { %v8661_v10 = vpop.permute.xlu0 %8660  ;;  %vm8727_vm13 = vcmp.ge.s32.totalorder %v13545_v63, %v8725_v2 }
 0xfff   :  { %v8710_v38 = vmul.f32 %v8661_v10, %v13852_v53  ;;  %10274 = vmatprep.subr.bf16.mxu0 %v10273_v3  ;;  %vm8733_vm14 = vcmp.lt.s32.totalorder %v13545_v63, %v8731_v32 }
0x1000   :  { %10276 = vmatpush3.bf16.msra.mxu0 %v10273_v3  ;;  %vm8735_vm15 = vmand %vm8727_vm13, %vm8733_vm14 }
0x1001   :  { %v10277_v24 = vpack.c.bf16 %v8710_v38, %v8709_v44 }
0x1003   :  { %10278 = vmatprep.subr.bf16.mxu0 %v10277_v24 }
0x1004   :  { %10280 = vmatpush3.bf16.msra.mxu0 %v10277_v24 }
0x100c   :  { %v8666_v59 = vpop.permute.xlu1 %8665 }
0x100d   :  { %v8711_v43 = vmul.f32 %v8666_v59, %v13853_v51 }
0x100f   :  { %v8671_v47 = vpop.permute.xlu0 %8670 }
0x1010   :  { %v8712_v45 = vmul.f32 %v8671_v47, %v13854_v54  ;;  %v8676_v23 = vpop.permute.xlu1 %8675 }
0x1011   :  { %v8713_v41 = vmul.f32 %v8676_v23, %v13855_v34 }
0x1012   :  { %v10281_v52 = vpack.c.bf16 %v8712_v45, %v8711_v43 }
0x1013   :  { %v8681_v20 = vpop.permute.xlu0 %8680 }
0x1014   :  { %v8714_v39 = vmul.f32 %v8681_v20, %v13856_v37  ;;  %10282 = vmatprep.subr.bf16.mxu0 %v10281_v52 }
0x1015   :  { %10284 = vmatpush3.bf16.msra.mxu0 %v10281_v52 }
0x1016   :  { %v10285_v22 = vpack.c.bf16 %v8714_v39, %v8713_v41 }
0x1018   :  { %10286 = vmatprep.subr.bf16.mxu0 %v10285_v22 }
0x1019   :  { %10288 = vmatpush3.bf16.msra.mxu0 %v10285_v22 }
0x1040   :  { %v8686_v25 = vpop.permute.xlu1 %8685 }
0x1041   :  { %v8715_v5 = vmul.f32 %v8686_v25, %v13857_v13 }
0x1042   :  { %v8691_v4 = vpop.permute.xlu0 %8690 }
0x1043   :  { %v8716_v14 = vmul.f32 %v8691_v4, %v13858_v17 }
0x1044   :  { %v8696_v26 = vpop.permute.xlu1 %8695 }
0x1045   :  { %v10289_v60 = vpack.c.bf16 %v8716_v14, %v8715_v5  ;;  %v8717_v31 = vmul.f32 %v8696_v26, %v13859_v56 }
0x1046   :  { %v8701_v61 = vpop.permute.xlu0 %8700 }
0x1047   :  { %v8718_v42 = vmul.f32 %v8701_v61, %v13860_v8  ;;  %10290 = vmatprep.subr.bf16.mxu0 %v10289_v60 }
0x1048   :  { %10292 = vmatpush3.bf16.msra.mxu0 %v10289_v60 }
0x1049   :  { %v10293_v57 = vpack.c.bf16 %v8718_v42, %v8717_v31 }
0x104b   :  { %10294 = vmatprep.subr.bf16.mxu0 %v10293_v57 }
0x104c   :  { %10296 = vmatpush3.bf16.msra.mxu0 %v10293_v57 }
0x104f   :  { %10263 = vmatmul.mubr.msk.f32.vlgmr.msra.gmra.mrb[36].mxu0 %vm8735_vm15, %v10879_v46 }
0x1122   :  { %v10264_v11 = vpop.f32.mrb[36].mxu0 }
0x1123   :  { %8814 = vst.msk [vmem:[#allocation5 + $0x8] sm:$0xff] %vm350_vm0, %v10264_v11  ;;  %v8804_v19 = vpop.f32.mrb[37].mxu0 }
0x1124   :  { %8813 = vst.msk [vmem:[#allocation5] sm:$0xff] %vm350_vm0, %v8804_v19 }
0x1125   :  { %10850 = shalt.err (!%p10847_p12)
}
0x1126   :  { %s10851_s29 = scalar_lea.hbm %s13614_s9, 256 }
0x1127   :  { %p10852_p13 = scmp.ne.s32.totalorder %s13614_s9, %s10851_s29  ;;  %p10855_p0 = scmp.lt.u32.totalorder %s10851_s29, %s13614_s9 }
0x1129   :  { %p10857_p1 = pnand %p10855_p0, %p10852_p13 }
0x112b   :  { %10860 = shalt.err (!%p10857_p1)
}
0x112c   :  { %8826 = dma.vmem_to_hbm [thread:$0]  %s8821_s8, 256, %s13614_s9, [#allocation4], %s10866_s19, %s10866_s19, %s10867_s20  }
0x112d   :  { %10863 = dma.done.wait [#allocation4], 256  }
0x112e   :  { %10864 = vsyncadd [#allocation4], 4294967040 }
0x112f   :  { %8830 = vsyncpa [#allocation3], 1 }
0x1130   :  { %8831 = vsyncpa [#allocation4], 1 }

</bundles_post_ra>
